<compile_context>
chip_gen: v6e
topology: v6e:2x2x1
jax: 0.10.0
libtpu: 0.0.40
codegen_flags: <defaults>
</compile_context>

<pallas_src>
import jax
import jax.numpy as jnp
import numpy as np
from jax import lax
from jax.experimental import pallas as pl
from jax.experimental.pallas import tpu as pltpu


# ----------------------------------------------------------------------------
# Pallas kernel: TB attention + LSTM-cell decoder steps per grid iteration.
# ----------------------------------------------------------------------------
def attn_decoder_block_kernel(
    xt_ref,            # (TB, 1, M)       per-block input slab
    h0_ref,            # (1, M)           initial hidden
    c0_ref,            # (1, M)           initial cell
    scope_att_ref,     # (S, D_scope)     D_scope = dim_lang + 3*M
    scope_att_w_ref,   # (S, M)           scope_att @ W_att_scope (module state)
    w_att_ref,         # (M, M)           W_att_target
    b_att_ref,         # (M, 1)           b_att column (MXU scores)
    wx_ref,            # (4, M, M)        per-gate weights for xt rows of W_dec
    wh_ref,            # (4, M, M)        per-gate weights for htm1 rows
    wz_ref,            # (4, D_scope, M)  per-gate weights for zt rows
    b_dec_ref,         # (4, 1, M)        per-gate bias
    drop_ref,          # (1, M)           dropout 0/1 mask
    ct_out_ref,        # (TB, 1, M)
    ht_out_ref,        # (TB, 1, M)
    zt_out_ref,        # (TB, 1, D_scope)
    h_scr,             # VMEM (1, M)      hidden carry across grid blocks
    c_scr,             # VMEM (1, M)      cell carry across grid blocks
):
    f32 = jnp.float32
    TB = xt_ref.shape[0]

    # ---- initialize the carried state on the first time block ---------------
    @pl.when(pl.program_id(0) == 0)
    def _():
        h_scr[...] = h0_ref[...]
        c_scr[...] = c0_ref[...]

    # Small reused operands: load once per time block.
    scope_att = scope_att_ref[...]       # (S, D_scope)
    scope_att_w = scope_att_w_ref[...]   # (S, M)
    w_att = w_att_ref[...]               # (M, M)
    b_att = b_att_ref[...]               # (M, 1)
    drop = drop_ref[...]                 # (1, M)

    def step(i, carry):
        h, c = carry                     # (1, M) each, carried in vregs
        x = xt_ref[i]                    # (1, M)

        # ---- attention over the language scope ------------------------------
        h_w = jnp.dot(h, w_att, preferred_element_type=f32)          # (1, M)
        att = jnp.tanh(h_w + scope_att_w)                            # (S, M)
        scores = jnp.dot(att, b_att, preferred_element_type=f32)     # (S, 1)
        e = jnp.exp(scores - jnp.max(scores))                        # (S, 1)
        inv_s = 1.0 / jnp.sum(e)
        zt = jnp.sum(e * scope_att, axis=0, keepdims=True) * inv_s   # (1, D_scope)

        # ---- LSTM-style decoder cell: per-gate lane-aligned dots -------------
        def gate_pre(g):                 # static g -> free ref slicing
            return (jnp.dot(x, wx_ref[g], preferred_element_type=f32)
                    + jnp.dot(h, wh_ref[g], preferred_element_type=f32)
                    + jnp.dot(zt, wz_ref[g], preferred_element_type=f32)
                    + b_dec_ref[g])                                  # (1, M)

        g_in = jax.nn.sigmoid(gate_pre(0))
        g_fg = jax.nn.sigmoid(gate_pre(1))
        g_out = jax.nn.sigmoid(gate_pre(2))
        g_c = jnp.tanh(gate_pre(3))

        ct = g_fg * c + g_in * g_c
        ht = g_out * jnp.tanh(ct)
        ht_drop = ht * drop

        ct_out_ref[i] = ct
        ht_out_ref[i] = ht_drop
        zt_out_ref[i] = zt
        return (ht_drop, ct)

    h_fin, c_fin = lax.fori_loop(0, TB, step, (h_scr[...], c_scr[...]),
                                 unroll=True)

    # ---- carry the recurrence to the next time block -------------------------
    h_scr[...] = h_fin
    c_scr[...] = c_fin


# ----------------------------------------------------------------------------
# One-time parameter preparation (hoisted out of the per-call path)
# ----------------------------------------------------------------------------
def prepare_params(params):
    M = params["dim_model"]
    f32 = jnp.float32
    W_dec = params["W_dec"].astype(f32)              # (dim_lang + 5M, 4M)
    Wx = W_dec[:M, :]                                # rows that multiply xt
    Wh = W_dec[M:2 * M, :]                           # rows that multiply htm1
    Wz = W_dec[2 * M:, :]                            # rows that multiply zt

    def split_gates(W):                              # (K, 4M) -> (4, K, M)
        return jnp.stack([W[:, g * M:(g + 1) * M] for g in range(4)], axis=0)

    return {
        "dim_model": M,
        "scope_att": params["scope_att"].astype(f32),
        "scope_att_times_W": params["scope_att_times_W"].astype(f32),
        "W_att_target": params["W_att_target"].astype(f32),
        "b_att_col": params["b_att"].reshape(M, 1).astype(f32),
        "W_dec_x_g": split_gates(Wx),                # (4, M, M)
        "W_dec_h_g": split_gates(Wh),                # (4, M, M)
        "W_dec_z_g": split_gates(Wz),                # (4, D_scope, M)
        "b_dec_g": params["b_dec"].reshape(4, 1, M).astype(f32),
        "drop_row": params["drop_mask"].reshape(1, M).astype(f32),
    }


# ----------------------------------------------------------------------------
# Wrappers
# ----------------------------------------------------------------------------
def attn_decoder_decode(xt_seq, htm1, ctm1, prep, *, block_steps=8):
    """Run T recurrent decoder steps in ONE pallas_call, TB steps per grid block.

    xt_seq: (T, 1, 1, M); htm1/ctm1: (1, 1, M).
    Returns per-step (ct_seq, ht_dropout_seq, zt_seq) with leading T axis.
    """
    M = prep["dim_model"]
    S, D_scope = prep["scope_att"].shape
    T = xt_seq.shape[0]
    f32 = jnp.float32

    TB = max(1, min(block_steps, T))
    n_blocks = pl.cdiv(T, TB)
    T_pad = n_blocks * TB

    xt3 = xt_seq.reshape(T, 1, M).astype(f32)
    if T_pad != T:
        # Trailing pad steps run through the recurrence but their outputs are
        # discarded below; padding sits after all real steps.
        xt3 = jnp.concatenate([xt3, jnp.zeros((T_pad - T, 1, M), f32)], axis=0)
    h0 = htm1.reshape(1, M).astype(f32)
    c0 = ctm1.reshape(1, M).astype(f32)

    grid_spec = pltpu.PrefetchScalarGridSpec(
        num_scalar_prefetch=0,
        grid=(n_blocks,),
        in_specs=[
            pl.BlockSpec((TB, 1, M), lambda b: (b, 0, 0)),         # xt slab
            pl.BlockSpec((1, M), lambda b: (0, 0)),                # h0 (resident)
            pl.BlockSpec((1, M), lambda b: (0, 0)),                # c0 (resident)
            pl.BlockSpec((S, D_scope), lambda b: (0, 0)),          # scope_att
            pl.BlockSpec((S, M), lambda b: (0, 0)),                # scope_att @ W_att_scope
            pl.BlockSpec((M, M), lambda b: (0, 0)),                # W_att_target
            pl.BlockSpec((M, 1), lambda b: (0, 0)),                # b_att column
            pl.BlockSpec((4, M, M), lambda b: (0, 0, 0)),          # W_dec x-gates
            pl.BlockSpec((4, M, M), lambda b: (0, 0, 0)),          # W_dec h-gates
            pl.BlockSpec((4, D_scope, M), lambda b: (0, 0, 0)),    # W_dec z-gates
            pl.BlockSpec((4, 1, M), lambda b: (0, 0, 0)),          # b_dec per gate
            pl.BlockSpec((1, M), lambda b: (0, 0)),                # dropout mask
        ],
        out_specs=[
            pl.BlockSpec((TB, 1, M), lambda b: (b, 0, 0)),         # ct
            pl.BlockSpec((TB, 1, M), lambda b: (b, 0, 0)),         # ht_dropout
            pl.BlockSpec((TB, 1, D_scope), lambda b: (b, 0, 0)),   # zt
        ],
        scratch_shapes=[pltpu.VMEM((1, M), f32),   # h carry
                        pltpu.VMEM((1, M), f32)],  # c carry
    )

    ct_seq, ht_seq, zt_seq = pl.pallas_call(
        attn_decoder_block_kernel,
        out_shape=(jax.ShapeDtypeStruct((T_pad, 1, M), f32),
                   jax.ShapeDtypeStruct((T_pad, 1, M), f32),
                   jax.ShapeDtypeStruct((T_pad, 1, D_scope), f32)),
        grid_spec=grid_spec,
        compiler_params=pltpu.CompilerParams(
            dimension_semantics=("arbitrary",)),    # sequential recurrence over t
    )(xt3, h0, c0,
      prep["scope_att"], prep["scope_att_times_W"], prep["W_att_target"],
      prep["b_att_col"], prep["W_dec_x_g"], prep["W_dec_h_g"],
      prep["W_dec_z_g"], prep["b_dec_g"], prep["drop_row"])

    return (ct_seq[:T].reshape(T, 1, 1, M),
            ht_seq[:T].reshape(T, 1, 1, M),
            zt_seq[:T].reshape(T, 1, 1, D_scope))


def attn_decoder_forward(xt, htm1, ctm1, prep):
    """Single step, PyTorch-shaped: (ct, ht_dropout, zt) as (1,1,M)/(1,1,M)/(1,1,D_scope)."""
    M = prep["dim_model"]
    ct, ht, zt = attn_decoder_decode(xt.reshape(1, 1, 1, M), htm1, ctm1, prep,
                                     block_steps=1)
    return ct[0], ht[0], zt[0]


# ----------------------------------------------------------------------------
# Pure-JAX references (correctness checks)
# ----------------------------------------------------------------------------
def reference_forward(xt, htm1, ctm1, params):
    M = params["dim_model"]
    scope_att = params["scope_att"]
    scope_att_w = params["scope_att_times_W"]
    h = htm1.reshape(1, M)
    c = ctm1.reshape(1, M)
    x = xt.reshape(1, M)

    att = jnp.tanh(h @ params["W_att_target"] + scope_att_w)
    scores = (att @ params["b_att"]).reshape(-1)
    e = jnp.exp(scores - jnp.max(scores))
    w = e / jnp.sum(e)
    zt = w.reshape(1, -1) @ scope_att
    inp = jnp.concatenate([x, h, zt], axis=1)
    pre = (inp @ params["W_dec"] + params["b_dec"]).reshape(-1)
    gi = jax.nn.sigmoid(pre[:M])
    gf = jax.nn.sigmoid(pre[M:2 * M])
    go = jax.nn.sigmoid(pre[2 * M:3 * M])
    gc = jnp.tanh(pre[3 * M:])
    ct = gf * c + gi * gc
    ht = go * jnp.tanh(ct) * params["drop_mask"].reshape(1, M)
    return ct, ht, zt


def reference_decode(xt_seq, htm1, ctm1, params):
    h, c = htm1, ctm1
    cts, hts, zts = [], [], []
    for t in range(xt_seq.shape[0]):
        ct, ht, zt = reference_forward(xt_seq[t], h, c, params)
        cts.append(ct)
        hts.append(ht)
        zts.append(zt)
        h, c = ht, ct                      # same recurrence as the kernel
    return jnp.stack(cts), jnp.stack(hts), jnp.stack(zts)


# ----------------------------------------------------------------------------
# Deterministic parameter / input construction
# ----------------------------------------------------------------------------
def make_params(key, *, dim_model, dim_lang, seq_lang_length, dropout_p):
    M = dim_model
    D_scope = dim_lang + 3 * M
    D_dec_in = dim_lang + 5 * M
    ks = jax.random.split(key, 8)

    def sample_weights(k, n_in, n_out):
        bound = np.sqrt(6.0 / (n_in + n_out))
        return jax.random.uniform(k, (n_in, n_out), jnp.float32, -bound, bound)

    W_att_target = sample_weights(ks[0], M, M)
    W_att_scope = sample_weights(ks[1], D_scope, M)
    # b_att / b_dec are zero-initialized in the module; small random values here
    # so the bias paths are actually exercised by the check.
    b_att = 0.1 * jax.random.normal(ks[5], (M, 1), jnp.float32)
    W_dec = sample_weights(ks[2], D_dec_in, 4 * M)
    b_dec = 0.1 * jax.random.normal(ks[6], (4 * M,), jnp.float32)

    # module state set outside __init__ in the original code
    scope_att = jax.random.normal(ks[3], (seq_lang_length, D_scope), jnp.float32)
    scope_att_times_W = scope_att @ W_att_scope

    # drop_out_layer_gen = (rand(M) < p) 0/1 mask (no rescaling, as in the torch code)
    ren_gen = jax.random.uniform(ks[4], (M,), jnp.float32)
    drop_mask = (ren_gen < dropout_p).astype(jnp.float32)

    return {
        "dim_model": M,
        "scope_att": scope_att,
        "scope_att_times_W": scope_att_times_W,
        "W_att_target": W_att_target,
        "b_att": b_att,
        "W_dec": W_dec,
        "b_dec": b_dec,
        "drop_mask": drop_mask,
    }


if __name__ == "__main__":
    dim_model = 32
    dim_lang = 16
    seq_lang_length = 8
    dropout_p = 0.5
    T = 8                                   # decode steps in one pallas_call

    key = jax.random.PRNGKey(0)
    k_par, k_xs, k_h, k_c = jax.random.split(key, 4)

    params = make_params(k_par, dim_model=dim_model, dim_lang=dim_lang,
                         seq_lang_length=seq_lang_length, dropout_p=dropout_p)
    prep = prepare_params(params)           # hoisted casts / weight re-layout (once)

    xt_seq = jax.random.normal(k_xs, (T, 1, 1, dim_model), jnp.float32)
    htm1 = jax.random.normal(k_h, (1, 1, dim_model), jnp.float32)
    ctm1 = jax.random.normal(k_c, (1, 1, dim_model), jnp.float32)

    # ---- fused multi-step decode: 2 grid blocks x 4 steps each ---------------
    # (block_steps < T exercises the cross-block VMEM h/c carry)
    ct_seq, ht_seq, zt_seq = attn_decoder_decode(xt_seq, htm1, ctm1, prep,
                                                 block_steps=4)
    jax.block_until_ready((ct_seq, ht_seq, zt_seq))

    ct_r, ht_r, zt_r = reference_decode(xt_seq, htm1, ctm1, params)
    np.testing.assert_allclose(np.asarray(ct_seq).reshape(T, -1),
                               np.asarray(ct_r).reshape(T, -1),
                               rtol=1e-5, atol=1e-5)
    np.testing.assert_allclose(np.asarray(ht_seq).reshape(T, -1),
                               np.asarray(ht_r).reshape(T, -1),
                               rtol=1e-5, atol=1e-5)
    np.testing.assert_allclose(np.asarray(zt_seq).reshape(T, -1),
                               np.asarray(zt_r).reshape(T, -1),
                               rtol=1e-5, atol=1e-5)

    # ---- single-step path (exact PyTorch forward shapes) ---------------------
    ct1, ht1, zt1 = attn_decoder_forward(xt_seq[0], htm1, ctm1, prep)
    jax.block_until_ready((ct1, ht1, zt1))
    ct1_r, ht1_r, zt1_r = reference_forward(xt_seq[0], htm1, ctm1, params)
    np.testing.assert_allclose(np.asarray(ct1).reshape(1, -1), np.asarray(ct1_r),
                               rtol=1e-5, atol=1e-5)
    np.testing.assert_allclose(np.asarray(ht1).reshape(1, -1), np.asarray(ht1_r),
                               rtol=1e-5, atol=1e-5)
    np.testing.assert_allclose(np.asarray(zt1).reshape(1, -1), np.asarray(zt1_r),
                               rtol=1e-5, atol=1e-5)

    print("KERNEL_OK")
</pallas_src>

<mosaic_0001>
module attributes {stable_mosaic.version = 11 : i64} {
  func.func @attn_decoder_block_kernel(%arg0: i32, %arg1: memref<4x1x32xf32, #tpu.memory_space<vmem>>, %arg2: memref<1x32xf32, #tpu.memory_space<vmem>>, %arg3: memref<1x32xf32, #tpu.memory_space<vmem>>, %arg4: memref<8x112xf32, #tpu.memory_space<vmem>>, %arg5: memref<8x32xf32, #tpu.memory_space<vmem>>, %arg6: memref<32x32xf32, #tpu.memory_space<vmem>>, %arg7: memref<32x1xf32, #tpu.memory_space<vmem>>, %arg8: memref<4x32x32xf32, #tpu.memory_space<vmem>>, %arg9: memref<4x32x32xf32, #tpu.memory_space<vmem>>, %arg10: memref<4x112x32xf32, #tpu.memory_space<vmem>>, %arg11: memref<4x1x32xf32, #tpu.memory_space<vmem>>, %arg12: memref<1x32xf32, #tpu.memory_space<vmem>>, %arg13: memref<4x1x32xf32, #tpu.memory_space<vmem>>, %arg14: memref<4x1x32xf32, #tpu.memory_space<vmem>>, %arg15: memref<4x1x112xf32, #tpu.memory_space<vmem>>, %arg16: memref<1x32xf32, #tpu.memory_space<vmem>>, %arg17: memref<1x32xf32, #tpu.memory_space<vmem>>) attributes {dimension_semantics = [#tpu.dimension_semantics<arbitrary>], iteration_bounds = array<i64: 2>, scalar_prefetch = 0 : i64, scratch_operands = 2 : i64, tpu.core_type = #tpu.core_type<tc>, window_params = [{transform_indices = @transform_0, window_bounds = array<i64: 4, 1, 32>}, {pipeline_mode = #tpu.pipeline_mode<synchronous>, transform_indices = @transform_1, window_bounds = array<i64: 1, 32>}, {pipeline_mode = #tpu.pipeline_mode<synchronous>, transform_indices = @transform_2, window_bounds = array<i64: 1, 32>}, {pipeline_mode = #tpu.pipeline_mode<synchronous>, transform_indices = @transform_3, window_bounds = array<i64: 8, 112>}, {pipeline_mode = #tpu.pipeline_mode<synchronous>, transform_indices = @transform_4, window_bounds = array<i64: 8, 32>}, {pipeline_mode = #tpu.pipeline_mode<synchronous>, transform_indices = @transform_5, window_bounds = array<i64: 32, 32>}, {pipeline_mode = #tpu.pipeline_mode<synchronous>, transform_indices = @transform_6, window_bounds = array<i64: 32, 1>}, {pipeline_mode = #tpu.pipeline_mode<synchronous>, transform_indices = @transform_7, window_bounds = array<i64: 4, 32, 32>}, {pipeline_mode = #tpu.pipeline_mode<synchronous>, transform_indices = @transform_8, window_bounds = array<i64: 4, 32, 32>}, {pipeline_mode = #tpu.pipeline_mode<synchronous>, transform_indices = @transform_9, window_bounds = array<i64: 4, 112, 32>}, {pipeline_mode = #tpu.pipeline_mode<synchronous>, transform_indices = @transform_10, window_bounds = array<i64: 4, 1, 32>}, {pipeline_mode = #tpu.pipeline_mode<synchronous>, transform_indices = @transform_11, window_bounds = array<i64: 1, 32>}, {transform_indices = @transform_12, window_bounds = array<i64: 4, 1, 32>}, {transform_indices = @transform_13, window_bounds = array<i64: 4, 1, 32>}, {transform_indices = @transform_14, window_bounds = array<i64: 4, 1, 112>}]} {
    %c0_i32 = arith.constant 0 : i32
    %0 = arith.cmpi eq, %arg0, %c0_i32 : i32
    %1 = arith.extui %0 : i1 to i32
    %c0_i32_0 = arith.constant 0 : i32
    %2 = arith.cmpi ne, %1, %c0_i32_0 : i32
    scf.if %2 {
      %c0_323 = arith.constant 0 : index
      %c0_324 = arith.constant 0 : index
      %476 = vector.load %arg2[%c0_323, %c0_324] : memref<1x32xf32, #tpu.memory_space<vmem>>, vector<1x32xf32>
      %c0_325 = arith.constant 0 : index
      %c0_326 = arith.constant 0 : index
      %477 = vector.load %arg16[%c0_325, %c0_326] : memref<1x32xf32, #tpu.memory_space<vmem>>, vector<1x32xf32>
      tpu.vector_store %arg16[%c0_325, %c0_326], %476 {strides = array<i32>} : memref<1x32xf32, #tpu.memory_space<vmem>>, vector<1x32xf32>,
      %c0_327 = arith.constant 0 : index
      %c0_328 = arith.constant 0 : index
      %478 = vector.load %arg3[%c0_327, %c0_328] : memref<1x32xf32, #tpu.memory_space<vmem>>, vector<1x32xf32>
      %c0_329 = arith.constant 0 : index
      %c0_330 = arith.constant 0 : index
      %479 = vector.load %arg17[%c0_329, %c0_330] : memref<1x32xf32, #tpu.memory_space<vmem>>, vector<1x32xf32>
      tpu.vector_store %arg17[%c0_329, %c0_330], %478 {strides = array<i32>} : memref<1x32xf32, #tpu.memory_space<vmem>>, vector<1x32xf32>,
    } else {
    }
    %c0 = arith.constant 0 : index
    %c0_1 = arith.constant 0 : index
    %3 = vector.load %arg4[%c0, %c0_1] : memref<8x112xf32, #tpu.memory_space<vmem>>, vector<8x112xf32>
    %c0_2 = arith.constant 0 : index
    %c0_3 = arith.constant 0 : index
    %4 = vector.load %arg5[%c0_2, %c0_3] : memref<8x32xf32, #tpu.memory_space<vmem>>, vector<8x32xf32>
    %c0_4 = arith.constant 0 : index
    %c0_5 = arith.constant 0 : index
    %5 = vector.load %arg6[%c0_4, %c0_5] : memref<32x32xf32, #tpu.memory_space<vmem>>, vector<32x32xf32>
    %c0_6 = arith.constant 0 : index
    %c0_7 = arith.constant 0 : index
    %6 = vector.load %arg7[%c0_6, %c0_7] : memref<32x1xf32, #tpu.memory_space<vmem>>, vector<32x1xf32>
    %c0_8 = arith.constant 0 : index
    %c0_9 = arith.constant 0 : index
    %7 = vector.load %arg12[%c0_8, %c0_9] : memref<1x32xf32, #tpu.memory_space<vmem>>, vector<1x32xf32>
    %c0_10 = arith.constant 0 : index
    %c0_11 = arith.constant 0 : index
    %8 = vector.load %arg16[%c0_10, %c0_11] : memref<1x32xf32, #tpu.memory_space<vmem>>, vector<1x32xf32>
    %c0_12 = arith.constant 0 : index
    %c0_13 = arith.constant 0 : index
    %9 = vector.load %arg17[%c0_12, %c0_13] : memref<1x32xf32, #tpu.memory_space<vmem>>, vector<1x32xf32>
    %c0_i32_14 = arith.constant 0 : i32
    %10 = arith.index_cast %c0_i32_14 : i32 to index
    %c0_15 = arith.constant 0 : index
    %c0_16 = arith.constant 0 : index
    %11 = vector.load %arg1[%10, %c0_15, %c0_16] : memref<4x1x32xf32, #tpu.memory_space<vmem>>, vector<1x1x32xf32>
    %12 = vector.shape_cast %11 : vector<1x1x32xf32> to vector<1x32xf32>
    %cst = arith.constant dense<0.000000e+00> : vector<1x32xf32>
    %13 = tpu.matmul %8, %5, %cst {dimension_numbers = #tpu.dot_dimension_numbers<[1], [0], [0], [1], [0, 0, 1, 1], [], []>} : vector<1x32xf32>, vector<32x32xf32>, vector<1x32xf32> -> vector<1x32xf32>
    %14 = vector.broadcast %13 : vector<1x32xf32> to vector<8x32xf32>
    %15 = arith.addf %14, %4 : vector<8x32xf32>
    %16 = math.tanh %15 : vector<8x32xf32>
    %cst_17 = arith.constant dense<0.000000e+00> : vector<8x1xf32>
    %17 = tpu.matmul %16, %6, %cst_17 {dimension_numbers = #tpu.dot_dimension_numbers<[1], [0], [0], [1], [0, 0, 1, 1], [], []>} : vector<8x32xf32>, vector<32x1xf32>, vector<8x1xf32> -> vector<8x1xf32>
    %18 = vector.shape_cast %17 : vector<8x1xf32> to vector<1x8x1xf32>
    %cst_18 = arith.constant dense<0xFF800000> : vector<1xf32>
    %19 = vector.multi_reduction <maximumf>, %18, %cst_18 [1, 2] : vector<1x8x1xf32> to vector<1xf32>
    %20 = vector.shape_cast %19 : vector<1xf32> to vector<1x1x1xf32>
    %21 = vector.extract %20[0, 0, 0] : f32 from vector<1x1x1xf32>
    %22 = vector.broadcast %21 : f32 to vector<8x1xf32>
    %23 = arith.subf %17, %22 : vector<8x1xf32>
    %24 = math.exp %23 : vector<8x1xf32>
    %25 = vector.shape_cast %24 : vector<8x1xf32> to vector<1x8x1xf32>
    %cst_19 = arith.constant dense<0.000000e+00> : vector<1xf32>
    %26 = vector.multi_reduction <add>, %25, %cst_19 [1, 2] : vector<1x8x1xf32> to vector<1xf32>
    %27 = vector.shape_cast %26 : vector<1xf32> to vector<1x1x1xf32>
    %28 = vector.extract %27[0, 0, 0] : f32 from vector<1x1x1xf32>
    %cst_20 = arith.constant 1.000000e+00 : f32
    %29 = arith.divf %cst_20, %28 : f32
    %30 = vector.broadcast %24 : vector<8x1xf32> to vector<8x112xf32>
    %31 = arith.mulf %30, %3 : vector<8x112xf32>
    %cst_21 = arith.constant dense<0.000000e+00> : vector<112xf32>
    %32 = vector.multi_reduction <add>, %31, %cst_21 [0] : vector<8x112xf32> to vector<112xf32>
    %33 = vector.shape_cast %32 : vector<112xf32> to vector<1x112xf32>
    %34 = vector.broadcast %29 : f32 to vector<1x112xf32>
    %35 = arith.mulf %33, %34 : vector<1x112xf32>
    %c0_22 = arith.constant 0 : index
    %c0_23 = arith.constant 0 : index
    %c0_24 = arith.constant 0 : index
    %36 = vector.load %arg8[%c0_22, %c0_23, %c0_24] : memref<4x32x32xf32, #tpu.memory_space<vmem>>, vector<1x32x32xf32>
    %37 = vector.shape_cast %36 : vector<1x32x32xf32> to vector<32x32xf32>
    %cst_25 = arith.constant dense<0.000000e+00> : vector<1x32xf32>
    %38 = tpu.matmul %12, %37, %cst_25 {dimension_numbers = #tpu.dot_dimension_numbers<[1], [0], [0], [1], [0, 0, 1, 1], [], []>} : vector<1x32xf32>, vector<32x32xf32>, vector<1x32xf32> -> vector<1x32xf32>
    %c0_26 = arith.constant 0 : index
    %c0_27 = arith.constant 0 : index
    %c0_28 = arith.constant 0 : index
    %39 = vector.load %arg9[%c0_26, %c0_27, %c0_28] : memref<4x32x32xf32, #tpu.memory_space<vmem>>, vector<1x32x32xf32>
    %40 = vector.shape_cast %39 : vector<1x32x32xf32> to vector<32x32xf32>
    %cst_29 = arith.constant dense<0.000000e+00> : vector<1x32xf32>
    %41 = tpu.matmul %8, %40, %cst_29 {dimension_numbers = #tpu.dot_dimension_numbers<[1], [0], [0], [1], [0, 0, 1, 1], [], []>} : vector<1x32xf32>, vector<32x32xf32>, vector<1x32xf32> -> vector<1x32xf32>
    %42 = arith.addf %38, %41 : vector<1x32xf32>
    %c0_30 = arith.constant 0 : index
    %c0_31 = arith.constant 0 : index
    %c0_32 = arith.constant 0 : index
    %43 = vector.load %arg10[%c0_30, %c0_31, %c0_32] : memref<4x112x32xf32, #tpu.memory_space<vmem>>, vector<1x112x32xf32>
    %44 = vector.shape_cast %43 : vector<1x112x32xf32> to vector<112x32xf32>
    %cst_33 = arith.constant dense<0.000000e+00> : vector<1x32xf32>
    %45 = tpu.matmul %35, %44, %cst_33 {dimension_numbers = #tpu.dot_dimension_numbers<[1], [0], [0], [1], [0, 0, 1, 1], [], []>} : vector<1x112xf32>, vector<112x32xf32>, vector<1x32xf32> -> vector<1x32xf32>
    %46 = arith.addf %42, %45 : vector<1x32xf32>
    %c0_34 = arith.constant 0 : index
    %c0_35 = arith.constant 0 : index
    %c0_36 = arith.constant 0 : index
    %47 = vector.load %arg11[%c0_34, %c0_35, %c0_36] : memref<4x1x32xf32, #tpu.memory_space<vmem>>, vector<1x1x32xf32>
    %48 = vector.shape_cast %47 : vector<1x1x32xf32> to vector<1x32xf32>
    %49 = arith.addf %46, %48 : vector<1x32xf32>
    %50 = arith.negf %49 : vector<1x32xf32>
    %51 = math.exp %50 : vector<1x32xf32>
    %cst_37 = arith.constant 1.000000e+00 : f32
    %52 = vector.broadcast %cst_37 : f32 to vector<1x32xf32>
    %53 = arith.addf %52, %51 : vector<1x32xf32>
    %54 = arith.divf %52, %53 : vector<1x32xf32>
    %c1 = arith.constant 1 : index
    %c0_38 = arith.constant 0 : index
    %c0_39 = arith.constant 0 : index
    %55 = vector.load %arg8[%c1, %c0_38, %c0_39] : memref<4x32x32xf32, #tpu.memory_space<vmem>>, vector<1x32x32xf32>
    %56 = vector.shape_cast %55 : vector<1x32x32xf32> to vector<32x32xf32>
    %cst_40 = arith.constant dense<0.000000e+00> : vector<1x32xf32>
    %57 = tpu.matmul %12, %56, %cst_40 {dimension_numbers = #tpu.dot_dimension_numbers<[1], [0], [0], [1], [0, 0, 1, 1], [], []>} : vector<1x32xf32>, vector<32x32xf32>, vector<1x32xf32> -> vector<1x32xf32>
    %c1_41 = arith.constant 1 : index
    %c0_42 = arith.constant 0 : index
    %c0_43 = arith.constant 0 : index
    %58 = vector.load %arg9[%c1_41, %c0_42, %c0_43] : memref<4x32x32xf32, #tpu.memory_space<vmem>>, vector<1x32x32xf32>
    %59 = vector.shape_cast %58 : vector<1x32x32xf32> to vector<32x32xf32>
    %cst_44 = arith.constant dense<0.000000e+00> : vector<1x32xf32>
    %60 = tpu.matmul %8, %59, %cst_44 {dimension_numbers = #tpu.dot_dimension_numbers<[1], [0], [0], [1], [0, 0, 1, 1], [], []>} : vector<1x32xf32>, vector<32x32xf32>, vector<1x32xf32> -> vector<1x32xf32>
    %61 = arith.addf %57, %60 : vector<1x32xf32>
    %c1_45 = arith.constant 1 : index
    %c0_46 = arith.constant 0 : index
    %c0_47 = arith.constant 0 : index
    %62 = vector.load %arg10[%c1_45, %c0_46, %c0_47] : memref<4x112x32xf32, #tpu.memory_space<vmem>>, vector<1x112x32xf32>
    %63 = vector.shape_cast %62 : vector<1x112x32xf32> to vector<112x32xf32>
    %cst_48 = arith.constant dense<0.000000e+00> : vector<1x32xf32>
    %64 = tpu.matmul %35, %63, %cst_48 {dimension_numbers = #tpu.dot_dimension_numbers<[1], [0], [0], [1], [0, 0, 1, 1], [], []>} : vector<1x112xf32>, vector<112x32xf32>, vector<1x32xf32> -> vector<1x32xf32>
    %65 = arith.addf %61, %64 : vector<1x32xf32>
    %c1_49 = arith.constant 1 : index
    %c0_50 = arith.constant 0 : index
    %c0_51 = arith.constant 0 : index
    %66 = vector.load %arg11[%c1_49, %c0_50, %c0_51] : memref<4x1x32xf32, #tpu.memory_space<vmem>>, vector<1x1x32xf32>
    %67 = vector.shape_cast %66 : vector<1x1x32xf32> to vector<1x32xf32>
    %68 = arith.addf %65, %67 : vector<1x32xf32>
    %69 = arith.negf %68 : vector<1x32xf32>
    %70 = math.exp %69 : vector<1x32xf32>
    %cst_52 = arith.constant 1.000000e+00 : f32
    %71 = vector.broadcast %cst_52 : f32 to vector<1x32xf32>
    %72 = arith.addf %71, %70 : vector<1x32xf32>
    %73 = arith.divf %71, %72 : vector<1x32xf32>
    %c2 = arith.constant 2 : index
    %c0_53 = arith.constant 0 : index
    %c0_54 = arith.constant 0 : index
    %74 = vector.load %arg8[%c2, %c0_53, %c0_54] : memref<4x32x32xf32, #tpu.memory_space<vmem>>, vector<1x32x32xf32>
    %75 = vector.shape_cast %74 : vector<1x32x32xf32> to vector<32x32xf32>
    %cst_55 = arith.constant dense<0.000000e+00> : vector<1x32xf32>
    %76 = tpu.matmul %12, %75, %cst_55 {dimension_numbers = #tpu.dot_dimension_numbers<[1], [0], [0], [1], [0, 0, 1, 1], [], []>} : vector<1x32xf32>, vector<32x32xf32>, vector<1x32xf32> -> vector<1x32xf32>
    %c2_56 = arith.constant 2 : index
    %c0_57 = arith.constant 0 : index
    %c0_58 = arith.constant 0 : index
    %77 = vector.load %arg9[%c2_56, %c0_57, %c0_58] : memref<4x32x32xf32, #tpu.memory_space<vmem>>, vector<1x32x32xf32>
    %78 = vector.shape_cast %77 : vector<1x32x32xf32> to vector<32x32xf32>
    %cst_59 = arith.constant dense<0.000000e+00> : vector<1x32xf32>
    %79 = tpu.matmul %8, %78, %cst_59 {dimension_numbers = #tpu.dot_dimension_numbers<[1], [0], [0], [1], [0, 0, 1, 1], [], []>} : vector<1x32xf32>, vector<32x32xf32>, vector<1x32xf32> -> vector<1x32xf32>
    %80 = arith.addf %76, %79 : vector<1x32xf32>
    %c2_60 = arith.constant 2 : index
    %c0_61 = arith.constant 0 : index
    %c0_62 = arith.constant 0 : index
    %81 = vector.load %arg10[%c2_60, %c0_61, %c0_62] : memref<4x112x32xf32, #tpu.memory_space<vmem>>, vector<1x112x32xf32>
    %82 = vector.shape_cast %81 : vector<1x112x32xf32> to vector<112x32xf32>
    %cst_63 = arith.constant dense<0.000000e+00> : vector<1x32xf32>
    %83 = tpu.matmul %35, %82, %cst_63 {dimension_numbers = #tpu.dot_dimension_numbers<[1], [0], [0], [1], [0, 0, 1, 1], [], []>} : vector<1x112xf32>, vector<112x32xf32>, vector<1x32xf32> -> vector<1x32xf32>
    %84 = arith.addf %80, %83 : vector<1x32xf32>
    %c2_64 = arith.constant 2 : index
    %c0_65 = arith.constant 0 : index
    %c0_66 = arith.constant 0 : index
    %85 = vector.load %arg11[%c2_64, %c0_65, %c0_66] : memref<4x1x32xf32, #tpu.memory_space<vmem>>, vector<1x1x32xf32>
    %86 = vector.shape_cast %85 : vector<1x1x32xf32> to vector<1x32xf32>
    %87 = arith.addf %84, %86 : vector<1x32xf32>
    %88 = arith.negf %87 : vector<1x32xf32>
    %89 = math.exp %88 : vector<1x32xf32>
    %cst_67 = arith.constant 1.000000e+00 : f32
    %90 = vector.broadcast %cst_67 : f32 to vector<1x32xf32>
    %91 = arith.addf %90, %89 : vector<1x32xf32>
    %92 = arith.divf %90, %91 : vector<1x32xf32>
    %c3 = arith.constant 3 : index
    %c0_68 = arith.constant 0 : index
    %c0_69 = arith.constant 0 : index
    %93 = vector.load %arg8[%c3, %c0_68, %c0_69] : memref<4x32x32xf32, #tpu.memory_space<vmem>>, vector<1x32x32xf32>
    %94 = vector.shape_cast %93 : vector<1x32x32xf32> to vector<32x32xf32>
    %cst_70 = arith.constant dense<0.000000e+00> : vector<1x32xf32>
    %95 = tpu.matmul %12, %94, %cst_70 {dimension_numbers = #tpu.dot_dimension_numbers<[1], [0], [0], [1], [0, 0, 1, 1], [], []>} : vector<1x32xf32>, vector<32x32xf32>, vector<1x32xf32> -> vector<1x32xf32>
    %c3_71 = arith.constant 3 : index
    %c0_72 = arith.constant 0 : index
    %c0_73 = arith.constant 0 : index
    %96 = vector.load %arg9[%c3_71, %c0_72, %c0_73] : memref<4x32x32xf32, #tpu.memory_space<vmem>>, vector<1x32x32xf32>
    %97 = vector.shape_cast %96 : vector<1x32x32xf32> to vector<32x32xf32>
    %cst_74 = arith.constant dense<0.000000e+00> : vector<1x32xf32>
    %98 = tpu.matmul %8, %97, %cst_74 {dimension_numbers = #tpu.dot_dimension_numbers<[1], [0], [0], [1], [0, 0, 1, 1], [], []>} : vector<1x32xf32>, vector<32x32xf32>, vector<1x32xf32> -> vector<1x32xf32>
    %99 = arith.addf %95, %98 : vector<1x32xf32>
    %c3_75 = arith.constant 3 : index
    %c0_76 = arith.constant 0 : index
    %c0_77 = arith.constant 0 : index
    %100 = vector.load %arg10[%c3_75, %c0_76, %c0_77] : memref<4x112x32xf32, #tpu.memory_space<vmem>>, vector<1x112x32xf32>
    %101 = vector.shape_cast %100 : vector<1x112x32xf32> to vector<112x32xf32>
    %cst_78 = arith.constant dense<0.000000e+00> : vector<1x32xf32>
    %102 = tpu.matmul %35, %101, %cst_78 {dimension_numbers = #tpu.dot_dimension_numbers<[1], [0], [0], [1], [0, 0, 1, 1], [], []>} : vector<1x112xf32>, vector<112x32xf32>, vector<1x32xf32> -> vector<1x32xf32>
    %103 = arith.addf %99, %102 : vector<1x32xf32>
    %c3_79 = arith.constant 3 : index
    %c0_80 = arith.constant 0 : index
    %c0_81 = arith.constant 0 : index
    %104 = vector.load %arg11[%c3_79, %c0_80, %c0_81] : memref<4x1x32xf32, #tpu.memory_space<vmem>>, vector<1x1x32xf32>
    %105 = vector.shape_cast %104 : vector<1x1x32xf32> to vector<1x32xf32>
    %106 = arith.addf %103, %105 : vector<1x32xf32>
    %107 = math.tanh %106 : vector<1x32xf32>
    %108 = arith.mulf %73, %9 : vector<1x32xf32>
    %109 = arith.mulf %54, %107 : vector<1x32xf32>
    %110 = arith.addf %108, %109 : vector<1x32xf32>
    %111 = math.tanh %110 : vector<1x32xf32>
    %112 = arith.mulf %92, %111 : vector<1x32xf32>
    %113 = arith.mulf %112, %7 : vector<1x32xf32>
    %114 = arith.index_cast %c0_i32_14 : i32 to index
    %c0_82 = arith.constant 0 : index
    %c0_83 = arith.constant 0 : index
    %115 = vector.load %arg13[%114, %c0_82, %c0_83] : memref<4x1x32xf32, #tpu.memory_space<vmem>>, vector<1x1x32xf32>
    %116 = vector.shape_cast %115 : vector<1x1x32xf32> to vector<1x32xf32>
    %117 = vector.shape_cast %110 : vector<1x32xf32> to vector<1x1x32xf32>
    tpu.vector_store %arg13[%114, %c0_82, %c0_83], %117 {strides = array<i32>} : memref<4x1x32xf32, #tpu.memory_space<vmem>>, vector<1x1x32xf32>,
    %118 = arith.index_cast %c0_i32_14 : i32 to index
    %c0_84 = arith.constant 0 : index
    %c0_85 = arith.constant 0 : index
    %119 = vector.load %arg14[%118, %c0_84, %c0_85] : memref<4x1x32xf32, #tpu.memory_space<vmem>>, vector<1x1x32xf32>
    %120 = vector.shape_cast %119 : vector<1x1x32xf32> to vector<1x32xf32>
    %121 = vector.shape_cast %113 : vector<1x32xf32> to vector<1x1x32xf32>
    tpu.vector_store %arg14[%118, %c0_84, %c0_85], %121 {strides = array<i32>} : memref<4x1x32xf32, #tpu.memory_space<vmem>>, vector<1x1x32xf32>,
    %122 = arith.index_cast %c0_i32_14 : i32 to index
    %c0_86 = arith.constant 0 : index
    %c0_87 = arith.constant 0 : index
    %123 = vector.load %arg15[%122, %c0_86, %c0_87] : memref<4x1x112xf32, #tpu.memory_space<vmem>>, vector<1x1x112xf32>
    %124 = vector.shape_cast %123 : vector<1x1x112xf32> to vector<1x112xf32>
    %125 = vector.shape_cast %35 : vector<1x112xf32> to vector<1x1x112xf32>
    tpu.vector_store %arg15[%122, %c0_86, %c0_87], %125 {strides = array<i32>} : memref<4x1x112xf32, #tpu.memory_space<vmem>>, vector<1x1x112xf32>,
    %c1_i32 = arith.constant 1 : i32
    %126 = arith.index_cast %c1_i32 : i32 to index
    %c0_88 = arith.constant 0 : index
    %c0_89 = arith.constant 0 : index
    %127 = vector.load %arg1[%126, %c0_88, %c0_89] : memref<4x1x32xf32, #tpu.memory_space<vmem>>, vector<1x1x32xf32>
    %128 = vector.shape_cast %127 : vector<1x1x32xf32> to vector<1x32xf32>
    %cst_90 = arith.constant dense<0.000000e+00> : vector<1x32xf32>
    %129 = tpu.matmul %113, %5, %cst_90 {dimension_numbers = #tpu.dot_dimension_numbers<[1], [0], [0], [1], [0, 0, 1, 1], [], []>} : vector<1x32xf32>, vector<32x32xf32>, vector<1x32xf32> -> vector<1x32xf32>
    %130 = vector.broadcast %129 : vector<1x32xf32> to vector<8x32xf32>
    %131 = arith.addf %130, %4 : vector<8x32xf32>
    %132 = math.tanh %131 : vector<8x32xf32>
    %cst_91 = arith.constant dense<0.000000e+00> : vector<8x1xf32>
    %133 = tpu.matmul %132, %6, %cst_91 {dimension_numbers = #tpu.dot_dimension_numbers<[1], [0], [0], [1], [0, 0, 1, 1], [], []>} : vector<8x32xf32>, vector<32x1xf32>, vector<8x1xf32> -> vector<8x1xf32>
    %134 = vector.shape_cast %133 : vector<8x1xf32> to vector<1x8x1xf32>
    %cst_92 = arith.constant dense<0xFF800000> : vector<1xf32>
    %135 = vector.multi_reduction <maximumf>, %134, %cst_92 [1, 2] : vector<1x8x1xf32> to vector<1xf32>
    %136 = vector.shape_cast %135 : vector<1xf32> to vector<1x1x1xf32>
    %137 = vector.extract %136[0, 0, 0] : f32 from vector<1x1x1xf32>
    %138 = vector.broadcast %137 : f32 to vector<8x1xf32>
    %139 = arith.subf %133, %138 : vector<8x1xf32>
    %140 = math.exp %139 : vector<8x1xf32>
    %141 = vector.shape_cast %140 : vector<8x1xf32> to vector<1x8x1xf32>
    %cst_93 = arith.constant dense<0.000000e+00> : vector<1xf32>
    %142 = vector.multi_reduction <add>, %141, %cst_93 [1, 2] : vector<1x8x1xf32> to vector<1xf32>
    %143 = vector.shape_cast %142 : vector<1xf32> to vector<1x1x1xf32>
    %144 = vector.extract %143[0, 0, 0] : f32 from vector<1x1x1xf32>
    %cst_94 = arith.constant 1.000000e+00 : f32
    %145 = arith.divf %cst_94, %144 : f32
    %146 = vector.broadcast %140 : vector<8x1xf32> to vector<8x112xf32>
    %147 = arith.mulf %146, %3 : vector<8x112xf32>
    %cst_95 = arith.constant dense<0.000000e+00> : vector<112xf32>
    %148 = vector.multi_reduction <add>, %147, %cst_95 [0] : vector<8x112xf32> to vector<112xf32>
    %149 = vector.shape_cast %148 : vector<112xf32> to vector<1x112xf32>
    %150 = vector.broadcast %145 : f32 to vector<1x112xf32>
    %151 = arith.mulf %149, %150 : vector<1x112xf32>
    %c0_96 = arith.constant 0 : index
    %c0_97 = arith.constant 0 : index
    %c0_98 = arith.constant 0 : index
    %152 = vector.load %arg8[%c0_96, %c0_97, %c0_98] : memref<4x32x32xf32, #tpu.memory_space<vmem>>, vector<1x32x32xf32>
    %153 = vector.shape_cast %152 : vector<1x32x32xf32> to vector<32x32xf32>
    %cst_99 = arith.constant dense<0.000000e+00> : vector<1x32xf32>
    %154 = tpu.matmul %128, %153, %cst_99 {dimension_numbers = #tpu.dot_dimension_numbers<[1], [0], [0], [1], [0, 0, 1, 1], [], []>} : vector<1x32xf32>, vector<32x32xf32>, vector<1x32xf32> -> vector<1x32xf32>
    %c0_100 = arith.constant 0 : index
    %c0_101 = arith.constant 0 : index
    %c0_102 = arith.constant 0 : index
    %155 = vector.load %arg9[%c0_100, %c0_101, %c0_102] : memref<4x32x32xf32, #tpu.memory_space<vmem>>, vector<1x32x32xf32>
    %156 = vector.shape_cast %155 : vector<1x32x32xf32> to vector<32x32xf32>
    %cst_103 = arith.constant dense<0.000000e+00> : vector<1x32xf32>
    %157 = tpu.matmul %113, %156, %cst_103 {dimension_numbers = #tpu.dot_dimension_numbers<[1], [0], [0], [1], [0, 0, 1, 1], [], []>} : vector<1x32xf32>, vector<32x32xf32>, vector<1x32xf32> -> vector<1x32xf32>
    %158 = arith.addf %154, %157 : vector<1x32xf32>
    %c0_104 = arith.constant 0 : index
    %c0_105 = arith.constant 0 : index
    %c0_106 = arith.constant 0 : index
    %159 = vector.load %arg10[%c0_104, %c0_105, %c0_106] : memref<4x112x32xf32, #tpu.memory_space<vmem>>, vector<1x112x32xf32>
    %160 = vector.shape_cast %159 : vector<1x112x32xf32> to vector<112x32xf32>
    %cst_107 = arith.constant dense<0.000000e+00> : vector<1x32xf32>
    %161 = tpu.matmul %151, %160, %cst_107 {dimension_numbers = #tpu.dot_dimension_numbers<[1], [0], [0], [1], [0, 0, 1, 1], [], []>} : vector<1x112xf32>, vector<112x32xf32>, vector<1x32xf32> -> vector<1x32xf32>
    %162 = arith.addf %158, %161 : vector<1x32xf32>
    %c0_108 = arith.constant 0 : index
    %c0_109 = arith.constant 0 : index
    %c0_110 = arith.constant 0 : index
    %163 = vector.load %arg11[%c0_108, %c0_109, %c0_110] : memref<4x1x32xf32, #tpu.memory_space<vmem>>, vector<1x1x32xf32>
    %164 = vector.shape_cast %163 : vector<1x1x32xf32> to vector<1x32xf32>
    %165 = arith.addf %162, %164 : vector<1x32xf32>
    %166 = arith.negf %165 : vector<1x32xf32>
    %167 = math.exp %166 : vector<1x32xf32>
    %cst_111 = arith.constant 1.000000e+00 : f32
    %168 = vector.broadcast %cst_111 : f32 to vector<1x32xf32>
    %169 = arith.addf %168, %167 : vector<1x32xf32>
    %170 = arith.divf %168, %169 : vector<1x32xf32>
    %c1_112 = arith.constant 1 : index
    %c0_113 = arith.constant 0 : index
    %c0_114 = arith.constant 0 : index
    %171 = vector.load %arg8[%c1_112, %c0_113, %c0_114] : memref<4x32x32xf32, #tpu.memory_space<vmem>>, vector<1x32x32xf32>
    %172 = vector.shape_cast %171 : vector<1x32x32xf32> to vector<32x32xf32>
    %cst_115 = arith.constant dense<0.000000e+00> : vector<1x32xf32>
    %173 = tpu.matmul %128, %172, %cst_115 {dimension_numbers = #tpu.dot_dimension_numbers<[1], [0], [0], [1], [0, 0, 1, 1], [], []>} : vector<1x32xf32>, vector<32x32xf32>, vector<1x32xf32> -> vector<1x32xf32>
    %c1_116 = arith.constant 1 : index
    %c0_117 = arith.constant 0 : index
    %c0_118 = arith.constant 0 : index
    %174 = vector.load %arg9[%c1_116, %c0_117, %c0_118] : memref<4x32x32xf32, #tpu.memory_space<vmem>>, vector<1x32x32xf32>
    %175 = vector.shape_cast %174 : vector<1x32x32xf32> to vector<32x32xf32>
    %cst_119 = arith.constant dense<0.000000e+00> : vector<1x32xf32>
    %176 = tpu.matmul %113, %175, %cst_119 {dimension_numbers = #tpu.dot_dimension_numbers<[1], [0], [0], [1], [0, 0, 1, 1], [], []>} : vector<1x32xf32>, vector<32x32xf32>, vector<1x32xf32> -> vector<1x32xf32>
    %177 = arith.addf %173, %176 : vector<1x32xf32>
    %c1_120 = arith.constant 1 : index
    %c0_121 = arith.constant 0 : index
    %c0_122 = arith.constant 0 : index
    %178 = vector.load %arg10[%c1_120, %c0_121, %c0_122] : memref<4x112x32xf32, #tpu.memory_space<vmem>>, vector<1x112x32xf32>
    %179 = vector.shape_cast %178 : vector<1x112x32xf32> to vector<112x32xf32>
    %cst_123 = arith.constant dense<0.000000e+00> : vector<1x32xf32>
    %180 = tpu.matmul %151, %179, %cst_123 {dimension_numbers = #tpu.dot_dimension_numbers<[1], [0], [0], [1], [0, 0, 1, 1], [], []>} : vector<1x112xf32>, vector<112x32xf32>, vector<1x32xf32> -> vector<1x32xf32>
    %181 = arith.addf %177, %180 : vector<1x32xf32>
    %c1_124 = arith.constant 1 : index
    %c0_125 = arith.constant 0 : index
    %c0_126 = arith.constant 0 : index
    %182 = vector.load %arg11[%c1_124, %c0_125, %c0_126] : memref<4x1x32xf32, #tpu.memory_space<vmem>>, vector<1x1x32xf32>
    %183 = vector.shape_cast %182 : vector<1x1x32xf32> to vector<1x32xf32>
    %184 = arith.addf %181, %183 : vector<1x32xf32>
    %185 = arith.negf %184 : vector<1x32xf32>
    %186 = math.exp %185 : vector<1x32xf32>
    %cst_127 = arith.constant 1.000000e+00 : f32
    %187 = vector.broadcast %cst_127 : f32 to vector<1x32xf32>
    %188 = arith.addf %187, %186 : vector<1x32xf32>
    %189 = arith.divf %187, %188 : vector<1x32xf32>
    %c2_128 = arith.constant 2 : index
    %c0_129 = arith.constant 0 : index
    %c0_130 = arith.constant 0 : index
    %190 = vector.load %arg8[%c2_128, %c0_129, %c0_130] : memref<4x32x32xf32, #tpu.memory_space<vmem>>, vector<1x32x32xf32>
    %191 = vector.shape_cast %190 : vector<1x32x32xf32> to vector<32x32xf32>
    %cst_131 = arith.constant dense<0.000000e+00> : vector<1x32xf32>
    %192 = tpu.matmul %128, %191, %cst_131 {dimension_numbers = #tpu.dot_dimension_numbers<[1], [0], [0], [1], [0, 0, 1, 1], [], []>} : vector<1x32xf32>, vector<32x32xf32>, vector<1x32xf32> -> vector<1x32xf32>
    %c2_132 = arith.constant 2 : index
    %c0_133 = arith.constant 0 : index
    %c0_134 = arith.constant 0 : index
    %193 = vector.load %arg9[%c2_132, %c0_133, %c0_134] : memref<4x32x32xf32, #tpu.memory_space<vmem>>, vector<1x32x32xf32>
    %194 = vector.shape_cast %193 : vector<1x32x32xf32> to vector<32x32xf32>
    %cst_135 = arith.constant dense<0.000000e+00> : vector<1x32xf32>
    %195 = tpu.matmul %113, %194, %cst_135 {dimension_numbers = #tpu.dot_dimension_numbers<[1], [0], [0], [1], [0, 0, 1, 1], [], []>} : vector<1x32xf32>, vector<32x32xf32>, vector<1x32xf32> -> vector<1x32xf32>
    %196 = arith.addf %192, %195 : vector<1x32xf32>
    %c2_136 = arith.constant 2 : index
    %c0_137 = arith.constant 0 : index
    %c0_138 = arith.constant 0 : index
    %197 = vector.load %arg10[%c2_136, %c0_137, %c0_138] : memref<4x112x32xf32, #tpu.memory_space<vmem>>, vector<1x112x32xf32>
    %198 = vector.shape_cast %197 : vector<1x112x32xf32> to vector<112x32xf32>
    %cst_139 = arith.constant dense<0.000000e+00> : vector<1x32xf32>
    %199 = tpu.matmul %151, %198, %cst_139 {dimension_numbers = #tpu.dot_dimension_numbers<[1], [0], [0], [1], [0, 0, 1, 1], [], []>} : vector<1x112xf32>, vector<112x32xf32>, vector<1x32xf32> -> vector<1x32xf32>
    %200 = arith.addf %196, %199 : vector<1x32xf32>
    %c2_140 = arith.constant 2 : index
    %c0_141 = arith.constant 0 : index
    %c0_142 = arith.constant 0 : index
    %201 = vector.load %arg11[%c2_140, %c0_141, %c0_142] : memref<4x1x32xf32, #tpu.memory_space<vmem>>, vector<1x1x32xf32>
    %202 = vector.shape_cast %201 : vector<1x1x32xf32> to vector<1x32xf32>
    %203 = arith.addf %200, %202 : vector<1x32xf32>
    %204 = arith.negf %203 : vector<1x32xf32>
    %205 = math.exp %204 : vector<1x32xf32>
    %cst_143 = arith.constant 1.000000e+00 : f32
    %206 = vector.broadcast %cst_143 : f32 to vector<1x32xf32>
    %207 = arith.addf %206, %205 : vector<1x32xf32>
    %208 = arith.divf %206, %207 : vector<1x32xf32>
    %c3_144 = arith.constant 3 : index
    %c0_145 = arith.constant 0 : index
    %c0_146 = arith.constant 0 : index
    %209 = vector.load %arg8[%c3_144, %c0_145, %c0_146] : memref<4x32x32xf32, #tpu.memory_space<vmem>>, vector<1x32x32xf32>
    %210 = vector.shape_cast %209 : vector<1x32x32xf32> to vector<32x32xf32>
    %cst_147 = arith.constant dense<0.000000e+00> : vector<1x32xf32>
    %211 = tpu.matmul %128, %210, %cst_147 {dimension_numbers = #tpu.dot_dimension_numbers<[1], [0], [0], [1], [0, 0, 1, 1], [], []>} : vector<1x32xf32>, vector<32x32xf32>, vector<1x32xf32> -> vector<1x32xf32>
    %c3_148 = arith.constant 3 : index
    %c0_149 = arith.constant 0 : index
    %c0_150 = arith.constant 0 : index
    %212 = vector.load %arg9[%c3_148, %c0_149, %c0_150] : memref<4x32x32xf32, #tpu.memory_space<vmem>>, vector<1x32x32xf32>
    %213 = vector.shape_cast %212 : vector<1x32x32xf32> to vector<32x32xf32>
    %cst_151 = arith.constant dense<0.000000e+00> : vector<1x32xf32>
    %214 = tpu.matmul %113, %213, %cst_151 {dimension_numbers = #tpu.dot_dimension_numbers<[1], [0], [0], [1], [0, 0, 1, 1], [], []>} : vector<1x32xf32>, vector<32x32xf32>, vector<1x32xf32> -> vector<1x32xf32>
    %215 = arith.addf %211, %214 : vector<1x32xf32>
    %c3_152 = arith.constant 3 : index
    %c0_153 = arith.constant 0 : index
    %c0_154 = arith.constant 0 : index
    %216 = vector.load %arg10[%c3_152, %c0_153, %c0_154] : memref<4x112x32xf32, #tpu.memory_space<vmem>>, vector<1x112x32xf32>
    %217 = vector.shape_cast %216 : vector<1x112x32xf32> to vector<112x32xf32>
    %cst_155 = arith.constant dense<0.000000e+00> : vector<1x32xf32>
    %218 = tpu.matmul %151, %217, %cst_155 {dimension_numbers = #tpu.dot_dimension_numbers<[1], [0], [0], [1], [0, 0, 1, 1], [], []>} : vector<1x112xf32>, vector<112x32xf32>, vector<1x32xf32> -> vector<1x32xf32>
    %219 = arith.addf %215, %218 : vector<1x32xf32>
    %c3_156 = arith.constant 3 : index
    %c0_157 = arith.constant 0 : index
    %c0_158 = arith.constant 0 : index
    %220 = vector.load %arg11[%c3_156, %c0_157, %c0_158] : memref<4x1x32xf32, #tpu.memory_space<vmem>>, vector<1x1x32xf32>
    %221 = vector.shape_cast %220 : vector<1x1x32xf32> to vector<1x32xf32>
    %222 = arith.addf %219, %221 : vector<1x32xf32>
    %223 = math.tanh %222 : vector<1x32xf32>
    %224 = arith.mulf %189, %110 : vector<1x32xf32>
    %225 = arith.mulf %170, %223 : vector<1x32xf32>
    %226 = arith.addf %224, %225 : vector<1x32xf32>
    %227 = math.tanh %226 : vector<1x32xf32>
    %228 = arith.mulf %208, %227 : vector<1x32xf32>
    %229 = arith.mulf %228, %7 : vector<1x32xf32>
    %230 = arith.index_cast %c1_i32 : i32 to index
    %c0_159 = arith.constant 0 : index
    %c0_160 = arith.constant 0 : index
    %231 = vector.load %arg13[%230, %c0_159, %c0_160] : memref<4x1x32xf32, #tpu.memory_space<vmem>>, vector<1x1x32xf32>
    %232 = vector.shape_cast %231 : vector<1x1x32xf32> to vector<1x32xf32>
    %233 = vector.shape_cast %226 : vector<1x32xf32> to vector<1x1x32xf32>
    tpu.vector_store %arg13[%230, %c0_159, %c0_160], %233 {strides = array<i32>} : memref<4x1x32xf32, #tpu.memory_space<vmem>>, vector<1x1x32xf32>,
    %234 = arith.index_cast %c1_i32 : i32 to index
    %c0_161 = arith.constant 0 : index
    %c0_162 = arith.constant 0 : index
    %235 = vector.load %arg14[%234, %c0_161, %c0_162] : memref<4x1x32xf32, #tpu.memory_space<vmem>>, vector<1x1x32xf32>
    %236 = vector.shape_cast %235 : vector<1x1x32xf32> to vector<1x32xf32>
    %237 = vector.shape_cast %229 : vector<1x32xf32> to vector<1x1x32xf32>
    tpu.vector_store %arg14[%234, %c0_161, %c0_162], %237 {strides = array<i32>} : memref<4x1x32xf32, #tpu.memory_space<vmem>>, vector<1x1x32xf32>,
    %238 = arith.index_cast %c1_i32 : i32 to index
    %c0_163 = arith.constant 0 : index
    %c0_164 = arith.constant 0 : index
    %239 = vector.load %arg15[%238, %c0_163, %c0_164] : memref<4x1x112xf32, #tpu.memory_space<vmem>>, vector<1x1x112xf32>
    %240 = vector.shape_cast %239 : vector<1x1x112xf32> to vector<1x112xf32>
    %241 = vector.shape_cast %151 : vector<1x112xf32> to vector<1x1x112xf32>
    tpu.vector_store %arg15[%238, %c0_163, %c0_164], %241 {strides = array<i32>} : memref<4x1x112xf32, #tpu.memory_space<vmem>>, vector<1x1x112xf32>,
    %c2_i32 = arith.constant 2 : i32
    %242 = arith.index_cast %c2_i32 : i32 to index
    %c0_165 = arith.constant 0 : index
    %c0_166 = arith.constant 0 : index
    %243 = vector.load %arg1[%242, %c0_165, %c0_166] : memref<4x1x32xf32, #tpu.memory_space<vmem>>, vector<1x1x32xf32>
    %244 = vector.shape_cast %243 : vector<1x1x32xf32> to vector<1x32xf32>
    %cst_167 = arith.constant dense<0.000000e+00> : vector<1x32xf32>
    %245 = tpu.matmul %229, %5, %cst_167 {dimension_numbers = #tpu.dot_dimension_numbers<[1], [0], [0], [1], [0, 0, 1, 1], [], []>} : vector<1x32xf32>, vector<32x32xf32>, vector<1x32xf32> -> vector<1x32xf32>
    %246 = vector.broadcast %245 : vector<1x32xf32> to vector<8x32xf32>
    %247 = arith.addf %246, %4 : vector<8x32xf32>
    %248 = math.tanh %247 : vector<8x32xf32>
    %cst_168 = arith.constant dense<0.000000e+00> : vector<8x1xf32>
    %249 = tpu.matmul %248, %6, %cst_168 {dimension_numbers = #tpu.dot_dimension_numbers<[1], [0], [0], [1], [0, 0, 1, 1], [], []>} : vector<8x32xf32>, vector<32x1xf32>, vector<8x1xf32> -> vector<8x1xf32>
    %250 = vector.shape_cast %249 : vector<8x1xf32> to vector<1x8x1xf32>
    %cst_169 = arith.constant dense<0xFF800000> : vector<1xf32>
    %251 = vector.multi_reduction <maximumf>, %250, %cst_169 [1, 2] : vector<1x8x1xf32> to vector<1xf32>
    %252 = vector.shape_cast %251 : vector<1xf32> to vector<1x1x1xf32>
    %253 = vector.extract %252[0, 0, 0] : f32 from vector<1x1x1xf32>
    %254 = vector.broadcast %253 : f32 to vector<8x1xf32>
    %255 = arith.subf %249, %254 : vector<8x1xf32>
    %256 = math.exp %255 : vector<8x1xf32>
    %257 = vector.shape_cast %256 : vector<8x1xf32> to vector<1x8x1xf32>
    %cst_170 = arith.constant dense<0.000000e+00> : vector<1xf32>
    %258 = vector.multi_reduction <add>, %257, %cst_170 [1, 2] : vector<1x8x1xf32> to vector<1xf32>
    %259 = vector.shape_cast %258 : vector<1xf32> to vector<1x1x1xf32>
    %260 = vector.extract %259[0, 0, 0] : f32 from vector<1x1x1xf32>
    %cst_171 = arith.constant 1.000000e+00 : f32
    %261 = arith.divf %cst_171, %260 : f32
    %262 = vector.broadcast %256 : vector<8x1xf32> to vector<8x112xf32>
    %263 = arith.mulf %262, %3 : vector<8x112xf32>
    %cst_172 = arith.constant dense<0.000000e+00> : vector<112xf32>
    %264 = vector.multi_reduction <add>, %263, %cst_172 [0] : vector<8x112xf32> to vector<112xf32>
    %265 = vector.shape_cast %264 : vector<112xf32> to vector<1x112xf32>
    %266 = vector.broadcast %261 : f32 to vector<1x112xf32>
    %267 = arith.mulf %265, %266 : vector<1x112xf32>
    %c0_173 = arith.constant 0 : index
    %c0_174 = arith.constant 0 : index
    %c0_175 = arith.constant 0 : index
    %268 = vector.load %arg8[%c0_173, %c0_174, %c0_175] : memref<4x32x32xf32, #tpu.memory_space<vmem>>, vector<1x32x32xf32>
    %269 = vector.shape_cast %268 : vector<1x32x32xf32> to vector<32x32xf32>
    %cst_176 = arith.constant dense<0.000000e+00> : vector<1x32xf32>
    %270 = tpu.matmul %244, %269, %cst_176 {dimension_numbers = #tpu.dot_dimension_numbers<[1], [0], [0], [1], [0, 0, 1, 1], [], []>} : vector<1x32xf32>, vector<32x32xf32>, vector<1x32xf32> -> vector<1x32xf32>
    %c0_177 = arith.constant 0 : index
    %c0_178 = arith.constant 0 : index
    %c0_179 = arith.constant 0 : index
    %271 = vector.load %arg9[%c0_177, %c0_178, %c0_179] : memref<4x32x32xf32, #tpu.memory_space<vmem>>, vector<1x32x32xf32>
    %272 = vector.shape_cast %271 : vector<1x32x32xf32> to vector<32x32xf32>
    %cst_180 = arith.constant dense<0.000000e+00> : vector<1x32xf32>
    %273 = tpu.matmul %229, %272, %cst_180 {dimension_numbers = #tpu.dot_dimension_numbers<[1], [0], [0], [1], [0, 0, 1, 1], [], []>} : vector<1x32xf32>, vector<32x32xf32>, vector<1x32xf32> -> vector<1x32xf32>
    %274 = arith.addf %270, %273 : vector<1x32xf32>
    %c0_181 = arith.constant 0 : index
    %c0_182 = arith.constant 0 : index
    %c0_183 = arith.constant 0 : index
    %275 = vector.load %arg10[%c0_181, %c0_182, %c0_183] : memref<4x112x32xf32, #tpu.memory_space<vmem>>, vector<1x112x32xf32>
    %276 = vector.shape_cast %275 : vector<1x112x32xf32> to vector<112x32xf32>
    %cst_184 = arith.constant dense<0.000000e+00> : vector<1x32xf32>
    %277 = tpu.matmul %267, %276, %cst_184 {dimension_numbers = #tpu.dot_dimension_numbers<[1], [0], [0], [1], [0, 0, 1, 1], [], []>} : vector<1x112xf32>, vector<112x32xf32>, vector<1x32xf32> -> vector<1x32xf32>
    %278 = arith.addf %274, %277 : vector<1x32xf32>
    %c0_185 = arith.constant 0 : index
    %c0_186 = arith.constant 0 : index
    %c0_187 = arith.constant 0 : index
    %279 = vector.load %arg11[%c0_185, %c0_186, %c0_187] : memref<4x1x32xf32, #tpu.memory_space<vmem>>, vector<1x1x32xf32>
    %280 = vector.shape_cast %279 : vector<1x1x32xf32> to vector<1x32xf32>
    %281 = arith.addf %278, %280 : vector<1x32xf32>
    %282 = arith.negf %281 : vector<1x32xf32>
    %283 = math.exp %282 : vector<1x32xf32>
    %cst_188 = arith.constant 1.000000e+00 : f32
    %284 = vector.broadcast %cst_188 : f32 to vector<1x32xf32>
    %285 = arith.addf %284, %283 : vector<1x32xf32>
    %286 = arith.divf %284, %285 : vector<1x32xf32>
    %c1_189 = arith.constant 1 : index
    %c0_190 = arith.constant 0 : index
    %c0_191 = arith.constant 0 : index
    %287 = vector.load %arg8[%c1_189, %c0_190, %c0_191] : memref<4x32x32xf32, #tpu.memory_space<vmem>>, vector<1x32x32xf32>
    %288 = vector.shape_cast %287 : vector<1x32x32xf32> to vector<32x32xf32>
    %cst_192 = arith.constant dense<0.000000e+00> : vector<1x32xf32>
    %289 = tpu.matmul %244, %288, %cst_192 {dimension_numbers = #tpu.dot_dimension_numbers<[1], [0], [0], [1], [0, 0, 1, 1], [], []>} : vector<1x32xf32>, vector<32x32xf32>, vector<1x32xf32> -> vector<1x32xf32>
    %c1_193 = arith.constant 1 : index
    %c0_194 = arith.constant 0 : index
    %c0_195 = arith.constant 0 : index
    %290 = vector.load %arg9[%c1_193, %c0_194, %c0_195] : memref<4x32x32xf32, #tpu.memory_space<vmem>>, vector<1x32x32xf32>
    %291 = vector.shape_cast %290 : vector<1x32x32xf32> to vector<32x32xf32>
    %cst_196 = arith.constant dense<0.000000e+00> : vector<1x32xf32>
    %292 = tpu.matmul %229, %291, %cst_196 {dimension_numbers = #tpu.dot_dimension_numbers<[1], [0], [0], [1], [0, 0, 1, 1], [], []>} : vector<1x32xf32>, vector<32x32xf32>, vector<1x32xf32> -> vector<1x32xf32>
    %293 = arith.addf %289, %292 : vector<1x32xf32>
    %c1_197 = arith.constant 1 : index
    %c0_198 = arith.constant 0 : index
    %c0_199 = arith.constant 0 : index
    %294 = vector.load %arg10[%c1_197, %c0_198, %c0_199] : memref<4x112x32xf32, #tpu.memory_space<vmem>>, vector<1x112x32xf32>
    %295 = vector.shape_cast %294 : vector<1x112x32xf32> to vector<112x32xf32>
    %cst_200 = arith.constant dense<0.000000e+00> : vector<1x32xf32>
    %296 = tpu.matmul %267, %295, %cst_200 {dimension_numbers = #tpu.dot_dimension_numbers<[1], [0], [0], [1], [0, 0, 1, 1], [], []>} : vector<1x112xf32>, vector<112x32xf32>, vector<1x32xf32> -> vector<1x32xf32>
    %297 = arith.addf %293, %296 : vector<1x32xf32>
    %c1_201 = arith.constant 1 : index
    %c0_202 = arith.constant 0 : index
    %c0_203 = arith.constant 0 : index
    %298 = vector.load %arg11[%c1_201, %c0_202, %c0_203] : memref<4x1x32xf32, #tpu.memory_space<vmem>>, vector<1x1x32xf32>
    %299 = vector.shape_cast %298 : vector<1x1x32xf32> to vector<1x32xf32>
    %300 = arith.addf %297, %299 : vector<1x32xf32>
    %301 = arith.negf %300 : vector<1x32xf32>
    %302 = math.exp %301 : vector<1x32xf32>
    %cst_204 = arith.constant 1.000000e+00 : f32
    %303 = vector.broadcast %cst_204 : f32 to vector<1x32xf32>
    %304 = arith.addf %303, %302 : vector<1x32xf32>
    %305 = arith.divf %303, %304 : vector<1x32xf32>
    %c2_205 = arith.constant 2 : index
    %c0_206 = arith.constant 0 : index
    %c0_207 = arith.constant 0 : index
    %306 = vector.load %arg8[%c2_205, %c0_206, %c0_207] : memref<4x32x32xf32, #tpu.memory_space<vmem>>, vector<1x32x32xf32>
    %307 = vector.shape_cast %306 : vector<1x32x32xf32> to vector<32x32xf32>
    %cst_208 = arith.constant dense<0.000000e+00> : vector<1x32xf32>
    %308 = tpu.matmul %244, %307, %cst_208 {dimension_numbers = #tpu.dot_dimension_numbers<[1], [0], [0], [1], [0, 0, 1, 1], [], []>} : vector<1x32xf32>, vector<32x32xf32>, vector<1x32xf32> -> vector<1x32xf32>
    %c2_209 = arith.constant 2 : index
    %c0_210 = arith.constant 0 : index
    %c0_211 = arith.constant 0 : index
    %309 = vector.load %arg9[%c2_209, %c0_210, %c0_211] : memref<4x32x32xf32, #tpu.memory_space<vmem>>, vector<1x32x32xf32>
    %310 = vector.shape_cast %309 : vector<1x32x32xf32> to vector<32x32xf32>
    %cst_212 = arith.constant dense<0.000000e+00> : vector<1x32xf32>
    %311 = tpu.matmul %229, %310, %cst_212 {dimension_numbers = #tpu.dot_dimension_numbers<[1], [0], [0], [1], [0, 0, 1, 1], [], []>} : vector<1x32xf32>, vector<32x32xf32>, vector<1x32xf32> -> vector<1x32xf32>
    %312 = arith.addf %308, %311 : vector<1x32xf32>
    %c2_213 = arith.constant 2 : index
    %c0_214 = arith.constant 0 : index
    %c0_215 = arith.constant 0 : index
    %313 = vector.load %arg10[%c2_213, %c0_214, %c0_215] : memref<4x112x32xf32, #tpu.memory_space<vmem>>, vector<1x112x32xf32>
    %314 = vector.shape_cast %313 : vector<1x112x32xf32> to vector<112x32xf32>
    %cst_216 = arith.constant dense<0.000000e+00> : vector<1x32xf32>
    %315 = tpu.matmul %267, %314, %cst_216 {dimension_numbers = #tpu.dot_dimension_numbers<[1], [0], [0], [1], [0, 0, 1, 1], [], []>} : vector<1x112xf32>, vector<112x32xf32>, vector<1x32xf32> -> vector<1x32xf32>
    %316 = arith.addf %312, %315 : vector<1x32xf32>
    %c2_217 = arith.constant 2 : index
    %c0_218 = arith.constant 0 : index
    %c0_219 = arith.constant 0 : index
    %317 = vector.load %arg11[%c2_217, %c0_218, %c0_219] : memref<4x1x32xf32, #tpu.memory_space<vmem>>, vector<1x1x32xf32>
    %318 = vector.shape_cast %317 : vector<1x1x32xf32> to vector<1x32xf32>
    %319 = arith.addf %316, %318 : vector<1x32xf32>
    %320 = arith.negf %319 : vector<1x32xf32>
    %321 = math.exp %320 : vector<1x32xf32>
    %cst_220 = arith.constant 1.000000e+00 : f32
    %322 = vector.broadcast %cst_220 : f32 to vector<1x32xf32>
    %323 = arith.addf %322, %321 : vector<1x32xf32>
    %324 = arith.divf %322, %323 : vector<1x32xf32>
    %c3_221 = arith.constant 3 : index
    %c0_222 = arith.constant 0 : index
    %c0_223 = arith.constant 0 : index
    %325 = vector.load %arg8[%c3_221, %c0_222, %c0_223] : memref<4x32x32xf32, #tpu.memory_space<vmem>>, vector<1x32x32xf32>
    %326 = vector.shape_cast %325 : vector<1x32x32xf32> to vector<32x32xf32>
    %cst_224 = arith.constant dense<0.000000e+00> : vector<1x32xf32>
    %327 = tpu.matmul %244, %326, %cst_224 {dimension_numbers = #tpu.dot_dimension_numbers<[1], [0], [0], [1], [0, 0, 1, 1], [], []>} : vector<1x32xf32>, vector<32x32xf32>, vector<1x32xf32> -> vector<1x32xf32>
    %c3_225 = arith.constant 3 : index
    %c0_226 = arith.constant 0 : index
    %c0_227 = arith.constant 0 : index
    %328 = vector.load %arg9[%c3_225, %c0_226, %c0_227] : memref<4x32x32xf32, #tpu.memory_space<vmem>>, vector<1x32x32xf32>
    %329 = vector.shape_cast %328 : vector<1x32x32xf32> to vector<32x32xf32>
    %cst_228 = arith.constant dense<0.000000e+00> : vector<1x32xf32>
    %330 = tpu.matmul %229, %329, %cst_228 {dimension_numbers = #tpu.dot_dimension_numbers<[1], [0], [0], [1], [0, 0, 1, 1], [], []>} : vector<1x32xf32>, vector<32x32xf32>, vector<1x32xf32> -> vector<1x32xf32>
    %331 = arith.addf %327, %330 : vector<1x32xf32>
    %c3_229 = arith.constant 3 : index
    %c0_230 = arith.constant 0 : index
    %c0_231 = arith.constant 0 : index
    %332 = vector.load %arg10[%c3_229, %c0_230, %c0_231] : memref<4x112x32xf32, #tpu.memory_space<vmem>>, vector<1x112x32xf32>
    %333 = vector.shape_cast %332 : vector<1x112x32xf32> to vector<112x32xf32>
    %cst_232 = arith.constant dense<0.000000e+00> : vector<1x32xf32>
    %334 = tpu.matmul %267, %333, %cst_232 {dimension_numbers = #tpu.dot_dimension_numbers<[1], [0], [0], [1], [0, 0, 1, 1], [], []>} : vector<1x112xf32>, vector<112x32xf32>, vector<1x32xf32> -> vector<1x32xf32>
    %335 = arith.addf %331, %334 : vector<1x32xf32>
    %c3_233 = arith.constant 3 : index
    %c0_234 = arith.constant 0 : index
    %c0_235 = arith.constant 0 : index
    %336 = vector.load %arg11[%c3_233, %c0_234, %c0_235] : memref<4x1x32xf32, #tpu.memory_space<vmem>>, vector<1x1x32xf32>
    %337 = vector.shape_cast %336 : vector<1x1x32xf32> to vector<1x32xf32>
    %338 = arith.addf %335, %337 : vector<1x32xf32>
    %339 = math.tanh %338 : vector<1x32xf32>
    %340 = arith.mulf %305, %226 : vector<1x32xf32>
    %341 = arith.mulf %286, %339 : vector<1x32xf32>
    %342 = arith.addf %340, %341 : vector<1x32xf32>
    %343 = math.tanh %342 : vector<1x32xf32>
    %344 = arith.mulf %324, %343 : vector<1x32xf32>
    %345 = arith.mulf %344, %7 : vector<1x32xf32>
    %346 = arith.index_cast %c2_i32 : i32 to index
    %c0_236 = arith.constant 0 : index
    %c0_237 = arith.constant 0 : index
    %347 = vector.load %arg13[%346, %c0_236, %c0_237] : memref<4x1x32xf32, #tpu.memory_space<vmem>>, vector<1x1x32xf32>
    %348 = vector.shape_cast %347 : vector<1x1x32xf32> to vector<1x32xf32>
    %349 = vector.shape_cast %342 : vector<1x32xf32> to vector<1x1x32xf32>
    tpu.vector_store %arg13[%346, %c0_236, %c0_237], %349 {strides = array<i32>} : memref<4x1x32xf32, #tpu.memory_space<vmem>>, vector<1x1x32xf32>,
    %350 = arith.index_cast %c2_i32 : i32 to index
    %c0_238 = arith.constant 0 : index
    %c0_239 = arith.constant 0 : index
    %351 = vector.load %arg14[%350, %c0_238, %c0_239] : memref<4x1x32xf32, #tpu.memory_space<vmem>>, vector<1x1x32xf32>
    %352 = vector.shape_cast %351 : vector<1x1x32xf32> to vector<1x32xf32>
    %353 = vector.shape_cast %345 : vector<1x32xf32> to vector<1x1x32xf32>
    tpu.vector_store %arg14[%350, %c0_238, %c0_239], %353 {strides = array<i32>} : memref<4x1x32xf32, #tpu.memory_space<vmem>>, vector<1x1x32xf32>,
    %354 = arith.index_cast %c2_i32 : i32 to index
    %c0_240 = arith.constant 0 : index
    %c0_241 = arith.constant 0 : index
    %355 = vector.load %arg15[%354, %c0_240, %c0_241] : memref<4x1x112xf32, #tpu.memory_space<vmem>>, vector<1x1x112xf32>
    %356 = vector.shape_cast %355 : vector<1x1x112xf32> to vector<1x112xf32>
    %357 = vector.shape_cast %267 : vector<1x112xf32> to vector<1x1x112xf32>
    tpu.vector_store %arg15[%354, %c0_240, %c0_241], %357 {strides = array<i32>} : memref<4x1x112xf32, #tpu.memory_space<vmem>>, vector<1x1x112xf32>,
    %c3_i32 = arith.constant 3 : i32
    %358 = arith.index_cast %c3_i32 : i32 to index
    %c0_242 = arith.constant 0 : index
    %c0_243 = arith.constant 0 : index
    %359 = vector.load %arg1[%358, %c0_242, %c0_243] : memref<4x1x32xf32, #tpu.memory_space<vmem>>, vector<1x1x32xf32>
    %360 = vector.shape_cast %359 : vector<1x1x32xf32> to vector<1x32xf32>
    %cst_244 = arith.constant dense<0.000000e+00> : vector<1x32xf32>
    %361 = tpu.matmul %345, %5, %cst_244 {dimension_numbers = #tpu.dot_dimension_numbers<[1], [0], [0], [1], [0, 0, 1, 1], [], []>} : vector<1x32xf32>, vector<32x32xf32>, vector<1x32xf32> -> vector<1x32xf32>
    %362 = vector.broadcast %361 : vector<1x32xf32> to vector<8x32xf32>
    %363 = arith.addf %362, %4 : vector<8x32xf32>
    %364 = math.tanh %363 : vector<8x32xf32>
    %cst_245 = arith.constant dense<0.000000e+00> : vector<8x1xf32>
    %365 = tpu.matmul %364, %6, %cst_245 {dimension_numbers = #tpu.dot_dimension_numbers<[1], [0], [0], [1], [0, 0, 1, 1], [], []>} : vector<8x32xf32>, vector<32x1xf32>, vector<8x1xf32> -> vector<8x1xf32>
    %366 = vector.shape_cast %365 : vector<8x1xf32> to vector<1x8x1xf32>
    %cst_246 = arith.constant dense<0xFF800000> : vector<1xf32>
    %367 = vector.multi_reduction <maximumf>, %366, %cst_246 [1, 2] : vector<1x8x1xf32> to vector<1xf32>
    %368 = vector.shape_cast %367 : vector<1xf32> to vector<1x1x1xf32>
    %369 = vector.extract %368[0, 0, 0] : f32 from vector<1x1x1xf32>
    %370 = vector.broadcast %369 : f32 to vector<8x1xf32>
    %371 = arith.subf %365, %370 : vector<8x1xf32>
    %372 = math.exp %371 : vector<8x1xf32>
    %373 = vector.shape_cast %372 : vector<8x1xf32> to vector<1x8x1xf32>
    %cst_247 = arith.constant dense<0.000000e+00> : vector<1xf32>
    %374 = vector.multi_reduction <add>, %373, %cst_247 [1, 2] : vector<1x8x1xf32> to vector<1xf32>
    %375 = vector.shape_cast %374 : vector<1xf32> to vector<1x1x1xf32>
    %376 = vector.extract %375[0, 0, 0] : f32 from vector<1x1x1xf32>
    %cst_248 = arith.constant 1.000000e+00 : f32
    %377 = arith.divf %cst_248, %376 : f32
    %378 = vector.broadcast %372 : vector<8x1xf32> to vector<8x112xf32>
    %379 = arith.mulf %378, %3 : vector<8x112xf32>
    %cst_249 = arith.constant dense<0.000000e+00> : vector<112xf32>
    %380 = vector.multi_reduction <add>, %379, %cst_249 [0] : vector<8x112xf32> to vector<112xf32>
    %381 = vector.shape_cast %380 : vector<112xf32> to vector<1x112xf32>
    %382 = vector.broadcast %377 : f32 to vector<1x112xf32>
    %383 = arith.mulf %381, %382 : vector<1x112xf32>
    %c0_250 = arith.constant 0 : index
    %c0_251 = arith.constant 0 : index
    %c0_252 = arith.constant 0 : index
    %384 = vector.load %arg8[%c0_250, %c0_251, %c0_252] : memref<4x32x32xf32, #tpu.memory_space<vmem>>, vector<1x32x32xf32>
    %385 = vector.shape_cast %384 : vector<1x32x32xf32> to vector<32x32xf32>
    %cst_253 = arith.constant dense<0.000000e+00> : vector<1x32xf32>
    %386 = tpu.matmul %360, %385, %cst_253 {dimension_numbers = #tpu.dot_dimension_numbers<[1], [0], [0], [1], [0, 0, 1, 1], [], []>} : vector<1x32xf32>, vector<32x32xf32>, vector<1x32xf32> -> vector<1x32xf32>
    %c0_254 = arith.constant 0 : index
    %c0_255 = arith.constant 0 : index
    %c0_256 = arith.constant 0 : index
    %387 = vector.load %arg9[%c0_254, %c0_255, %c0_256] : memref<4x32x32xf32, #tpu.memory_space<vmem>>, vector<1x32x32xf32>
    %388 = vector.shape_cast %387 : vector<1x32x32xf32> to vector<32x32xf32>
    %cst_257 = arith.constant dense<0.000000e+00> : vector<1x32xf32>
    %389 = tpu.matmul %345, %388, %cst_257 {dimension_numbers = #tpu.dot_dimension_numbers<[1], [0], [0], [1], [0, 0, 1, 1], [], []>} : vector<1x32xf32>, vector<32x32xf32>, vector<1x32xf32> -> vector<1x32xf32>
    %390 = arith.addf %386, %389 : vector<1x32xf32>
    %c0_258 = arith.constant 0 : index
    %c0_259 = arith.constant 0 : index
    %c0_260 = arith.constant 0 : index
    %391 = vector.load %arg10[%c0_258, %c0_259, %c0_260] : memref<4x112x32xf32, #tpu.memory_space<vmem>>, vector<1x112x32xf32>
    %392 = vector.shape_cast %391 : vector<1x112x32xf32> to vector<112x32xf32>
    %cst_261 = arith.constant dense<0.000000e+00> : vector<1x32xf32>
    %393 = tpu.matmul %383, %392, %cst_261 {dimension_numbers = #tpu.dot_dimension_numbers<[1], [0], [0], [1], [0, 0, 1, 1], [], []>} : vector<1x112xf32>, vector<112x32xf32>, vector<1x32xf32> -> vector<1x32xf32>
    %394 = arith.addf %390, %393 : vector<1x32xf32>
    %c0_262 = arith.constant 0 : index
    %c0_263 = arith.constant 0 : index
    %c0_264 = arith.constant 0 : index
    %395 = vector.load %arg11[%c0_262, %c0_263, %c0_264] : memref<4x1x32xf32, #tpu.memory_space<vmem>>, vector<1x1x32xf32>
    %396 = vector.shape_cast %395 : vector<1x1x32xf32> to vector<1x32xf32>
    %397 = arith.addf %394, %396 : vector<1x32xf32>
    %398 = arith.negf %397 : vector<1x32xf32>
    %399 = math.exp %398 : vector<1x32xf32>
    %cst_265 = arith.constant 1.000000e+00 : f32
    %400 = vector.broadcast %cst_265 : f32 to vector<1x32xf32>
    %401 = arith.addf %400, %399 : vector<1x32xf32>
    %402 = arith.divf %400, %401 : vector<1x32xf32>
    %c1_266 = arith.constant 1 : index
    %c0_267 = arith.constant 0 : index
    %c0_268 = arith.constant 0 : index
    %403 = vector.load %arg8[%c1_266, %c0_267, %c0_268] : memref<4x32x32xf32, #tpu.memory_space<vmem>>, vector<1x32x32xf32>
    %404 = vector.shape_cast %403 : vector<1x32x32xf32> to vector<32x32xf32>
    %cst_269 = arith.constant dense<0.000000e+00> : vector<1x32xf32>
    %405 = tpu.matmul %360, %404, %cst_269 {dimension_numbers = #tpu.dot_dimension_numbers<[1], [0], [0], [1], [0, 0, 1, 1], [], []>} : vector<1x32xf32>, vector<32x32xf32>, vector<1x32xf32> -> vector<1x32xf32>
    %c1_270 = arith.constant 1 : index
    %c0_271 = arith.constant 0 : index
    %c0_272 = arith.constant 0 : index
    %406 = vector.load %arg9[%c1_270, %c0_271, %c0_272] : memref<4x32x32xf32, #tpu.memory_space<vmem>>, vector<1x32x32xf32>
    %407 = vector.shape_cast %406 : vector<1x32x32xf32> to vector<32x32xf32>
    %cst_273 = arith.constant dense<0.000000e+00> : vector<1x32xf32>
    %408 = tpu.matmul %345, %407, %cst_273 {dimension_numbers = #tpu.dot_dimension_numbers<[1], [0], [0], [1], [0, 0, 1, 1], [], []>} : vector<1x32xf32>, vector<32x32xf32>, vector<1x32xf32> -> vector<1x32xf32>
    %409 = arith.addf %405, %408 : vector<1x32xf32>
    %c1_274 = arith.constant 1 : index
    %c0_275 = arith.constant 0 : index
    %c0_276 = arith.constant 0 : index
    %410 = vector.load %arg10[%c1_274, %c0_275, %c0_276] : memref<4x112x32xf32, #tpu.memory_space<vmem>>, vector<1x112x32xf32>
    %411 = vector.shape_cast %410 : vector<1x112x32xf32> to vector<112x32xf32>
    %cst_277 = arith.constant dense<0.000000e+00> : vector<1x32xf32>
    %412 = tpu.matmul %383, %411, %cst_277 {dimension_numbers = #tpu.dot_dimension_numbers<[1], [0], [0], [1], [0, 0, 1, 1], [], []>} : vector<1x112xf32>, vector<112x32xf32>, vector<1x32xf32> -> vector<1x32xf32>
    %413 = arith.addf %409, %412 : vector<1x32xf32>
    %c1_278 = arith.constant 1 : index
    %c0_279 = arith.constant 0 : index
    %c0_280 = arith.constant 0 : index
    %414 = vector.load %arg11[%c1_278, %c0_279, %c0_280] : memref<4x1x32xf32, #tpu.memory_space<vmem>>, vector<1x1x32xf32>
    %415 = vector.shape_cast %414 : vector<1x1x32xf32> to vector<1x32xf32>
    %416 = arith.addf %413, %415 : vector<1x32xf32>
    %417 = arith.negf %416 : vector<1x32xf32>
    %418 = math.exp %417 : vector<1x32xf32>
    %cst_281 = arith.constant 1.000000e+00 : f32
    %419 = vector.broadcast %cst_281 : f32 to vector<1x32xf32>
    %420 = arith.addf %419, %418 : vector<1x32xf32>
    %421 = arith.divf %419, %420 : vector<1x32xf32>
    %c2_282 = arith.constant 2 : index
    %c0_283 = arith.constant 0 : index
    %c0_284 = arith.constant 0 : index
    %422 = vector.load %arg8[%c2_282, %c0_283, %c0_284] : memref<4x32x32xf32, #tpu.memory_space<vmem>>, vector<1x32x32xf32>
    %423 = vector.shape_cast %422 : vector<1x32x32xf32> to vector<32x32xf32>
    %cst_285 = arith.constant dense<0.000000e+00> : vector<1x32xf32>
    %424 = tpu.matmul %360, %423, %cst_285 {dimension_numbers = #tpu.dot_dimension_numbers<[1], [0], [0], [1], [0, 0, 1, 1], [], []>} : vector<1x32xf32>, vector<32x32xf32>, vector<1x32xf32> -> vector<1x32xf32>
    %c2_286 = arith.constant 2 : index
    %c0_287 = arith.constant 0 : index
    %c0_288 = arith.constant 0 : index
    %425 = vector.load %arg9[%c2_286, %c0_287, %c0_288] : memref<4x32x32xf32, #tpu.memory_space<vmem>>, vector<1x32x32xf32>
    %426 = vector.shape_cast %425 : vector<1x32x32xf32> to vector<32x32xf32>
    %cst_289 = arith.constant dense<0.000000e+00> : vector<1x32xf32>
    %427 = tpu.matmul %345, %426, %cst_289 {dimension_numbers = #tpu.dot_dimension_numbers<[1], [0], [0], [1], [0, 0, 1, 1], [], []>} : vector<1x32xf32>, vector<32x32xf32>, vector<1x32xf32> -> vector<1x32xf32>
    %428 = arith.addf %424, %427 : vector<1x32xf32>
    %c2_290 = arith.constant 2 : index
    %c0_291 = arith.constant 0 : index
    %c0_292 = arith.constant 0 : index
    %429 = vector.load %arg10[%c2_290, %c0_291, %c0_292] : memref<4x112x32xf32, #tpu.memory_space<vmem>>, vector<1x112x32xf32>
    %430 = vector.shape_cast %429 : vector<1x112x32xf32> to vector<112x32xf32>
    %cst_293 = arith.constant dense<0.000000e+00> : vector<1x32xf32>
    %431 = tpu.matmul %383, %430, %cst_293 {dimension_numbers = #tpu.dot_dimension_numbers<[1], [0], [0], [1], [0, 0, 1, 1], [], []>} : vector<1x112xf32>, vector<112x32xf32>, vector<1x32xf32> -> vector<1x32xf32>
    %432 = arith.addf %428, %431 : vector<1x32xf32>
    %c2_294 = arith.constant 2 : index
    %c0_295 = arith.constant 0 : index
    %c0_296 = arith.constant 0 : index
    %433 = vector.load %arg11[%c2_294, %c0_295, %c0_296] : memref<4x1x32xf32, #tpu.memory_space<vmem>>, vector<1x1x32xf32>
    %434 = vector.shape_cast %433 : vector<1x1x32xf32> to vector<1x32xf32>
    %435 = arith.addf %432, %434 : vector<1x32xf32>
    %436 = arith.negf %435 : vector<1x32xf32>
    %437 = math.exp %436 : vector<1x32xf32>
    %cst_297 = arith.constant 1.000000e+00 : f32
    %438 = vector.broadcast %cst_297 : f32 to vector<1x32xf32>
    %439 = arith.addf %438, %437 : vector<1x32xf32>
    %440 = arith.divf %438, %439 : vector<1x32xf32>
    %c3_298 = arith.constant 3 : index
    %c0_299 = arith.constant 0 : index
    %c0_300 = arith.constant 0 : index
    %441 = vector.load %arg8[%c3_298, %c0_299, %c0_300] : memref<4x32x32xf32, #tpu.memory_space<vmem>>, vector<1x32x32xf32>
    %442 = vector.shape_cast %441 : vector<1x32x32xf32> to vector<32x32xf32>
    %cst_301 = arith.constant dense<0.000000e+00> : vector<1x32xf32>
    %443 = tpu.matmul %360, %442, %cst_301 {dimension_numbers = #tpu.dot_dimension_numbers<[1], [0], [0], [1], [0, 0, 1, 1], [], []>} : vector<1x32xf32>, vector<32x32xf32>, vector<1x32xf32> -> vector<1x32xf32>
    %c3_302 = arith.constant 3 : index
    %c0_303 = arith.constant 0 : index
    %c0_304 = arith.constant 0 : index
    %444 = vector.load %arg9[%c3_302, %c0_303, %c0_304] : memref<4x32x32xf32, #tpu.memory_space<vmem>>, vector<1x32x32xf32>
    %445 = vector.shape_cast %444 : vector<1x32x32xf32> to vector<32x32xf32>
    %cst_305 = arith.constant dense<0.000000e+00> : vector<1x32xf32>
    %446 = tpu.matmul %345, %445, %cst_305 {dimension_numbers = #tpu.dot_dimension_numbers<[1], [0], [0], [1], [0, 0, 1, 1], [], []>} : vector<1x32xf32>, vector<32x32xf32>, vector<1x32xf32> -> vector<1x32xf32>
    %447 = arith.addf %443, %446 : vector<1x32xf32>
    %c3_306 = arith.constant 3 : index
    %c0_307 = arith.constant 0 : index
    %c0_308 = arith.constant 0 : index
    %448 = vector.load %arg10[%c3_306, %c0_307, %c0_308] : memref<4x112x32xf32, #tpu.memory_space<vmem>>, vector<1x112x32xf32>
    %449 = vector.shape_cast %448 : vector<1x112x32xf32> to vector<112x32xf32>
    %cst_309 = arith.constant dense<0.000000e+00> : vector<1x32xf32>
    %450 = tpu.matmul %383, %449, %cst_309 {dimension_numbers = #tpu.dot_dimension_numbers<[1], [0], [0], [1], [0, 0, 1, 1], [], []>} : vector<1x112xf32>, vector<112x32xf32>, vector<1x32xf32> -> vector<1x32xf32>
    %451 = arith.addf %447, %450 : vector<1x32xf32>
    %c3_310 = arith.constant 3 : index
    %c0_311 = arith.constant 0 : index
    %c0_312 = arith.constant 0 : index
    %452 = vector.load %arg11[%c3_310, %c0_311, %c0_312] : memref<4x1x32xf32, #tpu.memory_space<vmem>>, vector<1x1x32xf32>
    %453 = vector.shape_cast %452 : vector<1x1x32xf32> to vector<1x32xf32>
    %454 = arith.addf %451, %453 : vector<1x32xf32>
    %455 = math.tanh %454 : vector<1x32xf32>
    %456 = arith.mulf %421, %342 : vector<1x32xf32>
    %457 = arith.mulf %402, %455 : vector<1x32xf32>
    %458 = arith.addf %456, %457 : vector<1x32xf32>
    %459 = math.tanh %458 : vector<1x32xf32>
    %460 = arith.mulf %440, %459 : vector<1x32xf32>
    %461 = arith.mulf %460, %7 : vector<1x32xf32>
    %462 = arith.index_cast %c3_i32 : i32 to index
    %c0_313 = arith.constant 0 : index
    %c0_314 = arith.constant 0 : index
    %463 = vector.load %arg13[%462, %c0_313, %c0_314] : memref<4x1x32xf32, #tpu.memory_space<vmem>>, vector<1x1x32xf32>
    %464 = vector.shape_cast %463 : vector<1x1x32xf32> to vector<1x32xf32>
    %465 = vector.shape_cast %458 : vector<1x32xf32> to vector<1x1x32xf32>
    tpu.vector_store %arg13[%462, %c0_313, %c0_314], %465 {strides = array<i32>} : memref<4x1x32xf32, #tpu.memory_space<vmem>>, vector<1x1x32xf32>,
    %466 = arith.index_cast %c3_i32 : i32 to index
    %c0_315 = arith.constant 0 : index
    %c0_316 = arith.constant 0 : index
    %467 = vector.load %arg14[%466, %c0_315, %c0_316] : memref<4x1x32xf32, #tpu.memory_space<vmem>>, vector<1x1x32xf32>
    %468 = vector.shape_cast %467 : vector<1x1x32xf32> to vector<1x32xf32>
    %469 = vector.shape_cast %461 : vector<1x32xf32> to vector<1x1x32xf32>
    tpu.vector_store %arg14[%466, %c0_315, %c0_316], %469 {strides = array<i32>} : memref<4x1x32xf32, #tpu.memory_space<vmem>>, vector<1x1x32xf32>,
    %470 = arith.index_cast %c3_i32 : i32 to index
    %c0_317 = arith.constant 0 : index
    %c0_318 = arith.constant 0 : index
    %471 = vector.load %arg15[%470, %c0_317, %c0_318] : memref<4x1x112xf32, #tpu.memory_space<vmem>>, vector<1x1x112xf32>
    %472 = vector.shape_cast %471 : vector<1x1x112xf32> to vector<1x112xf32>
    %473 = vector.shape_cast %383 : vector<1x112xf32> to vector<1x1x112xf32>
    tpu.vector_store %arg15[%470, %c0_317, %c0_318], %473 {strides = array<i32>} : memref<4x1x112xf32, #tpu.memory_space<vmem>>, vector<1x1x112xf32>,
    %c4_i32 = arith.constant 4 : i32
    %c0_319 = arith.constant 0 : index
    %c0_320 = arith.constant 0 : index
    %474 = vector.load %arg16[%c0_319, %c0_320] : memref<1x32xf32, #tpu.memory_space<vmem>>, vector<1x32xf32>
    tpu.vector_store %arg16[%c0_319, %c0_320], %461 {strides = array<i32>} : memref<1x32xf32, #tpu.memory_space<vmem>>, vector<1x32xf32>,
    %c0_321 = arith.constant 0 : index
    %c0_322 = arith.constant 0 : index
    %475 = vector.load %arg17[%c0_321, %c0_322] : memref<1x32xf32, #tpu.memory_space<vmem>>, vector<1x32xf32>
    tpu.vector_store %arg17[%c0_321, %c0_322], %458 {strides = array<i32>} : memref<1x32xf32, #tpu.memory_space<vmem>>, vector<1x32xf32>,
    return
  }
  func.func @transform_0(%arg0: i32) -> (i32, i32, i32) {
    %c0_i32 = arith.constant 0 : i32
    %c0_i32_0 = arith.constant 0 : i32
    %c0_i32_1 = arith.constant 0 : i32
    return %arg0, %c0_i32, %c0_i32_0 : i32, i32, i32
  }
  func.func @transform_1(%arg0: i32) -> (i32, i32) {
    %c0_i32 = arith.constant 0 : i32
    %c0_i32_0 = arith.constant 0 : i32
    %c0_i32_1 = arith.constant 0 : i32
    return %c0_i32, %c0_i32_0 : i32, i32
  }
  func.func @transform_2(%arg0: i32) -> (i32, i32) {
    %c0_i32 = arith.constant 0 : i32
    %c0_i32_0 = arith.constant 0 : i32
    %c0_i32_1 = arith.constant 0 : i32
    return %c0_i32, %c0_i32_0 : i32, i32
  }
  func.func @transform_3(%arg0: i32) -> (i32, i32) {
    %c0_i32 = arith.constant 0 : i32
    %c0_i32_0 = arith.constant 0 : i32
    %c0_i32_1 = arith.constant 0 : i32
    return %c0_i32, %c0_i32_0 : i32, i32
  }
  func.func @transform_4(%arg0: i32) -> (i32, i32) {
    %c0_i32 = arith.constant 0 : i32
    %c0_i32_0 = arith.constant 0 : i32
    %c0_i32_1 = arith.constant 0 : i32
    return %c0_i32, %c0_i32_0 : i32, i32
  }
  func.func @transform_5(%arg0: i32) -> (i32, i32) {
    %c0_i32 = arith.constant 0 : i32
    %c0_i32_0 = arith.constant 0 : i32
    %c0_i32_1 = arith.constant 0 : i32
    return %c0_i32, %c0_i32_0 : i32, i32
  }
  func.func @transform_6(%arg0: i32) -> (i32, i32) {
    %c0_i32 = arith.constant 0 : i32
    %c0_i32_0 = arith.constant 0 : i32
    %c0_i32_1 = arith.constant 0 : i32
    return %c0_i32, %c0_i32_0 : i32, i32
  }
  func.func @transform_7(%arg0: i32) -> (i32, i32, i32) {
    %c0_i32 = arith.constant 0 : i32
    %c0_i32_0 = arith.constant 0 : i32
    %c0_i32_1 = arith.constant 0 : i32
    %c0_i32_2 = arith.constant 0 : i32
    return %c0_i32, %c0_i32_0, %c0_i32_1 : i32, i32, i32
  }
  func.func @transform_8(%arg0: i32) -> (i32, i32, i32) {
    %c0_i32 = arith.constant 0 : i32
    %c0_i32_0 = arith.constant 0 : i32
    %c0_i32_1 = arith.constant 0 : i32
    %c0_i32_2 = arith.constant 0 : i32
    return %c0_i32, %c0_i32_0, %c0_i32_1 : i32, i32, i32
  }
  func.func @transform_9(%arg0: i32) -> (i32, i32, i32) {
    %c0_i32 = arith.constant 0 : i32
    %c0_i32_0 = arith.constant 0 : i32
    %c0_i32_1 = arith.constant 0 : i32
    %c0_i32_2 = arith.constant 0 : i32
    return %c0_i32, %c0_i32_0, %c0_i32_1 : i32, i32, i32
  }
  func.func @transform_10(%arg0: i32) -> (i32, i32, i32) {
    %c0_i32 = arith.constant 0 : i32
    %c0_i32_0 = arith.constant 0 : i32
    %c0_i32_1 = arith.constant 0 : i32
    %c0_i32_2 = arith.constant 0 : i32
    return %c0_i32, %c0_i32_0, %c0_i32_1 : i32, i32, i32
  }
  func.func @transform_11(%arg0: i32) -> (i32, i32) {
    %c0_i32 = arith.constant 0 : i32
    %c0_i32_0 = arith.constant 0 : i32
    %c0_i32_1 = arith.constant 0 : i32
    return %c0_i32, %c0_i32_0 : i32, i32
  }
  func.func @transform_12(%arg0: i32) -> (i32, i32, i32) {
    %c0_i32 = arith.constant 0 : i32
    %c0_i32_0 = arith.constant 0 : i32
    %c0_i32_1 = arith.constant 0 : i32
    return %arg0, %c0_i32, %c0_i32_0 : i32, i32, i32
  }
  func.func @transform_13(%arg0: i32) -> (i32, i32, i32) {
    %c0_i32 = arith.constant 0 : i32
    %c0_i32_0 = arith.constant 0 : i32
    %c0_i32_1 = arith.constant 0 : i32
    return %arg0, %c0_i32, %c0_i32_0 : i32, i32, i32
  }
  func.func @transform_14(%arg0: i32) -> (i32, i32, i32) {
    %c0_i32 = arith.constant 0 : i32
    %c0_i32_0 = arith.constant 0 : i32
    %c0_i32_1 = arith.constant 0 : i32
    return %arg0, %c0_i32, %c0_i32_0 : i32, i32, i32
  }
}

</mosaic_0001>

<bundles_post_ra>
// kernel: tpu_custom_call.1
= control target key start
LH: loop header
LB: loop body
LE: loop exit
PB: predicated region body
PF: predicated region fallthrough
CT: control target
= control target key end

     0   :  { %s9891_s0 = inlined_call_operand.vmem [shape: f32[8,1,32], index: 0, kind: input, shape index: {}]   ;;  %s9892_s1 = inlined_call_operand.vmem [shape: f32[1,32], index: 1, kind: input, shape index: {}]   ;;  %s9893_s2 = inlined_call_operand.vmem [shape: f32[1,32], index: 2, kind: input, shape index: {}]   ;;  %s9894_s3 = inlined_call_operand.vmem [shape: f32[8,112], index: 3, kind: input, shape index: {}]   ;;  %s9895_s4 = inlined_call_operand.vmem [shape: f32[8,32], index: 4, kind: input, shape index: {}]   ;;  %s9896_s5 = inlined_call_operand.vmem [shape: f32[32,32], index: 5, kind: input, shape index: {}]   ;;  %s9897_s6 = inlined_call_operand.vmem [shape: f32[32,1], index: 6, kind: input, shape index: {}]   ;;  %s9898_s7 = inlined_call_operand.vmem [shape: f32[4,32,32], index: 7, kind: input, shape index: {}]   ;;  %s9899_s8 = inlined_call_operand.vmem [shape: f32[4,32,32], index: 8, kind: input, shape index: {}]   ;;  %s9900_s9 = inlined_call_operand.vmem [shape: f32[4,112,32], index: 9, kind: input, shape index: {}]   ;;  %s9901_s10 = inlined_call_operand.vmem [shape: f32[4,1,32], index: 10, kind: input, shape index: {}]   ;;  %s9902_s11 = inlined_call_operand.vmem [shape: f32[1,32], index: 11, kind: input, shape index: {}]   ;;  %s9903_s12 = inlined_call_operand.hbm [shape: f32[8,1,32], index: 12, kind: output, shape index: {0}]   ;;  %s9904_s13 = inlined_call_operand.hbm [shape: f32[8,1,32], index: 13, kind: output, shape index: {1}]   ;;  %s9905_s14 = inlined_call_operand.hbm [shape: f32[8,1,112], index: 14, kind: output, shape index: {2}]  }
   0x1   :  { %10010 = sst [smem:[#allocation64_spill]] %s9891_s0 }
   0x2   :  { %10011 = sst [smem:[#allocation65_spill]] %s9892_s1 }
   0x3   :  { %10012 = sst [smem:[#allocation66_spill]] %s9893_s2 }
   0x4   :  { %10013 = sst [smem:[#allocation67_spill]] %s9894_s3 }
   0x5   :  { %20 = vsyncpa [#allocation5], 0 }
   0x6   :  { %22 = vsyncpa [#allocation5 + $0x1], 0 }
   0x7   :  { %23 = vsyncpa [#allocation7], 0 }
   0x8   :  { %25 = vsyncpa [#allocation7 + $0x1], 0  ;;  %s7526_s29 = smov 0   ;;  %s7528_s30 = smov 0  }
   0x9   :  { %s7530_s15 = smov 0   ;;  %s7532_s16 = smov 0  }
   0xa LB: > { %10014 = sst [smem:[#allocation11_spill]] %s7429_s29  ;;  %s7547_s17 = sadd.s32 4294967295, %s7441_s16   ;;  %s7441_s16 = sphi %s7532_s16, %s10220_s16   ;;  %s7437_s15 = sphi %s7530_s15, %s10222_s15   ;;  %s7433_s30 = sphi %s7528_s30, %s10224_s30   ;;  %s7429_s29 = sphi %s7526_s29, %s10223_s29  }
   0xb   : > { %10015 = sst [smem:[#allocation12_spill]] %s7437_s15  ;;  %s9906_s18 = sadd.s32 4294967294, %s7441_s16  }
   0xc   : > { %s7551_s19 = sadd.s32 1, %s7441_s16   ;;  %s295_s20 = sadd.s32 1, %s7437_s15 }
   0xd   : > { %10016 = sst [smem:[#allocation13_spill]] %s7551_s19  ;;  %s292_s21 = ssub.s32 %s7441_s16, %s7551_s19 }
   0xe   : > { %p305_p0 = scmp.ne.s32.totalorder %s7437_s15, %s7433_s30  ;;  %p293_p1 = scmp.eq.s32.totalorder %s292_s21, 0 }
   0xf   : > { %p306_p2 = scmp.eq.s32.totalorder %s7547_s17, 1  ;;  %p311_p3 = scmp.ne.s32.totalorder %s7433_s30, %s7429_s29 }
  0x10   : > { %p312_p4 = scmp.eq.s32.totalorder %s9906_s18, 1  ;;  %p5394_p7 = scmp.ge.s32.totalorder %s7441_s16, 1 }
  0x11   : > { %s7564_s22 = scalar_select %p293_p1, %s7437_s15, %s295_s20  }
  0x12   : > { %p7566_p5 = por %p306_p2, %p305_p0  ;;  %p7570_p6 = por %p312_p4, %p311_p3 }
  0x13   : > { %10017 = sst [smem:[#allocation14_spill]] %s7564_s22  ;;  %p423_p8 = scmp.lt.s32.totalorder %s7441_s16, 3 }
  0x14   : > { %s10019_s24 = scalar_select %p7570_p6, 1, 0 }
  0x15   : > { %p424_p9 = pnand %p5394_p7, %p423_p8 }
  0x16   : > { %10020 = sst [smem:[#allocation15_spill]] %s10019_s24 }
  0x17   : > { %427 = sbr.rel (%p424_p9) target bundleno = 4796 (0x12bc), region = 68 }
  0x1c   : > { %s9911_s25 = sand.u32 1, %s7433_s30   ;;  %s5398_s26 = sshll.u32 %s7547_s17, 2 }
  0x1d   : > { %s5395_s27 = sshll.u32 %s9911_s25, 2  ;;  %p479_p10 = scmp.lt.s32.totalorder %s5398_s26, 7 }
  0x1e   : > { %s10021_s0 = sld [smem:[#allocation64_spill]]  ;;  %s7585_s18 = scalar_lea.vmem [#allocation4], %s5395_s27 }
  0x1f   : > { %s10226_s26 = smov (!%p479_p10, %s5398_s26), 7  ;;  %s7587_s22 = scalar_lea.vmem [#allocation6], %s5395_s27 }
  0x20   : > { %s7589_s15 = scalar_lea.vmem [#allocation8], %s5395_s27  ;;  %p5399_p11 = scmp.ne.s32.totalorder %s7547_s17, 0 }
  0x21   : > { %s10022_s1 = sld [smem:[#allocation65_spill]] (!%p5399_p11) }
  0x22   : > { %489 = sbr.rel (%p5399_p11) target bundleno = 42 (0x2a), region = 72  ;;  %s10023_s2 = sld [smem:[#allocation66_spill]] (!%p5399_p11) }
  0x24   : > { %s7583_s21 = scalar_lea.vmem %s10021_s0, %s10226_s26 }
  0x27   : > { %v490_v0 = vld [vmem:[%s10022_s1] sm:$0x1]  ;;  %vm491_vm0 = vcmask 253952  }
  0x28   : > { %v493_v1 = vld [vmem:[%s10023_s2] sm:$0x1]  ;;  %492 = vst.msk [vmem:[#allocation2] sm:$0x1] %vm491_vm0, %v490_v0 }
  0x29   : > { %494 = vst.msk [vmem:[#allocation3] sm:$0x1] %vm491_vm0, %v493_v1 }
  0x2a PF: > { %v7601_v2 = vld [vmem:[%s9896_s5 + $0x18] sm:$0xff]  ;;  %v9917_v3 = vmov 0.0   ;;  %v7607_v4 = vld [vmem:[%s9896_s5 + $0x10] sm:$0xff]  ;;  %vm7444_vm1 = vmmov 0   ;;  %v7617_v5 = vld [vmem:[%s9896_s5 + $0x8] sm:$0xff]  ;;  %vm509_vm2 = vcmask 261120   ;;  %v583_v12 = vlaneseq }
  0x2b   : > { %6210 = vmatprep.subr.mxu0 %v9917_v3  ;;  %6218 = vmatprep.mubr.msk.f32.mxu0 %vm7444_vm1, %v9917_v3  ;;  %v7626_v6 = vld [vmem:[%s9896_s5] sm:$0xff]  ;;  %v7641_v8 = vld [vmem:[%s9897_s6 + $0x18] sm:$0xff]  ;;  %v7646_v9 = vld [vmem:[%s9897_s6 + $0x10] sm:$0xff]  ;;  %vm662_vm3 = vcmask 7168   ;;  %v7445_v24 = vmov 0   ;;  %s10029_s3 = sld [smem:[#allocation67_spill]] }
  0x2c   : > { %6211 = vmatpush3.msra.mxu0 %v7601_v2  ;;  %6243 = vmatprep.subr.mxu1 %v9917_v3  ;;  %v7653_v10 = vld [vmem:[%s9897_s6 + $0x8] sm:$0xff]  ;;  %v7660_v11 = vld [vmem:[%s9897_s6] sm:$0xff]  ;;  %v584_v13 = vshrl.u32 %v583_v12, 7  ;;  %v7683_v37 = vld [vmem:[%s9898_s7 + $0x18] sm:$0xff]  ;;  %vm696_vm4 = vcmask 916480   ;;  %vm1692_vm5 = vcmask 909312  }
  0x2d   : > { %6212 = vmatprep.subr.mxu0 %v9917_v3  ;;  %6251 = vmatprep.mubr.msk.f32.mxu1 %vm7444_vm1, %v9917_v3  ;;  %v7671_v15 = vld [vmem:[%s9895_s4] sm:$0xff]  ;;  %v7688_v38 = vld [vmem:[%s9898_s7 + $0x10] sm:$0xff]  ;;  %v7695_v39 = vld [vmem:[%s9898_s7 + $0x8] sm:$0xff]  ;;  %vm1689_vm6 = vcmask 253952  }
  0x2e   : > { %6213 = vmatpush3.msra.mxu0 %v7607_v4  ;;  %v7666_v14 = vsub.s32 0, %v584_v13  ;;  %7224 = vset.pattern.permute.xlu1 %v7445_v24  ;;  %v7704_v40 = vld [vmem:[%s9898_s7] sm:$0xff]  ;;  %v7710_v41 = vld [vmem:[%s9899_s8 + $0x18] sm:$0xff]  ;;  %v7725_v44 = vld [vmem:[%s9899_s8 + $0x10] sm:$0xff] }
  0x2f   : > { %6214 = vmatprep.subr.mxu0 %v9917_v3  ;;  %v7629_v7 = vld [vmem:[#allocation2] sm:$0x1]  ;;  %7225 = vset.pattern.permute.xlu0 %v7445_v24  ;;  %v7718_v43 = vld [vmem:[%s9899_s8 + $0x38] sm:$0xff]  ;;  %v7733_v45 = vld [vmem:[%s9899_s8 + $0x30] sm:$0xff] }
  0x30   : > { %6215 = vmatpush3.msra.mxu0 %v7617_v5  ;;  %6244 = vmatpush3.msra.mxu1 %v7683_v37  ;;  %v7713_v42 = vld [vmem:[%s7583_s21] sm:$0x1]  ;;  %v7738_v46 = vld [vmem:[%s9899_s8 + $0x8] sm:$0xff]  ;;  %v7771_v50 = vld [vmem:[%s9898_s7 + $0x38] sm:$0xff] }
  0x31   : > { %6216 = vmatprep.subr.mxu0 %v9917_v3  ;;  %6245 = vmatprep.subr.mxu1 %v9917_v3  ;;  %v7747_v47 = vld [vmem:[%s9899_s8 + $0x28] sm:$0xff]  ;;  %v7752_v48 = vld [vmem:[%s9899_s8] sm:$0xff]  ;;  %v7782_v51 = vld [vmem:[%s9898_s7 + $0x30] sm:$0xff] }
  0x32   : > { %6217 = vmatpush3.msra.mxu0 %v7626_v6  ;;  %6246 = vmatpush3.msra.mxu1 %v7688_v38  ;;  %v7761_v49 = vld [vmem:[%s9899_s8 + $0x20] sm:$0xff]  ;;  %v7787_v52 = vld [vmem:[%s9900_s9 + $0x68] sm:$0xff]  ;;  %v7816_v56 = vld [vmem:[%s9900_s9 + $0x58] sm:$0xff] }
  0x33   : > { %6219 = vmatmul.mubr.msk.f32.vlgmr.msra.gmra.mxu0 %vm509_vm2, %v7629_v7  ;;  %6221 = vmatprep.subr.mxu0 %v9917_v3  ;;  %v7796_v53 = vld [vmem:[%s9898_s7 + $0x28] sm:$0xff]  ;;  %v7802_v54 = vld [vmem:[%s9900_s9 + $0x60] sm:$0xff]  ;;  %v7824_v57 = vld [vmem:[%s9900_s9 + $0xd8] sm:$0xff] }
  0x34   : > { %6229 = vmatprep.mubr.msk.f32.mxu0 %vm7444_vm1, %v9917_v3  ;;  %6222 = vmatpush3.msra.mxu0 %v7641_v8  ;;  %v7810_v55 = vld [vmem:[%s9898_s7 + $0x20] sm:$0xff]  ;;  %v7832_v58 = vld [vmem:[%s9900_s9 + $0x50] sm:$0xff]  ;;  %v7847_v60 = vld [vmem:[%s9900_s9 + $0x48] sm:$0xff] }
  0x35   : > { %6223 = vmatprep.subr.mxu0 %v9917_v3  ;;  %6247 = vmatprep.subr.mxu1 %v9917_v3  ;;  %v7840_v59 = vld [vmem:[%s9900_s9 + $0xd0] sm:$0xff]  ;;  %v7853_v61 = vld [vmem:[%s9900_s9 + $0xc8] sm:$0xff]  ;;  %v7861_v62 = vld [vmem:[%s9900_s9 + $0x40] sm:$0xff] }
  0x36   : > { %6224 = vmatpush3.msra.mxu0 %v7646_v9  ;;  %6248 = vmatpush3.msra.mxu1 %v7695_v39  ;;  %v7867_v63 = vld [vmem:[%s9900_s9 + $0xc0] sm:$0xff]  ;;  %v7875_v0 = vld [vmem:[%s9900_s9 + $0x38] sm:$0xff]  ;;  %v7889_v12 = vld [vmem:[%s9900_s9 + $0x30] sm:$0xff] }
  0x37   : > { %6225 = vmatprep.subr.mxu0 %v9917_v3  ;;  %6249 = vmatprep.subr.mxu1 %v9917_v3  ;;  %v7881_v1 = vld [vmem:[%s9900_s9 + $0xb8] sm:$0xff]  ;;  %v7895_v13 = vld [vmem:[%s9900_s9 + $0xb0] sm:$0xff]  ;;  %v7960_v24 = vld [vmem:[%s9900_s9 + $0x88] sm:$0xff] }
  0x38   : > { %6226 = vmatpush3.msra.mxu0 %v7653_v10  ;;  %6250 = vmatpush3.msra.mxu1 %v7704_v40 }
  0x39   : > { %6227 = vmatprep.subr.mxu0 %v9917_v3  ;;  %6285 = vmatprep.subr.mxu1 %v9917_v3 }
  0x3a   : > { %6228 = vmatpush3.msra.mxu0 %v7660_v11  ;;  %6252 = vmatmul.mubr.msk.f32.vlgmr.msra.gmra.mxu1 %vm509_vm2, %v7713_v42 }
  0x3b   : > { %6232 = vmatprep.subr.mxu0 %v9917_v3  ;;  %6286 = vmatpush3.msra.mxu1 %v7718_v43 }
  0x3c   : > { %6287 = vmatprep.subr.mxu1 %v9917_v3  ;;  %6293 = vmatprep.mubr.msk.f32.mxu1 %vm7444_vm1, %v9917_v3 }
  0x3d   : > { %6288 = vmatpush3.msra.mxu1 %v7733_v45 }
  0x3e   : > { %6289 = vmatprep.subr.mxu1 %v9917_v3 }
  0x3f   : > { %6290 = vmatpush3.msra.mxu1 %v7747_v47 }
  0x40   : > { %6291 = vmatprep.subr.mxu1 %v9917_v3 }
  0x41   : > { %6292 = vmatpush3.msra.mxu1 %v7761_v49 }
  0x42   : > { %6296 = vmatprep.subr.mxu1 %v9917_v3  ;;  %6294 = vmatmul.mubr.msk.f32.vlgmr.msra.gmra.mxu1 %vm509_vm2, %v7629_v7 }
  0x43   : > { %6297 = vmatpush3.msra.mxu1 %v7771_v50  ;;  %6304 = vmatprep.mubr.msk.f32.mxu1 %vm7444_vm1, %v9917_v3 }
  0x44   : > { %6298 = vmatprep.subr.mxu1 %v9917_v3 }
  0x45   : > { %6299 = vmatpush3.msra.mxu1 %v7782_v51 }
  0x46   : > { %6300 = vmatprep.subr.mxu1 %v9917_v3 }
  0x47   : > { %6301 = vmatpush3.msra.mxu1 %v7796_v53 }
  0x48   : > { %6302 = vmatprep.subr.mxu1 %v9917_v3 }
  0x49   : > { %6303 = vmatpush3.msra.mxu1 %v7810_v55 }
  0x4a   : > { %6305 = vmatmul.mubr.msk.f32.vlgmr.msra.gmra.mxu1 %vm509_vm2, %v7713_v42  ;;  %6307 = vmatprep.subr.mxu1 %v9917_v3 }
  0x4b   : > { %6308 = vmatpush3.msra.mxu1 %v7824_v57  ;;  %6335 = vmatprep.mubr.msk.f32.mxu1 %vm7444_vm1, %v9917_v3 }
  0x4c   : > { %6309 = vmatprep.subr.mxu1 %v9917_v3 }
  0x4d   : > { %6310 = vmatpush3.msra.mxu1 %v7840_v59 }
  0x4e   : > { %6311 = vmatprep.subr.mxu1 %v9917_v3 }
  0x4f   : > { %6312 = vmatpush3.msra.mxu1 %v7853_v61 }
  0x50   : > { %6313 = vmatprep.subr.mxu1 %v9917_v3 }
  0x51   : > { %6314 = vmatpush3.msra.mxu1 %v7867_v63 }
  0x52   : > { %6315 = vmatprep.subr.mxu1 %v9917_v3 }
  0x53   : > { %6316 = vmatpush3.msra.mxu1 %v7881_v1 }
  0x54   : > { %6317 = vmatprep.subr.mxu1 %v9917_v3 }
  0x55   : > { %6318 = vmatpush3.msra.mxu1 %v7895_v13 }
  0x56   : > { %6319 = vmatprep.subr.mxu1 %v9917_v3 }
  0xf3   : > { %v579_v16 = vpop.f32.mrf.mxu0 }
  0xf4   : > { %v586_v17 = vrot.slane %v579_v16, %v7666_v14  ;;  %v7903_v16 = vld [vmem:[%s9900_s9 + $0x28] sm:$0xff] }
  0xf5   : > { %v6220_v18 = vpop.f32.mrf.mxu0 }
  0xf6   : > { %v587_v19 = vadd.f32 %v586_v17, %v7671_v15  ;;  %v7909_v17 = vld [vmem:[%s9900_s9 + $0xa8] sm:$0xff]  ;;  %v7917_v18 = vld [vmem:[%s9900_s9 + $0x20] sm:$0xff] }
  0xf7   : > { %10024 = vst [vmem:[#allocation16_spill] sm:$0xff] %v7917_v18  ;;  %6320 = vmatpush3.msra.mxu1 %v7909_v17 }
  0xf8   : > { %7226 = vtanh.f32 %v587_v19  ;;  %v7923_v19 = vld [vmem:[%s9900_s9 + $0xa0] sm:$0xff]  ;;  %6321 = vmatprep.subr.mxu1 %v9917_v3 }
  0xf9   : > { %6322 = vmatpush3.msra.mxu1 %v7923_v19 }
  0xfa   : > { %6323 = vmatprep.subr.mxu1 %v9917_v3 }
 0x105   : > { %v7227_v20 = vpop.eup %7226 }
 0x106   : > { %6230 = vmatmul.mubr.msk.f32.vlgmr.msra.gmra.mxu0 %vm509_vm2, %v7227_v20  ;;  %v7931_v20 = vld [vmem:[%s9900_s9 + $0x18] sm:$0xff] }
 0x107   : > { %6240 = vmatprep.mubr.msk.f32.mxu0 %vm7444_vm1, %v9917_v3  ;;  %6233 = vmatpush3.msra.mxu0 %v7710_v41  ;;  %10025 = vst [vmem:[#allocation17_spill] sm:$0xff] %v7931_v20 }
 0x108   : > { %6234 = vmatprep.subr.mxu0 %v9917_v3 }
 0x109   : > { %6235 = vmatpush3.msra.mxu0 %v7725_v44 }
 0x10a   : > { %6236 = vmatprep.subr.mxu0 %v9917_v3 }
 0x10b   : > { %6237 = vmatpush3.msra.mxu0 %v7738_v46 }
 0x10c   : > { %6238 = vmatprep.subr.mxu0 %v9917_v3 }
 0x10d   : > { %6239 = vmatpush3.msra.mxu0 %v7752_v48 }
 0x10e   : > { %6241 = vmatmul.mubr.msk.f32.vlgmr.msra.gmra.mxu0 %vm509_vm2, %v7629_v7  ;;  %6254 = vmatprep.subr.mxu0 %v9917_v3 }
 0x10f   : > { %6255 = vmatpush3.msra.mxu0 %v7787_v52  ;;  %6282 = vmatprep.mubr.msk.f32.mxu0 %vm7444_vm1, %v9917_v3 }
 0x110   : > { %6256 = vmatprep.subr.mxu0 %v9917_v3 }
 0x111   : > { %6257 = vmatpush3.msra.mxu0 %v7802_v54 }
 0x112   : > { %6258 = vmatprep.subr.mxu0 %v9917_v3 }
 0x113   : > { %6259 = vmatpush3.msra.mxu0 %v7816_v56 }
 0x114   : > { %6260 = vmatprep.subr.mxu0 %v9917_v3 }
 0x115   : > { %6261 = vmatpush3.msra.mxu0 %v7832_v58 }
 0x116   : > { %6262 = vmatprep.subr.mxu0 %v9917_v3 }
 0x117   : > { %6263 = vmatpush3.msra.mxu0 %v7847_v60 }
 0x118   : > { %6264 = vmatprep.subr.mxu0 %v9917_v3 }
 0x119   : > { %6265 = vmatpush3.msra.mxu0 %v7861_v62 }
 0x11a   : > { %6266 = vmatprep.subr.mxu0 %v9917_v3 }
 0x11b   : > { %6267 = vmatpush3.msra.mxu0 %v7875_v0 }
 0x11c   : > { %6268 = vmatprep.subr.mxu0 %v9917_v3 }
 0x11d   : > { %6269 = vmatpush3.msra.mxu0 %v7889_v12 }
 0x11e   : > { %6270 = vmatprep.subr.mxu0 %v9917_v3 }
 0x11f   : > { %6271 = vmatpush3.msra.mxu0 %v7903_v16 }
 0x120   : > { %6272 = vmatprep.subr.mxu0 %v9917_v3 }
 0x121   : > { %6273 = vmatpush3.msra.mxu0 %v7917_v18  ;;  %v8019_v18 = vld [vmem:[%s9899_s8 + $0x58] sm:$0xff] }
 0x122   : > { %6274 = vmatprep.subr.mxu0 %v9917_v3 }
 0x123   : > { %6275 = vmatpush3.msra.mxu0 %v7931_v20 }
 0x124   : > { %6276 = vmatprep.subr.mxu0 %v9917_v3 }
 0x1c6   : > { %v658_v21 = vpop.f32.mrf.mxu0 }
 0x1c7   : > { %v663_v22 = vsel %vm662_vm3, %v658_v21, -inf }
 0x1c8   : > { %664 = vmax.xlane.f32.xlu0 %v663_v22  ;;  %v6231_v23 = vpop.f32.mrf.mxu0  ;;  %v7945_v22 = vld [vmem:[%s9900_s9 + $0x10] sm:$0xff] }
 0x1c9   : > { %10026 = vst [vmem:[#allocation18_spill] sm:$0xff] %v7945_v22  ;;  %v7951_v23 = vld [vmem:[%s9900_s9 + $0x90] sm:$0xff]  ;;  %6277 = vmatpush3.msra.mxu0 %v7945_v22 }
 0x1ca   : > { %6278 = vmatprep.subr.mxu0 %v9917_v3 }
 0x251   : > { %v665_v25 = vpop.xlane.xlu0 %664 }
 0x252   : > { %v666_v26 = vrot.slane %v665_v25, 4 }
 0x254   : > { %v667_v27 = vmax.f32 %v665_v25, %v666_v26  ;;  %v7969_v25 = vld [vmem:[%s9900_s9 + $0x80] sm:$0xff]  ;;  %v7982_v26 = vld [vmem:[%s9900_s9 + $0x8] sm:$0xff] }
 0x255   : > { %10027 = vst [vmem:[#allocation19_spill] sm:$0xff] %v7982_v26  ;;  %6279 = vmatpush3.msra.mxu0 %v7982_v26 }
 0x256   : > { %v668_v28 = vrot.slane %v667_v27, 2  ;;  %6280 = vmatprep.subr.mxu0 %v9917_v3 }
 0x258   : > { %v669_v29 = vmax.f32 %v667_v27, %v668_v28  ;;  %v7987_v27 = vld [vmem:[%s9900_s9 + $0x78] sm:$0xff] }
 0x25a   : > { %v670_v30 = vrot.slane %v669_v29, 1 }
 0x25c   : > { %v671_v31 = vmax.f32 %v669_v29, %v670_v30  ;;  %v7996_v29 = vld [vmem:[%s9900_s9] sm:$0xff]  ;;  %v8001_v30 = vld [vmem:[%s9900_s9 + $0x70] sm:$0xff] }
 0x25d   : > { %10028 = vst [vmem:[#allocation20_spill] sm:$0xff] %v7996_v29  ;;  %6281 = vmatpush3.msra.mxu0 %v7996_v29  ;;  %v8010_v29 = vld [vmem:[%s10029_s3] sm:$0xff] }
 0x25e   : > { %7146 = vpush %v671_v31  ;;  %6338 = vmatprep.subr.mxu0 %v9917_v3 }
 0x28f   : > { %s7147_s27 = spop %7146 }
 0x290   : > { %v673_v32 = vstv %s7147_s27 }
 0x291   : > { %v674_v33 = vsub.f32 %v658_v21, %v673_v32  ;;  %v7937_v21 = vld [vmem:[%s9900_s9 + $0x98] sm:$0xff] }
 0x292   : > { %6324 = vmatpush3.msra.mxu1 %v7937_v21 }
 0x293   : > { %v675_v34 = vmul.f32 1.442695, %v674_v33  ;;  %6325 = vmatprep.subr.mxu1 %v9917_v3 }
 0x294   : > { %6326 = vmatpush3.msra.mxu1 %v7951_v23 }
 0x295   : > { %7228 = vpow2.f32 %v675_v34  ;;  %6327 = vmatprep.subr.mxu1 %v9917_v3 }
 0x296   : > { %6328 = vmatpush3.msra.mxu1 %v7960_v24 }
 0x297   : > { %6329 = vmatprep.subr.mxu1 %v9917_v3 }
 0x298   : > { %6330 = vmatpush3.msra.mxu1 %v7969_v25 }
 0x299   : > { %6331 = vmatprep.subr.mxu1 %v9917_v3 }
 0x29a   : > { %6332 = vmatpush3.msra.mxu1 %v7987_v27 }
 0x29b   : > { %6333 = vmatprep.subr.mxu1 %v9917_v3 }
 0x29c   : > { %6334 = vmatpush3.msra.mxu1 %v8001_v30 }
 0x29d   : > { %6391 = vmatprep.subr.mxu1 %v9917_v3 }
 0x2a2   : > { %v7229_v35 = vpop.eup %7228 }
 0x2a3   : > { %692 = vperm.xlu1 %7224, %v7229_v35   ;;  %v677_v36 = vsel %vm662_vm3, %v7229_v35, 0.0 }
 0x2a4   : > { %678 = vadd.xlane.f32.xlu0 %v677_v36 }
 0x31e   : > { %v693_v20 = vpop.permute.xlu1 %692 }
 0x31f   : > { %v695_v3 = vmul.f32 %v693_v20, %v8010_v29  ;;  %v8036_v20 = vld [vmem:[%s9899_s8 + $0x50] sm:$0xff] }
 0x320   : > { %10031 = vst [vmem:[#allocation22_spill] sm:$0xff] %v8036_v20 }
 0x32d   : > { %v679_v28 = vpop.xlane.xlu0 %678 }
 0x32e   : > { %v680_v31 = vrot.slane %v679_v28, 4 }
 0x330   : > { %v681_v32 = vadd.f32 %v680_v31, %v679_v28  ;;  %v697_v28 = vsel %vm696_vm4, %v695_v3, 0.0  ;;  %v8024_v3 = vld [vmem:[%s9899_s8 + $0x78] sm:$0xff] }
 0x331   : > { %v698_v31 = vrot.slane %v697_v28, 4  ;;  %10030 = vst [vmem:[#allocation21_spill] sm:$0xff] %v8024_v3 }
 0x332   : > { %v682_v33 = vrot.slane %v681_v32, 2 }
 0x334   : > { %v683_v34 = vadd.f32 %v682_v33, %v681_v32  ;;  %v699_v32 = vadd.f32 %v698_v31, %v697_v28  ;;  %v8041_v28 = vld [vmem:[%s9899_s8 + $0x70] sm:$0xff]  ;;  %v10033_v31 = vmov 0.0  }
 0x335   : > { %10032 = vst [vmem:[#allocation23_spill] sm:$0xff] %v8041_v28 }
 0x336   : > { %v684_v35 = vrot.slane %v683_v34, 1  ;;  %v700_v33 = vrot.slane %v699_v32, 2 }
 0x338   : > { %v685_v36 = vadd.f32 %v684_v35, %v683_v34  ;;  %v701_v34 = vadd.f32 %v700_v33, %v699_v32  ;;  %v8050_v32 = vld [vmem:[%s9899_s8 + $0x48] sm:$0xff] }
 0x339   : > { %10034 = vst [vmem:[#allocation24_spill] sm:$0xff] %v8050_v32  ;;  %v8055_v33 = vld [vmem:[%s9899_s8 + $0x68] sm:$0xff] }
 0x33a   : > { %7148 = vpush %v685_v36  ;;  %v702_v35 = vrot.slane %v701_v34, 1  ;;  %10035 = vst [vmem:[#allocation25_spill] sm:$0xff] %v8055_v33 }
 0x36b   : > { %s7149_s20 = spop %7148 }
 0x36c   : > { %v687_v26 = vstv %s7149_s20 }
 0x36d   : > { %7230 = vrcp.f32 %v687_v26  ;;  %v703_v26 = vadd.f32 %v702_v35, %v701_v34  ;;  %v8064_v34 = vld [vmem:[%s9899_s8 + $0x40] sm:$0xff] }
 0x36e   : > { %10036 = vst [vmem:[#allocation26_spill] sm:$0xff] %v8064_v34  ;;  %v8071_v35 = vld [vmem:[%s9899_s8 + $0x60] sm:$0xff] }
 0x36f   : > { %10037 = vst [vmem:[#allocation27_spill] sm:$0xff] %v8071_v35 }
 0x37a   : > { %v7231_v22 = vpop.eup %7230 }
 0x37b   : > { %7150 = vpush %v7231_v22 }
 0x3ac   : > { %s7151_s24 = spop %7150 }
 0x3ad   : > { %v704_v22 = vstv %s7151_s24 }
 0x3ae   : > { %v8014_v36 = vmul.f32 %v704_v22, %v703_v26  ;;  %v8084_v26 = vld [vmem:[%s9898_s7 + $0x58] sm:$0xff] }
 0x3af   : > { %10038 = vst [vmem:[#allocation28_spill] sm:$0xff] %v8084_v26  ;;  %v8089_v22 = vld [vmem:[%s9898_s7 + $0x78] sm:$0xff] }
 0x3b0   : > { %1693 = vst.msk [vmem:[%s7589_s15] sm:$0x1] %vm1692_vm5, %v8014_v36  ;;  %6283 = vmatmul.mubr.msk.f32.vlgmr.msra.gmra.mxu0 %vm696_vm4, %v8014_v36  ;;  %6336 = vmatmul.mubr.msk.f32.vlgmr.msra.gmra.mxu1 %vm696_vm4, %v8014_v36  ;;  %10039 = vst [vmem:[#allocation29_spill] sm:$0xff] %v8089_v22 }
 0x3b1   : > { %6339 = vmatpush3.msra.mxu0 %v8019_v18  ;;  %6392 = vmatpush3.msra.mxu1 %v8024_v3  ;;  %v8257_v3 = vld [vmem:[%s9900_s9 + $0x180] sm:$0xff] }
 0x3b2   : > { %6340 = vmatprep.subr.mxu0 %v10033_v31  ;;  %6393 = vmatprep.subr.mxu1 %v10033_v31  ;;  %10060 = vst [vmem:[#allocation50_spill] sm:$0xff] %v8257_v3 }
 0x3b3   : > { %6341 = vmatpush3.msra.mxu0 %v8036_v20  ;;  %6394 = vmatpush3.msra.mxu1 %v8041_v28  ;;  %v8180_v20 = vld [vmem:[%s9900_s9 + $0x138] sm:$0xff] }
 0x3b4   : > { %6342 = vmatprep.subr.mxu0 %v10033_v31  ;;  %6395 = vmatprep.subr.mxu1 %v10033_v31  ;;  %10050 = vst [vmem:[#allocation40_spill] sm:$0xff] %v8180_v20 }
 0x3b5   : > { %6343 = vmatpush3.msra.mxu0 %v8050_v32  ;;  %6396 = vmatpush3.msra.mxu1 %v8055_v33  ;;  %v8119_v33 = vld [vmem:[%s9898_s7 + $0x68] sm:$0xff] }
 0x3b6   : > { %6344 = vmatprep.subr.mxu0 %v10033_v31  ;;  %6397 = vmatprep.subr.mxu1 %v10033_v31  ;;  %10043 = vst [vmem:[#allocation33_spill] sm:$0xff] %v8119_v33 }
 0x3b7   : > { %6345 = vmatpush3.msra.mxu0 %v8064_v34  ;;  %6346 = vmatprep.mubr.msk.f32.mxu0 %vm7444_vm1, %v10033_v31  ;;  %v8105_v34 = vld [vmem:[%s9898_s7 + $0x70] sm:$0xff] }
 0x3b8   : > { %6398 = vmatpush3.msra.mxu1 %v8071_v35  ;;  %6399 = vmatprep.mubr.msk.f32.mxu1 %vm7444_vm1, %v10033_v31  ;;  %v8100_v35 = vld [vmem:[%s9898_s7 + $0x50] sm:$0xff]  ;;  %10041 = vst [vmem:[#allocation31_spill] sm:$0xff] %v8105_v34 }
 0x3b9   : > { %6347 = vmatmul.mubr.msk.f32.vlgmr.msra.gmra.mxu0 %vm509_vm2, %v7629_v7  ;;  %6349 = vmatprep.subr.mxu0 %v10033_v31  ;;  %10040 = vst [vmem:[#allocation30_spill] sm:$0xff] %v8100_v35 }
 0x3ba   : > { %6400 = vmatmul.mubr.msk.f32.vlgmr.msra.gmra.mxu1 %vm509_vm2, %v7629_v7  ;;  %6402 = vmatprep.subr.mxu1 %v10033_v31  ;;  %v8114_v7 = vld [vmem:[%s9898_s7 + $0x48] sm:$0xff] }
 0x3bb   : > { %6350 = vmatpush3.msra.mxu0 %v8084_v26  ;;  %6403 = vmatpush3.msra.mxu1 %v8089_v22  ;;  %10042 = vst [vmem:[#allocation32_spill] sm:$0xff] %v8114_v7  ;;  %v853_v26 = vpop.f32.mrf.mxu1  ;;  %v8128_v22 = vld [vmem:[%s9898_s7 + $0x40] sm:$0xff] }
 0x3bc   : > { %6351 = vmatprep.subr.mxu0 %v10033_v31  ;;  %6404 = vmatprep.subr.mxu1 %v10033_v31  ;;  %10044 = vst [vmem:[#allocation34_spill] sm:$0xff] %v8128_v22 }
 0x3bd   : > { %6352 = vmatpush3.msra.mxu0 %v8100_v35  ;;  %6405 = vmatpush3.msra.mxu1 %v8105_v34  ;;  %v8135_v35 = vld [vmem:[%s9898_s7 + $0x60] sm:$0xff]  ;;  %v6253_v34 = vpop.f32.mrf.mxu1 }
 0x3be   : > { %6353 = vmatprep.subr.mxu0 %v10033_v31  ;;  %6406 = vmatprep.subr.mxu1 %v10033_v31  ;;  %10045 = vst [vmem:[#allocation35_spill] sm:$0xff] %v8135_v35  ;;  %v8153_v34 = vld [vmem:[%s9900_s9 + $0x1b8] sm:$0xff] }
 0x3bf   : > { %6354 = vmatpush3.msra.mxu0 %v8114_v7  ;;  %6407 = vmatpush3.msra.mxu1 %v8119_v33  ;;  %v8148_v33 = vld [vmem:[%s9900_s9 + $0x148] sm:$0xff]  ;;  %10047 = vst [vmem:[#allocation37_spill] sm:$0xff] %v8153_v34  ;;  %v8169_v7 = vld [vmem:[%s9900_s9 + $0x1b0] sm:$0xff]  ;;  %v1029_v28 = vpop.f32.mrf.mxu1 }
 0x3c0   : > { %6355 = vmatprep.subr.mxu0 %v10033_v31  ;;  %6408 = vmatprep.subr.mxu1 %v10033_v31  ;;  %10046 = vst [vmem:[#allocation36_spill] sm:$0xff] %v8148_v33  ;;  %10049 = vst [vmem:[#allocation39_spill] sm:$0xff] %v8169_v7 }
 0x3c1   : > { %6356 = vmatpush3.msra.mxu0 %v8128_v22  ;;  %6357 = vmatprep.mubr.msk.f32.mxu0 %vm7444_vm1, %v10033_v31  ;;  %v780_v22 = vpop.f32.mrf.mxu0 }
 0x3c2   : > { %6409 = vmatpush3.msra.mxu1 %v8135_v35  ;;  %6410 = vmatprep.mubr.msk.f32.mxu1 %vm7444_vm1, %v10033_v31  ;;  %v8164_v35 = vld [vmem:[%s9900_s9 + $0x140] sm:$0xff]  ;;  %v8171_v32 = vadd.f32 %v853_v26, %v780_v22  ;;  %v8185_v26 = vld [vmem:[%s9900_s9 + $0x1a8] sm:$0xff]  ;;  %v6295_v22 = vpop.f32.mrf.mxu1 }
 0x3c3   : > { %6358 = vmatmul.mubr.msk.f32.vlgmr.msra.gmra.mxu0 %vm509_vm2, %v7713_v42  ;;  %6360 = vmatprep.subr.mxu0 %v10033_v31  ;;  %10048 = vst [vmem:[#allocation38_spill] sm:$0xff] %v8164_v35  ;;  %10051 = vst [vmem:[#allocation41_spill] sm:$0xff] %v8185_v26  ;;  %v8208_v22 = vld [vmem:[%s9900_s9 + $0x128] sm:$0xff] }
 0x3c4   : > { %6411 = vmatmul.mubr.msk.f32.vlgmr.msra.gmra.mxu1 %vm509_vm2, %v7713_v42  ;;  %6413 = vmatprep.subr.mxu1 %v10033_v31  ;;  %v6242_v42 = vpop.f32.mrf.mxu0  ;;  %10054 = vst [vmem:[#allocation44_spill] sm:$0xff] %v8208_v22 }
 0x3c5   : > { %6361 = vmatpush3.msra.mxu0 %v8148_v33  ;;  %6414 = vmatpush3.msra.mxu1 %v8153_v34  ;;  %v8194_v42 = vld [vmem:[%s9900_s9 + $0x130] sm:$0xff]  ;;  %v8199_v34 = vld [vmem:[%s9900_s9 + $0x1a0] sm:$0xff] }
 0x3c6   : > { %6362 = vmatprep.subr.mxu0 %v10033_v31  ;;  %6415 = vmatprep.subr.mxu1 %v10033_v31  ;;  %10052 = vst [vmem:[#allocation42_spill] sm:$0xff] %v8194_v42  ;;  %10053 = vst [vmem:[#allocation43_spill] sm:$0xff] %v8199_v34 }
 0x3c7   : > { %6363 = vmatpush3.msra.mxu0 %v8164_v35  ;;  %6416 = vmatpush3.msra.mxu1 %v8169_v7  ;;  %v8213_v7 = vld [vmem:[%s9900_s9 + $0x198] sm:$0xff]  ;;  %v8241_v35 = vld [vmem:[%s9900_s9 + $0x188] sm:$0xff] }
 0x3c8   : > { %6364 = vmatprep.subr.mxu0 %v10033_v31  ;;  %6417 = vmatprep.subr.mxu1 %v10033_v31  ;;  %10055 = vst [vmem:[#allocation45_spill] sm:$0xff] %v8213_v7  ;;  %10058 = vst [vmem:[#allocation48_spill] sm:$0xff] %v8241_v35 }
 0x3c9   : > { %6365 = vmatpush3.msra.mxu0 %v8180_v20  ;;  %6418 = vmatpush3.msra.mxu1 %v8185_v26  ;;  %v8222_v26 = vld [vmem:[%s9900_s9 + $0x120] sm:$0xff]  ;;  %v8227_v20 = vld [vmem:[%s9900_s9 + $0x190] sm:$0xff] }
 0x3ca   : > { %6366 = vmatprep.subr.mxu0 %v10033_v31  ;;  %6419 = vmatprep.subr.mxu1 %v10033_v31  ;;  %10056 = vst [vmem:[#allocation46_spill] sm:$0xff] %v8227_v20 }
 0x3cb   : > { %6367 = vmatpush3.msra.mxu0 %v8194_v42  ;;  %6420 = vmatpush3.msra.mxu1 %v8199_v34  ;;  %v1099_v42 = vpop.f32.mrf.mxu1  ;;  %v8236_v34 = vld [vmem:[%s9900_s9 + $0x118] sm:$0xff] }
 0x3cc   : > { %6368 = vmatprep.subr.mxu0 %v10033_v31  ;;  %6421 = vmatprep.subr.mxu1 %v10033_v31  ;;  %10057 = vst [vmem:[#allocation47_spill] sm:$0xff] %v8236_v34  ;;  %v8243_v33 = vadd.f32 %v1099_v42, %v1029_v28  ;;  %v8266_v28 = vld [vmem:[%s9900_s9 + $0x108] sm:$0xff]  ;;  %v8280_v42 = vld [vmem:[%s9900_s9 + $0x100] sm:$0xff] }
 0x3cd   : > { %6369 = vmatpush3.msra.mxu0 %v8208_v22  ;;  %6422 = vmatpush3.msra.mxu1 %v8213_v7  ;;  %v6306_v7 = vpop.f32.mrf.mxu1  ;;  %v8252_v22 = vld [vmem:[%s9900_s9 + $0x110] sm:$0xff]  ;;  %10061 = vst [vmem:[#allocation51_spill] sm:$0xff] %v8266_v28  ;;  %10063 = vst [vmem:[#allocation53_spill] sm:$0xff] %v8280_v42 }
 0x3ce   : > { %6370 = vmatprep.subr.mxu0 %v10033_v31  ;;  %6423 = vmatprep.subr.mxu1 %v10033_v31  ;;  %10059 = vst [vmem:[#allocation49_spill] sm:$0xff] %v8252_v22  ;;  %v8271_v7 = vld [vmem:[%s9900_s9 + $0x178] sm:$0xff] }
 0x3cf   : > { %6371 = vmatpush3.msra.mxu0 %v8222_v26  ;;  %6424 = vmatpush3.msra.mxu1 %v8227_v20  ;;  %10062 = vst [vmem:[#allocation52_spill] sm:$0xff] %v8271_v7 }
 0x3d0   : > { %6372 = vmatprep.subr.mxu0 %v10033_v31  ;;  %6425 = vmatprep.subr.mxu1 %v10033_v31 }
 0x3d1   : > { %6373 = vmatpush3.msra.mxu0 %v8236_v34  ;;  %6426 = vmatpush3.msra.mxu1 %v8241_v35  ;;  %v8285_v35 = vld [vmem:[%s9900_s9 + $0x170] sm:$0xff] }
 0x3d2   : > { %6374 = vmatprep.subr.mxu0 %v10033_v31  ;;  %6427 = vmatprep.subr.mxu1 %v10033_v31  ;;  %10064 = vst [vmem:[#allocation54_spill] sm:$0xff] %v8285_v35 }
 0x3d3   : > { %6375 = vmatpush3.msra.mxu0 %v8252_v22  ;;  %6428 = vmatpush3.msra.mxu1 %v8257_v3  ;;  %v8294_v3 = vld [vmem:[%s9900_s9 + $0xf8] sm:$0xff]  ;;  %v8299_v22 = vld [vmem:[%s9900_s9 + $0x168] sm:$0xff] }
 0x3d4   : > { %6376 = vmatprep.subr.mxu0 %v10033_v31  ;;  %6429 = vmatprep.subr.mxu1 %v10033_v31  ;;  %10065 = vst [vmem:[#allocation55_spill] sm:$0xff] %v8294_v3  ;;  %10066 = vst [vmem:[#allocation56_spill] sm:$0xff] %v8299_v22 }
 0x3d5   : > { %6377 = vmatpush3.msra.mxu0 %v8266_v28  ;;  %6430 = vmatpush3.msra.mxu1 %v8271_v7  ;;  %v8308_v7 = vld [vmem:[%s9900_s9 + $0xf0] sm:$0xff]  ;;  %v8313_v28 = vld [vmem:[%s9900_s9 + $0x160] sm:$0xff] }
 0x3d6   : > { %6378 = vmatprep.subr.mxu0 %v10033_v31  ;;  %6431 = vmatprep.subr.mxu1 %v10033_v31  ;;  %10067 = vst [vmem:[#allocation57_spill] sm:$0xff] %v8308_v7  ;;  %10068 = vst [vmem:[#allocation58_spill] sm:$0xff] %v8313_v28 }
 0x3d7   : > { %6379 = vmatpush3.msra.mxu0 %v8280_v42  ;;  %6432 = vmatpush3.msra.mxu1 %v8285_v35  ;;  %v8322_v35 = vld [vmem:[%s9900_s9 + $0xe8] sm:$0xff]  ;;  %v8327_v42 = vld [vmem:[%s9900_s9 + $0x158] sm:$0xff] }
 0x3d8   : > { %6380 = vmatprep.subr.mxu0 %v10033_v31  ;;  %6433 = vmatprep.subr.mxu1 %v10033_v31  ;;  %10069 = vst [vmem:[#allocation59_spill] sm:$0xff] %v8322_v35  ;;  %10070 = vst [vmem:[#allocation60_spill] sm:$0xff] %v8327_v42 }
 0x3d9   : > { %6381 = vmatpush3.msra.mxu0 %v8294_v3  ;;  %6434 = vmatpush3.msra.mxu1 %v8299_v22  ;;  %v8336_v22 = vld [vmem:[%s9900_s9 + $0xe0] sm:$0xff]  ;;  %v8343_v3 = vld [vmem:[%s9900_s9 + $0x150] sm:$0xff] }
 0x3da   : > { %6382 = vmatprep.subr.mxu0 %v10033_v31  ;;  %6435 = vmatprep.subr.mxu1 %v10033_v31  ;;  %10071 = vst [vmem:[#allocation61_spill] sm:$0xff] %v8336_v22  ;;  %10072 = vst [vmem:[#allocation62_spill] sm:$0xff] %v8343_v3 }
 0x3db   : > { %6383 = vmatpush3.msra.mxu0 %v8308_v7  ;;  %6436 = vmatpush3.msra.mxu1 %v8313_v28 }
 0x3dc   : > { %6384 = vmatprep.subr.mxu0 %v10033_v31  ;;  %6437 = vmatprep.subr.mxu1 %v10033_v31 }
 0x3dd   : > { %6385 = vmatpush3.msra.mxu0 %v8322_v35  ;;  %6438 = vmatpush3.msra.mxu1 %v8327_v42 }
 0x3de   : > { %6386 = vmatprep.subr.mxu0 %v10033_v31  ;;  %6439 = vmatprep.subr.mxu1 %v10033_v31 }
 0x3df   : > { %6387 = vmatpush3.msra.mxu0 %v8336_v22  ;;  %6388 = vmatprep.mubr.msk.f32.mxu0 %vm7444_vm1, %v10033_v31 }
 0x3e0   : > { %6440 = vmatpush3.msra.mxu1 %v8343_v3  ;;  %6441 = vmatprep.mubr.msk.f32.mxu1 %vm7444_vm1, %v10033_v31 }
 0x3e1   : > { %6389 = vmatmul.mubr.msk.f32.vlgmr.msra.gmra.mxu0 %vm696_vm4, %v8014_v36  ;;  %6442 = vmatmul.mubr.msk.f32.vlgmr.msra.gmra.mxu1 %vm696_vm4, %v8014_v36 }
 0x3e2   : > { %6477 = vmatprep.subr.mxu1 %v10033_v31  ;;  %6485 = vmatprep.mubr.msk.f32.mxu1 %vm7444_vm1, %v10033_v31 }
 0x3e3   : > { %6478 = vmatpush3.msra.mxu1 %v7683_v37  ;;  %6444 = vmatprep.subr.mxu0 %v10033_v31 }
 0x3e4   : > { %6479 = vmatprep.subr.mxu1 %v10033_v31  ;;  %6445 = vmatpush3.msra.mxu0 %v7601_v2  ;;  %v8380_v2 = vld [vmem:[%s7583_s21 + $0x1] sm:$0x1] }
 0x3e5   : > { %6480 = vmatpush3.msra.mxu1 %v7688_v38  ;;  %6446 = vmatprep.subr.mxu0 %v10033_v31 }
 0x3e6   : > { %6481 = vmatprep.subr.mxu1 %v10033_v31  ;;  %6447 = vmatpush3.msra.mxu0 %v7607_v4 }
 0x3e7   : > { %6482 = vmatpush3.msra.mxu1 %v7695_v39  ;;  %6448 = vmatprep.subr.mxu0 %v10033_v31 }
 0x3e8   : > { %6483 = vmatprep.subr.mxu1 %v10033_v31  ;;  %6449 = vmatpush3.msra.mxu0 %v7617_v5 }
 0x3e9   : > { %6484 = vmatpush3.msra.mxu1 %v7704_v40  ;;  %6450 = vmatprep.subr.mxu0 %v10033_v31 }
 0x3ea   : > { %6519 = vmatprep.subr.mxu1 %v10033_v31  ;;  %6451 = vmatpush3.msra.mxu0 %v7626_v6 }
 0x3eb   : > { %6452 = vmatprep.mubr.msk.f32.mxu0 %vm7444_vm1, %v10033_v31  ;;  %6455 = vmatprep.subr.mxu0 %v10033_v31 }
 0x3ec   : > { %6486 = vmatmul.mubr.msk.f32.vlgmr.msra.gmra.mxu1 %vm509_vm2, %v8380_v2 }
 0x3ed   : > { %6520 = vmatpush3.msra.mxu1 %v7718_v43  ;;  %6527 = vmatprep.mubr.msk.f32.mxu1 %vm7444_vm1, %v10033_v31 }
 0x3ee   : > { %6521 = vmatprep.subr.mxu1 %v10033_v31 }
 0x3ef   : > { %6522 = vmatpush3.msra.mxu1 %v7733_v45 }
 0x3f0   : > { %6523 = vmatprep.subr.mxu1 %v10033_v31 }
 0x3f1   : > { %6524 = vmatpush3.msra.mxu1 %v7747_v47 }
 0x3f2   : > { %6525 = vmatprep.subr.mxu1 %v10033_v31 }
 0x3f3   : > { %6526 = vmatpush3.msra.mxu1 %v7761_v49  ;;  %v5431_v49 = vld [vmem:[%s9901_s10 + $0x1] sm:$0x1] }
 0x3f4   : > { %6530 = vmatprep.subr.mxu1 %v10033_v31 }
 0x470   : > { %v940_v4 = vpop.f32.mrf.mxu0  ;;  %v1184_v5 = vpop.f32.mrf.mxu1 }
 0x471   : > { %v1188_v45 = vadd.f32 %v1184_v5, %v8243_v33  ;;  %v944_v47 = vadd.f32 %v940_v4, %v8171_v32 }
 0x472   : > { %v6284_v6 = vpop.f32.mrf.mxu0  ;;  %v6337_v37 = vpop.f32.mrf.mxu1 }
 0x473   : > { %v945_v6 = vld [vmem:[%s9901_s10] sm:$0x1]  ;;  %v1191_v42 = vadd.f32 %v5431_v49, %v1188_v45  ;;  %v5485_v45 = vld [vmem:[%s9901_s10 + $0x3] sm:$0x1] }
 0x474   : > { %v946_v35 = vadd.f32 %v945_v6, %v944_v47 }
 0x479   : > { %v1274_v38 = vpop.f32.mrf.mxu0 }
 0x47a   : > { %v1519_v39 = vpop.f32.mrf.mxu1 }
 0x47b   : > { %v6348_v40 = vpop.f32.mrf.mxu0 }
 0x47c   : > { %v6401_v43 = vpop.f32.mrf.mxu1  ;;  %v5432_v40 = vmul.f32 -1.442695, %v1191_v42 }
 0x47d   : > { %v5405_v43 = vmul.f32 -1.442695, %v946_v35 }
 0x47e   : > { %7232 = vpow2.f32 %v5432_v40 }
 0x47f   : > { %7234 = vpow2.f32 %v5405_v43 }
 0x483   : > { %v1344_v36 = vpop.f32.mrf.mxu0 }
 0x484   : > { %v1589_v3 = vpop.f32.mrf.mxu1  ;;  %v1345_v32 = vadd.f32 %v1344_v36, %v1274_v38 }
 0x485   : > { %v6359_v22 = vpop.f32.mrf.mxu0  ;;  %v1590_v4 = vadd.f32 %v1589_v3, %v1519_v39  ;;  %v507_v39 = vld [vmem:[#allocation3] sm:$0x1] }
 0x486   : > { %v6412_v37 = vpop.f32.mrf.mxu1  ;;  %v5458_v22 = vld [vmem:[%s9901_s10 + $0x2] sm:$0x1] }
 0x48b   : > { %v7233_v33 = vpop.eup %7232 }
 0x48c   : > { %v7235_v5 = vpop.eup %7234  ;;  %v1195_v28 = vadd.f32 1.0, %v7233_v33 }
 0x48d   : > { %v950_v7 = vadd.f32 1.0, %v7235_v5 }
 0x48e   : > { %7236 = vrcp.f32 %v1195_v28 }
 0x48f   : > { %7238 = vrcp.f32 %v950_v7 }
 0x49b   : > { %v7237_v38 = vpop.eup %7236 }
 0x49c   : > { %v7239_v36 = vpop.eup %7238  ;;  %v1683_v43 = vmul.f32 %v7237_v38, %v507_v39 }
 0x4a1   : > { %v1429_v34 = vpop.f32.mrf.mxu0  ;;  %v1674_v20 = vpop.f32.mrf.mxu1 }
 0x4a2   : > { %v1433_v42 = vadd.f32 %v1429_v34, %v1345_v32  ;;  %v1678_v35 = vadd.f32 %v1674_v20, %v1590_v4  ;;  %v8417_v32 = vld [vmem:[%s9902_s11] sm:$0x1] }
 0x4a3   : > { %v6390_v47 = vpop.f32.mrf.mxu0  ;;  %v6443_v49 = vpop.f32.mrf.mxu1 }
 0x4a4   : > { %v1436_v6 = vadd.f32 %v5458_v22, %v1433_v42  ;;  %v1681_v37 = vadd.f32 %v5485_v45, %v1678_v35 }
 0x4a6   : > { %v5459_v3 = vmul.f32 -1.442695, %v1436_v6  ;;  %7240 = vtanh.f32 %v1681_v37 }
 0x4a8   : > { %7242 = vpow2.f32 %v5459_v3 }
 0x4b3   : > { %v7241_v40 = vpop.eup %7240 }
 0x4b4   : > { %v1684_v33 = vmul.f32 %v7241_v40, %v7239_v36 }
 0x4b5   : > { %v7243_v5 = vpop.eup %7242 }
 0x4b6   : > { %v1440_v20 = vadd.f32 1.0, %v7243_v5  ;;  %v8408_v34 = vadd.f32 %v1684_v33, %v1683_v43 }
 0x4b8   : > { %7244 = vrcp.f32 %v1440_v20  ;;  %1690 = vst.msk [vmem:[%s7585_s18] sm:$0x1] %vm1689_vm6, %v8408_v34 }
 0x4b9   : > { %7246 = vtanh.f32 %v8408_v34 }
 0x4c5   : > { %v7245_v28 = vpop.eup %7244 }
 0x4c6   : > { %v7247_v7 = vpop.eup %7246 }
 0x4c7   : > { %v1687_v4 = vmul.f32 %v7247_v7, %v7245_v28 }
 0x4c9   : > { %v8420_v22 = vmul.f32 %v1687_v4, %v8417_v32  ;;  %v10079_v4 = vld [vmem:[#allocation22_spill] sm:$0xff] }
 0x4cb   : > { %6453 = vmatmul.mubr.msk.f32.vlgmr.msra.gmra.mxu0 %vm509_vm2, %v8420_v22  ;;  %6528 = vmatmul.mubr.msk.f32.vlgmr.msra.gmra.mxu1 %vm509_vm2, %v8420_v22  ;;  %1691 = vst.msk [vmem:[%s7587_s22] sm:$0x1] %vm1689_vm6, %v8420_v22 }
 0x4cc   : > { %6531 = vmatpush3.msra.mxu1 %v7771_v50  ;;  %6538 = vmatprep.mubr.msk.f32.mxu1 %vm7444_vm1, %v10033_v31 }
 0x4cd   : > { %6532 = vmatprep.subr.mxu1 %v10033_v31  ;;  %6456 = vmatpush3.msra.mxu0 %v7641_v8  ;;  %v8481_v8 = vpop.f32.mrf.mxu1 }
 0x4ce   : > { %6533 = vmatpush3.msra.mxu1 %v7782_v51  ;;  %6457 = vmatprep.subr.mxu0 %v10033_v31 }
 0x4cf   : > { %6534 = vmatprep.subr.mxu1 %v10033_v31  ;;  %6458 = vmatpush3.msra.mxu0 %v7646_v9  ;;  %v6487_v9 = vpop.f32.mrf.mxu1 }
 0x4d0   : > { %6535 = vmatpush3.msra.mxu1 %v7796_v53  ;;  %6459 = vmatprep.subr.mxu0 %v10033_v31  ;;  %v10080_v9 = vld [vmem:[#allocation23_spill] sm:$0xff] }
 0x4d1   : > { %6536 = vmatprep.subr.mxu1 %v10033_v31  ;;  %6460 = vmatpush3.msra.mxu0 %v7653_v10 }
 0x4d2   : > { %6537 = vmatpush3.msra.mxu1 %v7810_v55  ;;  %6461 = vmatprep.subr.mxu0 %v10033_v31 }
 0x4d3   : > { %6539 = vmatmul.mubr.msk.f32.vlgmr.msra.gmra.mxu1 %vm509_vm2, %v8380_v2  ;;  %6462 = vmatpush3.msra.mxu0 %v7660_v11 }
 0x4d4   : > { %6463 = vmatprep.mubr.msk.f32.mxu0 %vm7444_vm1, %v10033_v31  ;;  %6466 = vmatprep.subr.mxu0 %v10033_v31 }
 0x4d5   : > { %6541 = vmatprep.subr.mxu1 %v10033_v31  ;;  %6569 = vmatprep.mubr.msk.f32.mxu1 %vm7444_vm1, %v10033_v31 }
 0x4d6   : > { %6542 = vmatpush3.msra.mxu1 %v7824_v57 }
 0x4d7   : > { %6543 = vmatprep.subr.mxu1 %v10033_v31 }
 0x4d8   : > { %6544 = vmatpush3.msra.mxu1 %v7840_v59 }
 0x4d9   : > { %6545 = vmatprep.subr.mxu1 %v10033_v31 }
 0x4da   : > { %6546 = vmatpush3.msra.mxu1 %v7853_v61 }
 0x4db   : > { %6547 = vmatprep.subr.mxu1 %v10033_v31 }
 0x4dc   : > { %6548 = vmatpush3.msra.mxu1 %v7867_v63 }
 0x4dd   : > { %6549 = vmatprep.subr.mxu1 %v10033_v31 }
 0x4de   : > { %6550 = vmatpush3.msra.mxu1 %v7881_v1 }
 0x4df   : > { %6551 = vmatprep.subr.mxu1 %v10033_v31 }
 0x4e0   : > { %6552 = vmatpush3.msra.mxu1 %v7895_v13 }
 0x4e1   : > { %6553 = vmatprep.subr.mxu1 %v10033_v31 }
 0x4e2   : > { %6554 = vmatpush3.msra.mxu1 %v7909_v17 }
 0x4e3   : > { %6555 = vmatprep.subr.mxu1 %v10033_v31 }
 0x4e4   : > { %6556 = vmatpush3.msra.mxu1 %v7923_v19 }
 0x4e5   : > { %6557 = vmatprep.subr.mxu1 %v10033_v31 }
 0x4e6   : > { %6558 = vmatpush3.msra.mxu1 %v7937_v21 }
 0x4e7   : > { %6559 = vmatprep.subr.mxu1 %v10033_v31 }
 0x4e8   : > { %6560 = vmatpush3.msra.mxu1 %v7951_v23 }
 0x4e9   : > { %6561 = vmatprep.subr.mxu1 %v10033_v31 }
 0x4ea   : > { %6562 = vmatpush3.msra.mxu1 %v7960_v24 }
 0x4eb   : > { %6563 = vmatprep.subr.mxu1 %v10033_v31 }
 0x4ec   : > { %6564 = vmatpush3.msra.mxu1 %v7969_v25 }
 0x4ed   : > { %6565 = vmatprep.subr.mxu1 %v10033_v31 }
 0x4ee   : > { %6566 = vmatpush3.msra.mxu1 %v7987_v27 }
 0x4ef   : > { %6567 = vmatprep.subr.mxu1 %v10033_v31 }
 0x4f0   : > { %6568 = vmatpush3.msra.mxu1 %v8001_v30 }
 0x4f1   : > { %6625 = vmatprep.subr.mxu1 %v10033_v31 }
 0x58b   : > { %v1765_v10 = vpop.f32.mrf.mxu0  ;;  %v2211_v11 = vpop.f32.mrf.mxu1 }
 0x58c   : > { %v1772_v50 = vrot.slane %v1765_v10, %v7666_v14  ;;  %v10081_v10 = vld [vmem:[#allocation24_spill] sm:$0xff] }
 0x58d   : > { %v6454_v51 = vpop.f32.mrf.mxu0  ;;  %v6529_v53 = vpop.f32.mrf.mxu1 }
 0x58e   : > { %v1773_v55 = vadd.f32 %v1772_v50, %v7671_v15  ;;  %v10073_v15 = vld [vmem:[#allocation16_spill] sm:$0xff]  ;;  %v10084_v50 = vld [vmem:[#allocation27_spill] sm:$0xff]  ;;  %v10086_v53 = vld [vmem:[#allocation29_spill] sm:$0xff] }
 0x58f   : > { %v10085_v51 = vld [vmem:[#allocation28_spill] sm:$0xff] }
 0x590   : > { %7248 = vtanh.f32 %v1773_v55  ;;  %v10087_v55 = vld [vmem:[#allocation30_spill] sm:$0xff] }
 0x593   : > { %v2281_v57 = vpop.f32.mrf.mxu1 }
 0x594   : > { %v8485_v59 = vadd.f32 %v2281_v57, %v2211_v11  ;;  %v10082_v11 = vld [vmem:[#allocation25_spill] sm:$0xff]  ;;  %v10088_v57 = vld [vmem:[#allocation31_spill] sm:$0xff] }
 0x595   : > { %v6540_v61 = vpop.f32.mrf.mxu1 }
 0x596   : > { %v10089_v61 = vld [vmem:[#allocation32_spill] sm:$0xff] }
 0x59d   : > { %v7249_v63 = vpop.eup %7248 }
 0x59e   : > { %6464 = vmatmul.mubr.msk.f32.vlgmr.msra.gmra.mxu0 %vm509_vm2, %v7249_v63  ;;  %v10091_v63 = vld [vmem:[#allocation34_spill] sm:$0xff] }
 0x59f   : > { %6467 = vmatpush3.msra.mxu0 %v7710_v41  ;;  %6474 = vmatprep.mubr.msk.f32.mxu0 %vm7444_vm1, %v10033_v31  ;;  %v10074_v41 = vld [vmem:[#allocation17_spill] sm:$0xff] }
 0x5a0   : > { %6468 = vmatprep.subr.mxu0 %v10033_v31 }
 0x5a1   : > { %6469 = vmatpush3.msra.mxu0 %v7725_v44  ;;  %v10075_v44 = vld [vmem:[#allocation18_spill] sm:$0xff] }
 0x5a2   : > { %6470 = vmatprep.subr.mxu0 %v10033_v31 }
 0x5a3   : > { %6471 = vmatpush3.msra.mxu0 %v7738_v46  ;;  %v10076_v46 = vld [vmem:[#allocation19_spill] sm:$0xff] }
 0x5a4   : > { %6472 = vmatprep.subr.mxu0 %v10033_v31 }
 0x5a5   : > { %6473 = vmatpush3.msra.mxu0 %v7752_v48  ;;  %v10077_v48 = vld [vmem:[#allocation20_spill] sm:$0xff] }
 0x5a6   : > { %6475 = vmatmul.mubr.msk.f32.vlgmr.msra.gmra.mxu0 %vm509_vm2, %v8420_v22  ;;  %6488 = vmatprep.subr.mxu0 %v10033_v31 }
 0x5a7   : > { %6489 = vmatpush3.msra.mxu0 %v7787_v52  ;;  %6516 = vmatprep.mubr.msk.f32.mxu0 %vm7444_vm1, %v10033_v31 }
 0x5a8   : > { %6490 = vmatprep.subr.mxu0 %v10033_v31 }
 0x5a9   : > { %6491 = vmatpush3.msra.mxu0 %v7802_v54 }
 0x5aa   : > { %6492 = vmatprep.subr.mxu0 %v10033_v31 }
 0x5ab   : > { %6493 = vmatpush3.msra.mxu0 %v7816_v56 }
 0x5ac   : > { %6494 = vmatprep.subr.mxu0 %v10033_v31 }
 0x5ad   : > { %6495 = vmatpush3.msra.mxu0 %v7832_v58 }
 0x5ae   : > { %6496 = vmatprep.subr.mxu0 %v10033_v31 }
 0x5af   : > { %6497 = vmatpush3.msra.mxu0 %v7847_v60 }
 0x5b0   : > { %6498 = vmatprep.subr.mxu0 %v10033_v31 }
 0x5b1   : > { %6499 = vmatpush3.msra.mxu0 %v7861_v62 }
 0x5b2   : > { %6500 = vmatprep.subr.mxu0 %v10033_v31 }
 0x5b3   : > { %6501 = vmatpush3.msra.mxu0 %v7875_v0 }
 0x5b4   : > { %6502 = vmatprep.subr.mxu0 %v10033_v31 }
 0x5b5   : > { %6503 = vmatpush3.msra.mxu0 %v7889_v12 }
 0x5b6   : > { %6504 = vmatprep.subr.mxu0 %v10033_v31 }
 0x5b7   : > { %6505 = vmatpush3.msra.mxu0 %v7903_v16 }
 0x5b8   : > { %6506 = vmatprep.subr.mxu0 %v10033_v31 }
 0x5b9   : > { %6507 = vmatpush3.msra.mxu0 %v10073_v15  ;;  %v10092_v15 = vld [vmem:[#allocation35_spill] sm:$0xff] }
 0x5ba   : > { %6508 = vmatprep.subr.mxu0 %v10033_v31 }
 0x5bb   : > { %6509 = vmatpush3.msra.mxu0 %v10074_v41  ;;  %v10093_v41 = vld [vmem:[#allocation36_spill] sm:$0xff] }
 0x5bc   : > { %6510 = vmatprep.subr.mxu0 %v10033_v31 }
 0x5bd   : > { %6511 = vmatpush3.msra.mxu0 %v10075_v44  ;;  %v10094_v44 = vld [vmem:[#allocation37_spill] sm:$0xff] }
 0x5be   : > { %6512 = vmatprep.subr.mxu0 %v10033_v31 }
 0x5bf   : > { %6513 = vmatpush3.msra.mxu0 %v10076_v46  ;;  %v10095_v46 = vld [vmem:[#allocation38_spill] sm:$0xff] }
 0x5c0   : > { %6514 = vmatprep.subr.mxu0 %v10033_v31 }
 0x5c1   : > { %6515 = vmatpush3.msra.mxu0 %v10077_v48  ;;  %v10096_v48 = vld [vmem:[#allocation39_spill] sm:$0xff] }
 0x5c2   : > { %6572 = vmatprep.subr.mxu0 %v10033_v31 }
 0x65e   : > { %v1844_v52 = vpop.f32.mrf.mxu0 }
 0x65f   : > { %v1848_v54 = vsel %vm662_vm3, %v1844_v52, -inf }
 0x660   : > { %1849 = vmax.xlane.f32.xlu1 %v1848_v54  ;;  %v6465_v56 = vpop.f32.mrf.mxu0  ;;  %v10099_v54 = vld [vmem:[#allocation42_spill] sm:$0xff] }
 0x661   : > { %v10100_v56 = vld [vmem:[#allocation43_spill] sm:$0xff] }
 0x666   : > { %v8531_v58 = vpop.f32.mrf.mxu0 }
 0x668   : > { %v6476_v60 = vpop.f32.mrf.mxu0 }
 0x669   : > { %v10101_v60 = vld [vmem:[#allocation44_spill] sm:$0xff] }
 0x6e9   : > { %v1850_v62 = vpop.xlane.xlu1 %1849 }
 0x6ea   : > { %v1851_v0 = vrot.slane %v1850_v62, 4 }
 0x6ec   : > { %v1852_v1 = vmax.f32 %v1850_v62, %v1851_v0  ;;  %v10102_v62 = vld [vmem:[#allocation45_spill] sm:$0xff]  ;;  %v10103_v0 = vld [vmem:[#allocation46_spill] sm:$0xff] }
 0x6ee   : > { %v1853_v12 = vrot.slane %v1852_v1, 2 }
 0x6f0   : > { %v1854_v13 = vmax.f32 %v1852_v1, %v1853_v12  ;;  %v10104_v1 = vld [vmem:[#allocation47_spill] sm:$0xff]  ;;  %v10105_v12 = vld [vmem:[#allocation48_spill] sm:$0xff] }
 0x6f2   : > { %v1855_v16 = vrot.slane %v1854_v13, 1 }
 0x6f4   : > { %v1856_v17 = vmax.f32 %v1854_v13, %v1855_v16  ;;  %v10106_v13 = vld [vmem:[#allocation49_spill] sm:$0xff]  ;;  %v10107_v16 = vld [vmem:[#allocation50_spill] sm:$0xff] }
 0x6f6   : > { %7152 = vpush %v1856_v17  ;;  %v10109_v17 = vld [vmem:[#allocation52_spill] sm:$0xff] }
 0x727   : > { %s7153_s28 = spop %7152 }
 0x728   : > { %v1858_v19 = vstv %s7153_s28 }
 0x729   : > { %v1859_v21 = vsub.f32 %v1844_v52, %v1858_v19  ;;  %v10097_v52 = vld [vmem:[#allocation40_spill] sm:$0xff]  ;;  %v10110_v19 = vld [vmem:[#allocation53_spill] sm:$0xff] }
 0x72b   : > { %v1860_v23 = vmul.f32 1.442695, %v1859_v21  ;;  %v10111_v21 = vld [vmem:[#allocation54_spill] sm:$0xff] }
 0x72d   : > { %7250 = vpow2.f32 %v1860_v23  ;;  %v10112_v23 = vld [vmem:[#allocation55_spill] sm:$0xff] }
 0x73a   : > { %v7251_v24 = vpop.eup %7250 }
 0x73b   : > { %v1862_v25 = vsel %vm662_vm3, %v7251_v24, 0.0 }
 0x73c   : > { %1863 = vadd.xlane.f32.xlu0 %v1862_v25  ;;  %v10114_v25 = vld [vmem:[#allocation57_spill] sm:$0xff] }
 0x752   : > { %1877 = vperm.xlu0 %7225, %v7251_v24   ;;  %v10113_v24 = vld [vmem:[#allocation56_spill] sm:$0xff] }
 0x7c5   : > { %v1864_v27 = vpop.xlane.xlu0 %1863 }
 0x7c6   : > { %v1865_v30 = vrot.slane %v1864_v27, 4 }
 0x7c8   : > { %v1866_v45 = vadd.f32 %v1865_v30, %v1864_v27  ;;  %v10115_v27 = vld [vmem:[#allocation58_spill] sm:$0xff]  ;;  %v10116_v30 = vld [vmem:[#allocation59_spill] sm:$0xff] }
 0x7ca   : > { %v1867_v42 = vrot.slane %v1866_v45, 2 }
 0x7cc   : > { %v1868_v35 = vadd.f32 %v1867_v42, %v1866_v45  ;;  %v10117_v45 = vld [vmem:[#allocation60_spill] sm:$0xff]  ;;  %v10118_v42 = vld [vmem:[#allocation61_spill] sm:$0xff] }
 0x7cd   : > { %v1878_v3 = vpop.permute.xlu0 %1877 }
 0x7ce   : > { %v1869_v47 = vrot.slane %v1868_v35, 1  ;;  %v1880_v38 = vmul.f32 %v1878_v3, %v8010_v29  ;;  %v10078_v29 = vld [vmem:[#allocation21_spill] sm:$0xff]  ;;  %v8692_v3 = vld [vmem:[%s9898_s7 + $0x18] sm:$0xff] }
 0x7d0   : > { %v1870_v49 = vadd.f32 %v1869_v47, %v1868_v35  ;;  %v1881_v39 = vsel %vm696_vm4, %v1880_v38, 0.0  ;;  %v10119_v35 = vld [vmem:[#allocation62_spill] sm:$0xff]  ;;  %v8664_v47 = vld [vmem:[%s9896_s5 + $0x18] sm:$0xff] }
 0x7d1   : > { %v1882_v36 = vrot.slane %v1881_v39, 4  ;;  %v8697_v38 = vld [vmem:[%s9898_s7 + $0x10] sm:$0xff] }
 0x7d2   : > { %7154 = vpush %v1870_v49  ;;  %v8671_v49 = vld [vmem:[%s9896_s5 + $0x10] sm:$0xff] }
 0x7d3   : > { %v1883_v40 = vadd.f32 %v1882_v36, %v1881_v39  ;;  %v8704_v39 = vld [vmem:[%s9898_s7 + $0x8] sm:$0xff]  ;;  %v8711_v36 = vld [vmem:[%s9898_s7] sm:$0xff] }
 0x7d5   : > { %v1884_v43 = vrot.slane %v1883_v40, 2 }
 0x7d7   : > { %v1885_v33 = vadd.f32 %v1884_v43, %v1883_v40  ;;  %v8715_v40 = vld [vmem:[%s7583_s21 + $0x2] sm:$0x1]  ;;  %v8721_v43 = vld [vmem:[%s9899_s8 + $0x38] sm:$0xff] }
 0x7d9   : > { %v1886_v5 = vrot.slane %v1885_v33, 1 }
 0x7db   : > { %v1887_v20 = vadd.f32 %v1886_v5, %v1885_v33  ;;  %v8730_v33 = vld [vmem:[%s9899_s8 + $0x30] sm:$0xff]  ;;  %v8739_v5 = vld [vmem:[%s9899_s8 + $0x28] sm:$0xff] }
 0x803   : > { %s7155_s27 = spop %7154 }
 0x804   : > { %v1872_v6 = vstv %s7155_s27 }
 0x805   : > { %7252 = vrcp.f32 %v1872_v6  ;;  %v8678_v6 = vld [vmem:[%s9896_s5 + $0x8] sm:$0xff] }
 0x812   : > { %v7253_v37 = vpop.eup %7252 }
 0x813   : > { %7156 = vpush %v7253_v37  ;;  %v8685_v37 = vld [vmem:[%s9896_s5] sm:$0xff] }
 0x844   : > { %s7157_s20 = spop %7156 }
 0x845   : > { %v1888_v28 = vstv %s7157_s20 }
 0x846   : > { %v8536_v7 = vmul.f32 %v1888_v28, %v1887_v20  ;;  %v8746_v20 = vld [vmem:[%s9899_s8 + $0x20] sm:$0xff] }
 0x848   : > { %5575 = vst.msk [vmem:[%s7589_s15 + $0x1] sm:$0x1] %vm1692_vm5, %v8536_v7  ;;  %6517 = vmatmul.mubr.msk.f32.vlgmr.msra.gmra.mxu0 %vm696_vm4, %v8536_v7  ;;  %6570 = vmatmul.mubr.msk.f32.vlgmr.msra.gmra.mxu1 %vm696_vm4, %v8536_v7 }
 0x849   : > { %6573 = vmatpush3.msra.mxu0 %v8019_v18  ;;  %6626 = vmatpush3.msra.mxu1 %v10078_v29  ;;  %v10083_v18 = vld [vmem:[#allocation26_spill] sm:$0xff] }
 0x84a   : > { %6574 = vmatprep.subr.mxu0 %v10033_v31  ;;  %6627 = vmatprep.subr.mxu1 %v10033_v31 }
 0x84b   : > { %6575 = vmatpush3.msra.mxu0 %v10079_v4  ;;  %6628 = vmatpush3.msra.mxu1 %v10080_v9 }
 0x84c   : > { %6576 = vmatprep.subr.mxu0 %v10033_v31  ;;  %6629 = vmatprep.subr.mxu1 %v10033_v31 }
 0x84d   : > { %6577 = vmatpush3.msra.mxu0 %v10081_v10  ;;  %6630 = vmatpush3.msra.mxu1 %v10082_v11 }
 0x84e   : > { %6578 = vmatprep.subr.mxu0 %v10033_v31  ;;  %6631 = vmatprep.subr.mxu1 %v10033_v31 }
 0x84f   : > { %6579 = vmatpush3.msra.mxu0 %v10083_v18  ;;  %6580 = vmatprep.mubr.msk.f32.mxu0 %vm7444_vm1, %v10033_v31 }
 0x850   : > { %6632 = vmatpush3.msra.mxu1 %v10084_v50  ;;  %6633 = vmatprep.mubr.msk.f32.mxu1 %vm7444_vm1, %v10033_v31  ;;  %v2038_v50 = vadd.f32 %v8481_v8, %v8531_v58 }
 0x851   : > { %6581 = vmatmul.mubr.msk.f32.vlgmr.msra.gmra.mxu0 %vm509_vm2, %v8420_v22  ;;  %6583 = vmatprep.subr.mxu0 %v10033_v31 }
 0x852   : > { %6634 = vmatmul.mubr.msk.f32.vlgmr.msra.gmra.mxu1 %vm509_vm2, %v8420_v22  ;;  %6636 = vmatprep.subr.mxu1 %v10033_v31  ;;  %v10090_v22 = vld [vmem:[#allocation33_spill] sm:$0xff] }
 0x853   : > { %6584 = vmatpush3.msra.mxu0 %v10085_v51  ;;  %6637 = vmatpush3.msra.mxu1 %v10086_v53 }
 0x854   : > { %6585 = vmatprep.subr.mxu0 %v10033_v31  ;;  %6638 = vmatprep.subr.mxu1 %v10033_v31 }
 0x855   : > { %6586 = vmatpush3.msra.mxu0 %v10087_v55  ;;  %6639 = vmatpush3.msra.mxu1 %v10088_v57 }
 0x856   : > { %6587 = vmatprep.subr.mxu0 %v10033_v31  ;;  %6640 = vmatprep.subr.mxu1 %v10033_v31 }
 0x857   : > { %6588 = vmatpush3.msra.mxu0 %v10089_v61  ;;  %6641 = vmatpush3.msra.mxu1 %v10090_v22  ;;  %v5518_v61 = vld [vmem:[%s9901_s10 + $0x1] sm:$0x1] }
 0x858   : > { %6589 = vmatprep.subr.mxu0 %v10033_v31  ;;  %6642 = vmatprep.subr.mxu1 %v10033_v31 }
 0x859   : > { %6590 = vmatpush3.msra.mxu0 %v10091_v63  ;;  %6591 = vmatprep.mubr.msk.f32.mxu0 %vm7444_vm1, %v10033_v31  ;;  %v2129_v63 = vld [vmem:[%s9901_s10] sm:$0x1] }
 0x85a   : > { %6643 = vmatpush3.msra.mxu1 %v10092_v15  ;;  %6644 = vmatprep.mubr.msk.f32.mxu1 %vm7444_vm1, %v10033_v31 }
 0x85b   : > { %6592 = vmatmul.mubr.msk.f32.vlgmr.msra.gmra.mxu0 %vm509_vm2, %v8380_v2  ;;  %6594 = vmatprep.subr.mxu0 %v10033_v31 }
 0x85c   : > { %6645 = vmatmul.mubr.msk.f32.vlgmr.msra.gmra.mxu1 %vm509_vm2, %v8380_v2  ;;  %6647 = vmatprep.subr.mxu1 %v10033_v31  ;;  %v10098_v2 = vld [vmem:[#allocation41_spill] sm:$0xff] }
 0x85d   : > { %6595 = vmatpush3.msra.mxu0 %v10093_v41  ;;  %6648 = vmatpush3.msra.mxu1 %v10094_v44 }
 0x85e   : > { %6596 = vmatprep.subr.mxu0 %v10033_v31  ;;  %6649 = vmatprep.subr.mxu1 %v10033_v31 }
 0x85f   : > { %6597 = vmatpush3.msra.mxu0 %v10095_v46  ;;  %6650 = vmatpush3.msra.mxu1 %v10096_v48 }
 0x860   : > { %6598 = vmatprep.subr.mxu0 %v10033_v31  ;;  %6651 = vmatprep.subr.mxu1 %v10033_v31 }
 0x861   : > { %6599 = vmatpush3.msra.mxu0 %v10097_v52  ;;  %6652 = vmatpush3.msra.mxu1 %v10098_v2 }
 0x862   : > { %6600 = vmatprep.subr.mxu0 %v10033_v31  ;;  %6653 = vmatprep.subr.mxu1 %v10033_v31 }
 0x863   : > { %6601 = vmatpush3.msra.mxu0 %v10099_v54  ;;  %6654 = vmatpush3.msra.mxu1 %v10100_v56 }
 0x864   : > { %6602 = vmatprep.subr.mxu0 %v10033_v31  ;;  %6655 = vmatprep.subr.mxu1 %v10033_v31 }
 0x865   : > { %6603 = vmatpush3.msra.mxu0 %v10101_v60  ;;  %6656 = vmatpush3.msra.mxu1 %v10102_v62  ;;  %v5545_v60 = vld [vmem:[%s9901_s10 + $0x2] sm:$0x1] }
 0x866   : > { %6604 = vmatprep.subr.mxu0 %v10033_v31  ;;  %6657 = vmatprep.subr.mxu1 %v10033_v31 }
 0x867   : > { %6605 = vmatpush3.msra.mxu0 %v8222_v26  ;;  %6658 = vmatpush3.msra.mxu1 %v10103_v0  ;;  %v10108_v26 = vld [vmem:[#allocation51_spill] sm:$0xff]  ;;  %v5572_v0 = vld [vmem:[%s9901_s10 + $0x3] sm:$0x1] }
 0x868   : > { %6606 = vmatprep.subr.mxu0 %v10033_v31  ;;  %6659 = vmatprep.subr.mxu1 %v10033_v31 }
 0x869   : > { %6607 = vmatpush3.msra.mxu0 %v10104_v1  ;;  %6660 = vmatpush3.msra.mxu1 %v10105_v12 }
 0x86a   : > { %6608 = vmatprep.subr.mxu0 %v10033_v31  ;;  %6661 = vmatprep.subr.mxu1 %v10033_v31 }
 0x86b   : > { %6609 = vmatpush3.msra.mxu0 %v10106_v13  ;;  %6662 = vmatpush3.msra.mxu1 %v10107_v16 }
 0x86c   : > { %6610 = vmatprep.subr.mxu0 %v10033_v31  ;;  %6663 = vmatprep.subr.mxu1 %v10033_v31 }
 0x86d   : > { %6611 = vmatpush3.msra.mxu0 %v10108_v26  ;;  %6664 = vmatpush3.msra.mxu1 %v10109_v17 }
 0x86e   : > { %6612 = vmatprep.subr.mxu0 %v10033_v31  ;;  %6665 = vmatprep.subr.mxu1 %v10033_v31 }
 0x86f   : > { %6613 = vmatpush3.msra.mxu0 %v10110_v19  ;;  %6666 = vmatpush3.msra.mxu1 %v10111_v21 }
 0x870   : > { %6614 = vmatprep.subr.mxu0 %v10033_v31  ;;  %6667 = vmatprep.subr.mxu1 %v10033_v31 }
 0x871   : > { %6615 = vmatpush3.msra.mxu0 %v10112_v23  ;;  %6668 = vmatpush3.msra.mxu1 %v10113_v24 }
 0x872   : > { %6616 = vmatprep.subr.mxu0 %v10033_v31  ;;  %6669 = vmatprep.subr.mxu1 %v10033_v31 }
 0x873   : > { %6617 = vmatpush3.msra.mxu0 %v10114_v25  ;;  %6670 = vmatpush3.msra.mxu1 %v10115_v27 }
 0x874   : > { %6618 = vmatprep.subr.mxu0 %v10033_v31  ;;  %6671 = vmatprep.subr.mxu1 %v10033_v31 }
 0x875   : > { %6619 = vmatpush3.msra.mxu0 %v10116_v30  ;;  %6672 = vmatpush3.msra.mxu1 %v10117_v45 }
 0x876   : > { %6620 = vmatprep.subr.mxu0 %v10033_v31  ;;  %6673 = vmatprep.subr.mxu1 %v10033_v31 }
 0x877   : > { %6621 = vmatpush3.msra.mxu0 %v10118_v42  ;;  %6622 = vmatprep.mubr.msk.f32.mxu0 %vm7444_vm1, %v10033_v31 }
 0x878   : > { %6674 = vmatpush3.msra.mxu1 %v10119_v35  ;;  %6675 = vmatprep.mubr.msk.f32.mxu1 %vm7444_vm1, %v10033_v31 }
 0x879   : > { %6623 = vmatmul.mubr.msk.f32.vlgmr.msra.gmra.mxu0 %vm696_vm4, %v8536_v7  ;;  %6676 = vmatmul.mubr.msk.f32.vlgmr.msra.gmra.mxu1 %vm696_vm4, %v8536_v7 }
 0x87a   : > { %6711 = vmatprep.subr.mxu1 %v10033_v31  ;;  %6719 = vmatprep.mubr.msk.f32.mxu1 %vm7444_vm1, %v10033_v31 }
 0x87b   : > { %6678 = vmatprep.subr.mxu0 %v10033_v31  ;;  %6686 = vmatprep.mubr.msk.f32.mxu0 %vm7444_vm1, %v10033_v31 }
 0x87c   : > { %6679 = vmatpush3.msra.mxu0 %v8664_v47  ;;  %6712 = vmatpush3.msra.mxu1 %v8692_v3 }
 0x87d   : > { %6680 = vmatprep.subr.mxu0 %v10033_v31  ;;  %6713 = vmatprep.subr.mxu1 %v10033_v31 }
 0x87e   : > { %6681 = vmatpush3.msra.mxu0 %v8671_v49  ;;  %6714 = vmatpush3.msra.mxu1 %v8697_v38 }
 0x87f   : > { %6682 = vmatprep.subr.mxu0 %v10033_v31  ;;  %6715 = vmatprep.subr.mxu1 %v10033_v31 }
 0x880   : > { %6683 = vmatpush3.msra.mxu0 %v8678_v6  ;;  %6716 = vmatpush3.msra.mxu1 %v8704_v39 }
 0x881   : > { %6684 = vmatprep.subr.mxu0 %v10033_v31  ;;  %6717 = vmatprep.subr.mxu1 %v10033_v31 }
 0x882   : > { %6685 = vmatpush3.msra.mxu0 %v8685_v37  ;;  %6718 = vmatpush3.msra.mxu1 %v8711_v36 }
 0x883   : > { %6689 = vmatprep.subr.mxu0 %v10033_v31  ;;  %6753 = vmatprep.subr.mxu1 %v10033_v31 }
 0x884   : > { %6720 = vmatmul.mubr.msk.f32.vlgmr.msra.gmra.mxu1 %vm509_vm2, %v8715_v40 }
 0x885   : > { %6754 = vmatpush3.msra.mxu1 %v8721_v43  ;;  %6761 = vmatprep.mubr.msk.f32.mxu1 %vm7444_vm1, %v10033_v31 }
 0x886   : > { %6755 = vmatprep.subr.mxu1 %v10033_v31 }
 0x887   : > { %6756 = vmatpush3.msra.mxu1 %v8730_v33 }
 0x888   : > { %6757 = vmatprep.subr.mxu1 %v10033_v31 }
 0x889   : > { %6758 = vmatpush3.msra.mxu1 %v8739_v5 }
 0x88a   : > { %6759 = vmatprep.subr.mxu1 %v10033_v31 }
 0x88b   : > { %6760 = vmatpush3.msra.mxu1 %v8746_v20 }
 0x88c   : > { %6764 = vmatprep.subr.mxu1 %v10033_v31 }
 0x908   : > { %v2124_v28 = vpop.f32.mrf.mxu0  ;;  %v2365_v7 = vpop.f32.mrf.mxu1 }
 0x909   : > { %v2369_v53 = vadd.f32 %v2365_v7, %v8485_v59  ;;  %v2128_v57 = vadd.f32 %v2124_v28, %v2038_v50  ;;  %v8839_v50 = vld [vmem:[%s9897_s6] sm:$0xff] }
 0x90a   : > { %v6518_v29 = vpop.f32.mrf.mxu0  ;;  %v6571_v4 = vpop.f32.mrf.mxu1 }
 0x90b   : > { %v2371_v41 = vadd.f32 %v5518_v61, %v2369_v53  ;;  %v2130_v44 = vadd.f32 %v2129_v63, %v2128_v57  ;;  %v8789_v4 = vld [vmem:[%s9898_s7 + $0x30] sm:$0xff] }
 0x90d   : > { %v5519_v46 = vmul.f32 -1.442695, %v2371_v41  ;;  %v5492_v48 = vmul.f32 -1.442695, %v2130_v44 }
 0x90f   : > { %7254 = vpow2.f32 %v5519_v46 }
 0x910   : > { %7256 = vpow2.f32 %v5492_v48 }
 0x911   : > { %v2452_v9 = vpop.f32.mrf.mxu0 }
 0x912   : > { %v2693_v10 = vpop.f32.mrf.mxu1 }
 0x913   : > { %v6582_v11 = vpop.f32.mrf.mxu0 }
 0x914   : > { %v6635_v18 = vpop.f32.mrf.mxu1  ;;  %v8820_v11 = vld [vmem:[%s9897_s6 + $0x10] sm:$0xff] }
 0x915   : > { %v8829_v18 = vld [vmem:[%s9897_s6 + $0x8] sm:$0xff] }
 0x91b   : > { %v2522_v51 = vpop.f32.mrf.mxu0 }
 0x91c   : > { %v2763_v55 = vpop.f32.mrf.mxu1  ;;  %v7255_v8 = vpop.eup %7254  ;;  %v2523_v52 = vadd.f32 %v2522_v51, %v2452_v9  ;;  %v8806_v9 = vld [vmem:[%s9897_s6 + $0x18] sm:$0xff] }
 0x91d   : > { %v6593_v22 = vpop.f32.mrf.mxu0  ;;  %v7257_v59 = vpop.eup %7256  ;;  %v2375_v58 = vadd.f32 1.0, %v7255_v8  ;;  %v2764_v2 = vadd.f32 %v2763_v55, %v2693_v10  ;;  %v8815_v10 = vld [vmem:[%s9898_s7 + $0x20] sm:$0xff]  ;;  %v8862_v8 = vld [vmem:[%s9899_s8 + $0x18] sm:$0xff] }
 0x91e   : > { %v6646_v15 = vpop.f32.mrf.mxu1  ;;  %v2134_v54 = vadd.f32 1.0, %v7257_v59 }
 0x91f   : > { %7258 = vrcp.f32 %v2375_v58  ;;  %v8854_v15 = vld [vmem:[%s9895_s4] sm:$0xff]  ;;  %v8868_v58 = vld [vmem:[%s9899_s8 + $0x10] sm:$0xff] }
 0x920   : > { %7260 = vrcp.f32 %v2134_v54 }
 0x92c   : > { %v7259_v21 = vpop.eup %7258 }
 0x92d   : > { %v7261_v23 = vpop.eup %7260  ;;  %v2855_v25 = vmul.f32 %v7259_v21, %v8408_v34  ;;  %v8780_v34 = vld [vmem:[%s9898_s7 + $0x38] sm:$0xff] }
 0x939   : > { %v2606_v56 = vpop.f32.mrf.mxu0  ;;  %v2847_v62 = vpop.f32.mrf.mxu1 }
 0x93a   : > { %v2610_v1 = vadd.f32 %v2606_v56, %v2523_v52  ;;  %v2851_v12 = vadd.f32 %v2847_v62, %v2764_v2  ;;  %v8877_v52 = vld [vmem:[%s9899_s8 + $0x8] sm:$0xff]  ;;  %v8884_v2 = vld [vmem:[%s9899_s8] sm:$0xff] }
 0x93b   : > { %v6624_v13 = vpop.f32.mrf.mxu0  ;;  %v6677_v16 = vpop.f32.mrf.mxu1 }
 0x93c   : > { %v2612_v26 = vadd.f32 %v5545_v60, %v2610_v1  ;;  %v2853_v17 = vadd.f32 %v5572_v0, %v2851_v12 }
 0x93e   : > { %v5546_v19 = vmul.f32 -1.442695, %v2612_v26  ;;  %7262 = vtanh.f32 %v2853_v17 }
 0x940   : > { %7264 = vpow2.f32 %v5546_v19 }
 0x944   : > { %v8848_v51 = vpop.f32.mrf.mxu1 }
 0x946   : > { %v6721_v53 = vpop.f32.mrf.mxu1 }
 0x947   : > { %v8930_v53 = vld [vmem:[%s9900_s9 + $0xc8] sm:$0xff] }
 0x94b   : > { %v7263_v24 = vpop.eup %7262 }
 0x94c   : > { %v2856_v27 = vmul.f32 %v7263_v24, %v7261_v23 }
 0x94d   : > { %v7265_v30 = vpop.eup %7264 }
 0x94e   : > { %v2616_v45 = vadd.f32 1.0, %v7265_v30  ;;  %v8768_v42 = vadd.f32 %v2856_v27, %v2855_v25  ;;  %v8901_v30 = vld [vmem:[%s9900_s9 + $0x68] sm:$0xff] }
 0x950   : > { %7266 = vrcp.f32 %v2616_v45  ;;  %5573 = vst.msk [vmem:[%s7585_s18 + $0x1] sm:$0x1] %vm1689_vm6, %v8768_v42  ;;  %v8906_v45 = vld [vmem:[%s9900_s9 + $0xd8] sm:$0xff] }
 0x951   : > { %7268 = vtanh.f32 %v8768_v42 }
 0x95d   : > { %v7267_v35 = vpop.eup %7266 }
 0x95e   : > { %v7269_v28 = vpop.eup %7268 }
 0x95f   : > { %v2859_v7 = vmul.f32 %v7269_v28, %v7267_v35  ;;  %v8911_v35 = vld [vmem:[%s9900_s9 + $0x60] sm:$0xff]  ;;  %v8918_v28 = vld [vmem:[%s9900_s9 + $0xd0] sm:$0xff] }
 0x961   : > { %v8775_v29 = vmul.f32 %v2859_v7, %v8417_v32  ;;  %v8801_v32 = vld [vmem:[%s9898_s7 + $0x28] sm:$0xff]  ;;  %v8925_v7 = vld [vmem:[%s9900_s9 + $0x58] sm:$0xff] }
 0x963   : > { %6687 = vmatmul.mubr.msk.f32.vlgmr.msra.gmra.mxu0 %vm509_vm2, %v8775_v29  ;;  %6762 = vmatmul.mubr.msk.f32.vlgmr.msra.gmra.mxu1 %vm509_vm2, %v8775_v29  ;;  %5574 = vst.msk [vmem:[%s7587_s22 + $0x1] sm:$0x1] %vm1689_vm6, %v8775_v29 }
 0x964   : > { %6765 = vmatpush3.msra.mxu1 %v8780_v34  ;;  %6772 = vmatprep.mubr.msk.f32.mxu1 %vm7444_vm1, %v10033_v31 }
 0x965   : > { %6766 = vmatprep.subr.mxu1 %v10033_v31  ;;  %6690 = vmatpush3.msra.mxu0 %v8806_v9 }
 0x966   : > { %6767 = vmatpush3.msra.mxu1 %v8789_v4  ;;  %6691 = vmatprep.subr.mxu0 %v10033_v31 }
 0x967   : > { %6768 = vmatprep.subr.mxu1 %v10033_v31  ;;  %6692 = vmatpush3.msra.mxu0 %v8820_v11 }
 0x968   : > { %6769 = vmatpush3.msra.mxu1 %v8801_v32  ;;  %6693 = vmatprep.subr.mxu0 %v10033_v31 }
 0x969   : > { %6770 = vmatprep.subr.mxu1 %v10033_v31  ;;  %6694 = vmatpush3.msra.mxu0 %v8829_v18 }
 0x96a   : > { %6771 = vmatpush3.msra.mxu1 %v8815_v10  ;;  %6695 = vmatprep.subr.mxu0 %v10033_v31 }
 0x96b   : > { %6773 = vmatmul.mubr.msk.f32.vlgmr.msra.gmra.mxu1 %vm509_vm2, %v8715_v40  ;;  %6696 = vmatpush3.msra.mxu0 %v8839_v50 }
 0x96c   : > { %6697 = vmatprep.mubr.msk.f32.mxu0 %vm7444_vm1, %v10033_v31  ;;  %6700 = vmatprep.subr.mxu0 %v10033_v31 }
 0x96d   : > { %6775 = vmatprep.subr.mxu1 %v10033_v31  ;;  %6803 = vmatprep.mubr.msk.f32.mxu1 %vm7444_vm1, %v10033_v31 }
 0x96e   : > { %6776 = vmatpush3.msra.mxu1 %v8906_v45 }
 0x96f   : > { %6777 = vmatprep.subr.mxu1 %v10033_v31 }
 0x970   : > { %6778 = vmatpush3.msra.mxu1 %v8918_v28 }
 0x971   : > { %6779 = vmatprep.subr.mxu1 %v10033_v31 }
 0x972   : > { %6780 = vmatpush3.msra.mxu1 %v8930_v53 }
 0x973   : > { %6781 = vmatprep.subr.mxu1 %v10033_v31 }
 0xa23   : > { %v2938_v55 = vpop.f32.mrf.mxu0  ;;  %v3384_v57 = vpop.f32.mrf.mxu1 }
 0xa24   : > { %v2945_v61 = vrot.slane %v2938_v55, %v7666_v14  ;;  %v8939_v55 = vld [vmem:[%s9900_s9 + $0x50] sm:$0xff] }
 0xa25   : > { %v6688_v22 = vpop.f32.mrf.mxu0  ;;  %v6763_v63 = vpop.f32.mrf.mxu1 }
 0xa26   : > { %v2946_v41 = vadd.f32 %v8854_v15, %v2945_v61  ;;  %v8953_v61 = vld [vmem:[%s9900_s9 + $0x48] sm:$0xff]  ;;  %v8958_v22 = vld [vmem:[%s9900_s9 + $0xb8] sm:$0xff]  ;;  %v8967_v63 = vld [vmem:[%s9900_s9 + $0x40] sm:$0xff] }
 0xa27   : > { %10120 = vst [vmem:[#allocation16_spill] sm:$0xff] %v8953_v61  ;;  %10121 = vst [vmem:[#allocation17_spill] sm:$0xff] %v8967_v63 }
 0xa28   : > { %7270 = vtanh.f32 %v2946_v41  ;;  %v8972_v41 = vld [vmem:[%s9900_s9 + $0xb0] sm:$0xff] }
 0xa2b   : > { %v3454_v44 = vpop.f32.mrf.mxu1 }
 0xa2c   : > { %v8857_v46 = vadd.f32 %v3454_v44, %v3384_v57  ;;  %v8944_v57 = vld [vmem:[%s9900_s9 + $0xc0] sm:$0xff]  ;;  %v8981_v44 = vld [vmem:[%s9900_s9 + $0x38] sm:$0xff] }
 0xa2d   : > { %v6774_v48 = vpop.f32.mrf.mxu1  ;;  %6782 = vmatpush3.msra.mxu1 %v8944_v57  ;;  %10122 = vst [vmem:[#allocation18_spill] sm:$0xff] %v8981_v44 }
 0xa2e   : > { %6783 = vmatprep.subr.mxu1 %v10033_v31  ;;  %v8986_v48 = vld [vmem:[%s9900_s9 + $0xa8] sm:$0xff] }
 0xa2f   : > { %6784 = vmatpush3.msra.mxu1 %v8958_v22 }
 0xa30   : > { %6785 = vmatprep.subr.mxu1 %v10033_v31 }
 0xa31   : > { %6786 = vmatpush3.msra.mxu1 %v8972_v41 }
 0xa32   : > { %6787 = vmatprep.subr.mxu1 %v10033_v31 }
 0xa33   : > { %6788 = vmatpush3.msra.mxu1 %v8986_v48 }
 0xa34   : > { %6789 = vmatprep.subr.mxu1 %v10033_v31 }
 0xa35   : > { %v7271_v59 = vpop.eup %7270 }
 0xa36   : > { %6698 = vmatmul.mubr.msk.f32.vlgmr.msra.gmra.mxu0 %vm509_vm2, %v7271_v59  ;;  %v8995_v59 = vld [vmem:[%s9900_s9 + $0x30] sm:$0xff] }
 0xa37   : > { %6701 = vmatpush3.msra.mxu0 %v8862_v8  ;;  %6708 = vmatprep.mubr.msk.f32.mxu0 %vm7444_vm1, %v10033_v31  ;;  %10123 = vst [vmem:[#allocation19_spill] sm:$0xff] %v8995_v59 }
 0xa38   : > { %6702 = vmatprep.subr.mxu0 %v10033_v31 }
 0xa39   : > { %6703 = vmatpush3.msra.mxu0 %v8868_v58 }
 0xa3a   : > { %6704 = vmatprep.subr.mxu0 %v10033_v31 }
 0xa3b   : > { %6705 = vmatpush3.msra.mxu0 %v8877_v52 }
 0xa3c   : > { %6706 = vmatprep.subr.mxu0 %v10033_v31 }
 0xa3d   : > { %6707 = vmatpush3.msra.mxu0 %v8884_v2 }
 0xa3e   : > { %6709 = vmatmul.mubr.msk.f32.vlgmr.msra.gmra.mxu0 %vm509_vm2, %v8775_v29  ;;  %6722 = vmatprep.subr.mxu0 %v10033_v31 }
 0xa3f   : > { %6750 = vmatprep.mubr.msk.f32.mxu0 %vm7444_vm1, %v10033_v31  ;;  %6723 = vmatpush3.msra.mxu0 %v8901_v30 }
 0xa40   : > { %6724 = vmatprep.subr.mxu0 %v10033_v31 }
 0xa41   : > { %6725 = vmatpush3.msra.mxu0 %v8911_v35 }
 0xa42   : > { %6726 = vmatprep.subr.mxu0 %v10033_v31 }
 0xa43   : > { %6727 = vmatpush3.msra.mxu0 %v8925_v7 }
 0xa44   : > { %6728 = vmatprep.subr.mxu0 %v10033_v31 }
 0xa45   : > { %6729 = vmatpush3.msra.mxu0 %v8939_v55 }
 0xa46   : > { %6730 = vmatprep.subr.mxu0 %v10033_v31 }
 0xa47   : > { %6731 = vmatpush3.msra.mxu0 %v8953_v61  ;;  %v9106_v61 = vld [vmem:[%s9899_s8 + $0x58] sm:$0xff] }
 0xa48   : > { %6732 = vmatprep.subr.mxu0 %v10033_v31 }
 0xa49   : > { %6733 = vmatpush3.msra.mxu0 %v8967_v63 }
 0xa4a   : > { %6734 = vmatprep.subr.mxu0 %v10033_v31 }
 0xa4b   : > { %6735 = vmatpush3.msra.mxu0 %v8981_v44 }
 0xa4c   : > { %6736 = vmatprep.subr.mxu0 %v10033_v31 }
 0xa4d   : > { %6737 = vmatpush3.msra.mxu0 %v8995_v59 }
 0xa4e   : > { %6738 = vmatprep.subr.mxu0 %v10033_v31 }
 0xaf6   : > { %v3017_v54 = vpop.f32.mrf.mxu0 }
 0xaf7   : > { %v3021_v56 = vsel %vm662_vm3, %v3017_v54, -inf }
 0xaf8   : > { %3022 = vmax.xlane.f32.xlu1 %v3021_v56  ;;  %v6699_v60 = vpop.f32.mrf.mxu0  ;;  %v9009_v56 = vld [vmem:[%s9900_s9 + $0x28] sm:$0xff] }
 0xaf9   : > { %10124 = vst [vmem:[#allocation20_spill] sm:$0xff] %v9009_v56  ;;  %v9014_v60 = vld [vmem:[%s9900_s9 + $0x98] sm:$0xff]  ;;  %6739 = vmatpush3.msra.mxu0 %v9009_v56 }
 0xafa   : > { %6740 = vmatprep.subr.mxu0 %v10033_v31 }
 0xafe   : > { %v8895_v62 = vpop.f32.mrf.mxu0 }
 0xb00   : > { %v6710_v0 = vpop.f32.mrf.mxu0 }
 0xb01   : > { %v9023_v0 = vld [vmem:[%s9900_s9 + $0x20] sm:$0xff] }
 0xb02   : > { %10125 = vst [vmem:[#allocation21_spill] sm:$0xff] %v9023_v0  ;;  %6741 = vmatpush3.msra.mxu0 %v9023_v0 }
 0xb03   : > { %6742 = vmatprep.subr.mxu0 %v10033_v31 }
 0xb81   : > { %v3023_v1 = vpop.xlane.xlu1 %3022 }
 0xb82   : > { %v3024_v12 = vrot.slane %v3023_v1, 4 }
 0xb84   : > { %v3025_v13 = vmax.f32 %v3023_v1, %v3024_v12  ;;  %v9028_v1 = vld [vmem:[%s9900_s9 + $0x90] sm:$0xff]  ;;  %v9037_v12 = vld [vmem:[%s9900_s9 + $0x18] sm:$0xff] }
 0xb85   : > { %10126 = vst [vmem:[#allocation22_spill] sm:$0xff] %v9037_v12  ;;  %6743 = vmatpush3.msra.mxu0 %v9037_v12 }
 0xb86   : > { %v3026_v16 = vrot.slane %v3025_v13, 2  ;;  %6744 = vmatprep.subr.mxu0 %v10033_v31 }
 0xb88   : > { %v3027_v26 = vmax.f32 %v3025_v13, %v3026_v16  ;;  %v9042_v13 = vld [vmem:[%s9900_s9 + $0x88] sm:$0xff]  ;;  %v9051_v16 = vld [vmem:[%s9900_s9 + $0x10] sm:$0xff] }
 0xb89   : > { %10127 = vst [vmem:[#allocation23_spill] sm:$0xff] %v9051_v16  ;;  %6745 = vmatpush3.msra.mxu0 %v9051_v16 }
 0xb8a   : > { %v3028_v17 = vrot.slane %v3027_v26, 1  ;;  %6746 = vmatprep.subr.mxu0 %v10033_v31 }
 0xb8c   : > { %v3029_v19 = vmax.f32 %v3027_v26, %v3028_v17  ;;  %v9056_v26 = vld [vmem:[%s9900_s9 + $0x80] sm:$0xff]  ;;  %v9069_v17 = vld [vmem:[%s9900_s9 + $0x8] sm:$0xff] }
 0xb8d   : > { %10128 = vst [vmem:[#allocation24_spill] sm:$0xff] %v9069_v17  ;;  %6747 = vmatpush3.msra.mxu0 %v9069_v17 }
 0xb8e   : > { %7158 = vpush %v3029_v19  ;;  %v9074_v19 = vld [vmem:[%s9900_s9 + $0x78] sm:$0xff]  ;;  %6748 = vmatprep.subr.mxu0 %v10033_v31 }
 0xbbf   : > { %s7159_s24 = spop %7158 }
 0xbc0   : > { %v3031_v21 = vstv %s7159_s24  ;;  %s5239_s24 = sshll.u32 %s7585_s18, 4  ;;  %s9766_s24 = int_to_ptr.vmem [resolvable:$true] %s5239_s24 }
 0xbc1   : > { %v3032_v23 = vsub.f32 %v3017_v54, %v3031_v21  ;;  %v9000_v54 = vld [vmem:[%s9900_s9 + $0xa0] sm:$0xff] }
 0xbc2   : > { %6790 = vmatpush3.msra.mxu1 %v9000_v54 }
 0xbc3   : > { %v3033_v24 = vmul.f32 1.442695, %v3032_v23  ;;  %6791 = vmatprep.subr.mxu1 %v10033_v31 }
 0xbc4   : > { %6792 = vmatpush3.msra.mxu1 %v9014_v60 }
 0xbc5   : > { %7272 = vpow2.f32 %v3033_v24  ;;  %6793 = vmatprep.subr.mxu1 %v10033_v31  ;;  %v9083_v24 = vld [vmem:[%s9900_s9] sm:$0xff] }
 0xbc6   : > { %6794 = vmatpush3.msra.mxu1 %v9028_v1  ;;  %10129 = vst [vmem:[#allocation25_spill] sm:$0xff] %v9083_v24  ;;  %6749 = vmatpush3.msra.mxu0 %v9083_v24 }
 0xbc7   : > { %6795 = vmatprep.subr.mxu1 %v10033_v31  ;;  %6806 = vmatprep.subr.mxu0 %v10033_v31 }
 0xbc8   : > { %6796 = vmatpush3.msra.mxu1 %v9042_v13 }
 0xbc9   : > { %6797 = vmatprep.subr.mxu1 %v10033_v31 }
 0xbca   : > { %6798 = vmatpush3.msra.mxu1 %v9056_v26 }
 0xbcb   : > { %6799 = vmatprep.subr.mxu1 %v10033_v31 }
 0xbcc   : > { %6800 = vmatpush3.msra.mxu1 %v9074_v19 }
 0xbcd   : > { %6801 = vmatprep.subr.mxu1 %v10033_v31 }
 0xbd2   : > { %v7273_v25 = vpop.eup %7272 }
 0xbd3   : > { %v3035_v27 = vsel %vm662_vm3, %v7273_v25, 0.0 }
 0xbd4   : > { %3036 = vadd.xlane.f32.xlu1 %v3035_v27 }
 0xbe5   : > { %3050 = vperm.xlu1 %7224, %v7273_v25   ;;  %v9088_v25 = vld [vmem:[%s9900_s9 + $0x70] sm:$0xff] }
 0xbe6   : > { %6802 = vmatpush3.msra.mxu1 %v9088_v25 }
 0xbe7   : > { %6859 = vmatprep.subr.mxu1 %v10033_v31 }
 0xc5d   : > { %v3037_v21 = vpop.xlane.xlu1 %3036 }
 0xc5e   : > { %v3038_v23 = vrot.slane %v3037_v21, 4 }
 0xc60   : > { %v3039_v27 = vadd.f32 %v3038_v23, %v3037_v21  ;;  %v9097_v21 = vld [vmem:[%s10029_s3] sm:$0xff] }
 0xc61   : > { %v3051_v44 = vpop.permute.xlu1 %3050 }
 0xc62   : > { %v3040_v17 = vrot.slane %v3039_v27, 2  ;;  %v3053_v23 = vmul.f32 %v9097_v21, %v3051_v44  ;;  %v9111_v44 = vld [vmem:[%s9899_s8 + $0x78] sm:$0xff] }
 0xc64   : > { %v3041_v16 = vadd.f32 %v3040_v17, %v3039_v27  ;;  %v3054_v24 = vsel %vm696_vm4, %v3053_v23, 0.0  ;;  %v9137_v23 = vld [vmem:[%s9899_s8 + $0x48] sm:$0xff] }
 0xc65   : > { %v3055_v17 = vrot.slane %v3054_v24, 4 }
 0xc66   : > { %v3042_v12 = vrot.slane %v3041_v16, 1 }
 0xc67   : > { %v3056_v27 = vadd.f32 %v3055_v17, %v3054_v24  ;;  %v9128_v24 = vld [vmem:[%s9899_s8 + $0x70] sm:$0xff]  ;;  %v9142_v17 = vld [vmem:[%s9899_s8 + $0x68] sm:$0xff] }
 0xc68   : > { %v3043_v0 = vadd.f32 %v3042_v12, %v3041_v16 }
 0xc69   : > { %v3057_v12 = vrot.slane %v3056_v27, 2 }
 0xc6a   : > { %7160 = vpush %v3043_v0 }
 0xc6b   : > { %v3058_v0 = vadd.f32 %v3057_v12, %v3056_v27  ;;  %v9151_v27 = vld [vmem:[%s9899_s8 + $0x40] sm:$0xff] }
 0xc6c   : > { %10130 = vst [vmem:[#allocation26_spill] sm:$0xff] %v9151_v27  ;;  %v9158_v12 = vld [vmem:[%s9899_s8 + $0x60] sm:$0xff] }
 0xc6d   : > { %v3059_v16 = vrot.slane %v3058_v0, 1  ;;  %10131 = vst [vmem:[#allocation27_spill] sm:$0xff] %v9158_v12 }
 0xc9b   : > { %s7161_s25 = spop %7160 }
 0xc9c   : > { %v3045_v56 = vstv %s7161_s25 }
 0xc9d   : > { %7274 = vrcp.f32 %v3045_v56  ;;  %v3060_v56 = vadd.f32 %v3059_v16, %v3058_v0  ;;  %v9171_v0 = vld [vmem:[%s9898_s7 + $0x58] sm:$0xff] }
 0xc9e   : > { %10132 = vst [vmem:[#allocation28_spill] sm:$0xff] %v9171_v0  ;;  %v9176_v16 = vld [vmem:[%s9898_s7 + $0x78] sm:$0xff] }
 0xc9f   : > { %10133 = vst [vmem:[#allocation29_spill] sm:$0xff] %v9176_v16 }
 0xcaa   : > { %v7275_v59 = vpop.eup %7274 }
 0xcab   : > { %7162 = vpush %v7275_v59 }
 0xcdc   : > { %s7163_s27 = spop %7162 }
 0xcdd   : > { %v3061_v63 = vstv %s7163_s27  ;;  %s10216_s27 = sand.u32 1, %s7433_s30  }
 0xcde   : > { %v9101_v59 = vmul.f32 %v3061_v63, %v3060_v56  ;;  %v9123_v63 = vld [vmem:[%s9899_s8 + $0x50] sm:$0xff] }
 0xcdf   : > { %v9187_v56 = vld [vmem:[%s9898_s7 + $0x50] sm:$0xff] }
 0xce0   : > { %5665 = vst.msk [vmem:[%s7589_s15 + $0x2] sm:$0x1] %vm1692_vm5, %v9101_v59  ;;  %6751 = vmatmul.mubr.msk.f32.vlgmr.msra.gmra.mxu0 %vm696_vm4, %v9101_v59  ;;  %6804 = vmatmul.mubr.msk.f32.vlgmr.msra.gmra.mxu1 %vm696_vm4, %v9101_v59  ;;  %10134 = vst [vmem:[#allocation30_spill] sm:$0xff] %v9187_v56 }
 0xce1   : > { %6807 = vmatpush3.msra.mxu0 %v9106_v61  ;;  %6860 = vmatpush3.msra.mxu1 %v9111_v44 }
 0xce2   : > { %6808 = vmatprep.subr.mxu0 %v10033_v31  ;;  %6861 = vmatprep.subr.mxu1 %v10033_v31 }
 0xce3   : > { %6809 = vmatpush3.msra.mxu0 %v9123_v63  ;;  %6862 = vmatpush3.msra.mxu1 %v9128_v24 }
 0xce4   : > { %6810 = vmatprep.subr.mxu0 %v10033_v31  ;;  %6863 = vmatprep.subr.mxu1 %v10033_v31 }
 0xce5   : > { %6811 = vmatpush3.msra.mxu0 %v9137_v23  ;;  %6864 = vmatpush3.msra.mxu1 %v9142_v17 }
 0xce6   : > { %6812 = vmatprep.subr.mxu0 %v10033_v31  ;;  %6865 = vmatprep.subr.mxu1 %v10033_v31 }
 0xce7   : > { %6813 = vmatpush3.msra.mxu0 %v9151_v27  ;;  %6814 = vmatprep.mubr.msk.f32.mxu0 %vm7444_vm1, %v10033_v31  ;;  %v9206_v27 = vld [vmem:[%s9898_s7 + $0x68] sm:$0xff] }
 0xce8   : > { %6866 = vmatpush3.msra.mxu1 %v9158_v12  ;;  %6867 = vmatprep.mubr.msk.f32.mxu1 %vm7444_vm1, %v10033_v31  ;;  %v9192_v12 = vld [vmem:[%s9898_s7 + $0x70] sm:$0xff]  ;;  %10137 = vst [vmem:[#allocation33_spill] sm:$0xff] %v9206_v27 }
 0xce9   : > { %6815 = vmatmul.mubr.msk.f32.vlgmr.msra.gmra.mxu0 %vm509_vm2, %v8775_v29  ;;  %6817 = vmatprep.subr.mxu0 %v10033_v31  ;;  %10135 = vst [vmem:[#allocation31_spill] sm:$0xff] %v9192_v12 }
 0xcea   : > { %6868 = vmatmul.mubr.msk.f32.vlgmr.msra.gmra.mxu1 %vm509_vm2, %v8775_v29  ;;  %6870 = vmatprep.subr.mxu1 %v10033_v31  ;;  %v9201_v29 = vld [vmem:[%s9898_s7 + $0x48] sm:$0xff] }
 0xceb   : > { %6818 = vmatpush3.msra.mxu0 %v9171_v0  ;;  %6871 = vmatpush3.msra.mxu1 %v9176_v16  ;;  %10136 = vst [vmem:[#allocation32_spill] sm:$0xff] %v9201_v29  ;;  %v9215_v16 = vld [vmem:[%s9898_s7 + $0x40] sm:$0xff] }
 0xcec   : > { %6819 = vmatprep.subr.mxu0 %v10033_v31  ;;  %6872 = vmatprep.subr.mxu1 %v10033_v31  ;;  %10138 = vst [vmem:[#allocation34_spill] sm:$0xff] %v9215_v16  ;;  %v9222_v0 = vld [vmem:[%s9898_s7 + $0x60] sm:$0xff] }
 0xced   : > { %6820 = vmatpush3.msra.mxu0 %v9187_v56  ;;  %6873 = vmatpush3.msra.mxu1 %v9192_v12  ;;  %10139 = vst [vmem:[#allocation35_spill] sm:$0xff] %v9222_v0  ;;  %v9270_v12 = vld [vmem:[%s9900_s9 + $0x1a8] sm:$0xff] }
 0xcee   : > { %6821 = vmatprep.subr.mxu0 %v10033_v31  ;;  %6874 = vmatprep.subr.mxu1 %v10033_v31  ;;  %10145 = vst [vmem:[#allocation41_spill] sm:$0xff] %v9270_v12 }
 0xcef   : > { %6822 = vmatpush3.msra.mxu0 %v9201_v29  ;;  %6875 = vmatpush3.msra.mxu1 %v9206_v27  ;;  %v9235_v27 = vld [vmem:[%s9900_s9 + $0x148] sm:$0xff]  ;;  %v9240_v29 = vld [vmem:[%s9900_s9 + $0x1b8] sm:$0xff] }
 0xcf0   : > { %6823 = vmatprep.subr.mxu0 %v10033_v31  ;;  %6876 = vmatprep.subr.mxu1 %v10033_v31  ;;  %10140 = vst [vmem:[#allocation36_spill] sm:$0xff] %v9235_v27  ;;  %10141 = vst [vmem:[#allocation37_spill] sm:$0xff] %v9240_v29 }
 0xcf1   : > { %6824 = vmatpush3.msra.mxu0 %v9215_v16  ;;  %6825 = vmatprep.mubr.msk.f32.mxu0 %vm7444_vm1, %v10033_v31  ;;  %v9256_v16 = vld [vmem:[%s9900_s9 + $0x1b0] sm:$0xff] }
 0xcf2   : > { %6877 = vmatpush3.msra.mxu1 %v9222_v0  ;;  %6878 = vmatprep.mubr.msk.f32.mxu1 %vm7444_vm1, %v10033_v31  ;;  %v9251_v0 = vld [vmem:[%s9900_s9 + $0x140] sm:$0xff]  ;;  %10143 = vst [vmem:[#allocation39_spill] sm:$0xff] %v9256_v16 }
 0xcf3   : > { %6826 = vmatmul.mubr.msk.f32.vlgmr.msra.gmra.mxu0 %vm509_vm2, %v8715_v40  ;;  %6828 = vmatprep.subr.mxu0 %v10033_v31  ;;  %10142 = vst [vmem:[#allocation38_spill] sm:$0xff] %v9251_v0 }
 0xcf4   : > { %6879 = vmatmul.mubr.msk.f32.vlgmr.msra.gmra.mxu1 %vm509_vm2, %v8715_v40  ;;  %6881 = vmatprep.subr.mxu1 %v10033_v31  ;;  %v9265_v40 = vld [vmem:[%s9900_s9 + $0x138] sm:$0xff] }
 0xcf5   : > { %6829 = vmatpush3.msra.mxu0 %v9235_v27  ;;  %6882 = vmatpush3.msra.mxu1 %v9240_v29  ;;  %10144 = vst [vmem:[#allocation40_spill] sm:$0xff] %v9265_v40  ;;  %v9279_v29 = vld [vmem:[%s9900_s9 + $0x130] sm:$0xff]  ;;  %v9284_v27 = vld [vmem:[%s9900_s9 + $0x1a0] sm:$0xff] }
 0xcf6   : > { %6830 = vmatprep.subr.mxu0 %v10033_v31  ;;  %6883 = vmatprep.subr.mxu1 %v10033_v31  ;;  %10146 = vst [vmem:[#allocation42_spill] sm:$0xff] %v9279_v29  ;;  %10147 = vst [vmem:[#allocation43_spill] sm:$0xff] %v9284_v27 }
 0xcf7   : > { %6831 = vmatpush3.msra.mxu0 %v9251_v0  ;;  %6884 = vmatpush3.msra.mxu1 %v9256_v16  ;;  %v9293_v16 = vld [vmem:[%s9900_s9 + $0x128] sm:$0xff]  ;;  %v9298_v0 = vld [vmem:[%s9900_s9 + $0x198] sm:$0xff] }
 0xcf8   : > { %6832 = vmatprep.subr.mxu0 %v10033_v31  ;;  %6885 = vmatprep.subr.mxu1 %v10033_v31  ;;  %10148 = vst [vmem:[#allocation44_spill] sm:$0xff] %v9293_v16  ;;  %10149 = vst [vmem:[#allocation45_spill] sm:$0xff] %v9298_v0 }
 0xcf9   : > { %6833 = vmatpush3.msra.mxu0 %v9265_v40  ;;  %6886 = vmatpush3.msra.mxu1 %v9270_v12  ;;  %v9307_v12 = vld [vmem:[%s9900_s9 + $0x120] sm:$0xff]  ;;  %v9312_v40 = vld [vmem:[%s9900_s9 + $0x190] sm:$0xff] }
 0xcfa   : > { %6834 = vmatprep.subr.mxu0 %v10033_v31  ;;  %6887 = vmatprep.subr.mxu1 %v10033_v31  ;;  %10150 = vst [vmem:[#allocation46_spill] sm:$0xff] %v9307_v12  ;;  %10151 = vst [vmem:[#allocation47_spill] sm:$0xff] %v9312_v40 }
 0xcfb   : > { %6835 = vmatpush3.msra.mxu0 %v9279_v29  ;;  %6888 = vmatpush3.msra.mxu1 %v9284_v27  ;;  %v9321_v27 = vld [vmem:[%s9900_s9 + $0x118] sm:$0xff]  ;;  %v9326_v29 = vld [vmem:[%s9900_s9 + $0x188] sm:$0xff] }
 0xcfc   : > { %6836 = vmatprep.subr.mxu0 %v10033_v31  ;;  %6889 = vmatprep.subr.mxu1 %v10033_v31  ;;  %10152 = vst [vmem:[#allocation48_spill] sm:$0xff] %v9321_v27  ;;  %10153 = vst [vmem:[#allocation49_spill] sm:$0xff] %v9326_v29 }
 0xcfd   : > { %6837 = vmatpush3.msra.mxu0 %v9293_v16  ;;  %6890 = vmatpush3.msra.mxu1 %v9298_v0  ;;  %v9335_v0 = vld [vmem:[%s9900_s9 + $0x110] sm:$0xff]  ;;  %v9340_v16 = vld [vmem:[%s9900_s9 + $0x180] sm:$0xff] }
 0xcfe   : > { %6838 = vmatprep.subr.mxu0 %v10033_v31  ;;  %6891 = vmatprep.subr.mxu1 %v10033_v31  ;;  %10154 = vst [vmem:[#allocation50_spill] sm:$0xff] %v9335_v0  ;;  %10155 = vst [vmem:[#allocation51_spill] sm:$0xff] %v9340_v16 }
 0xcff   : > { %6839 = vmatpush3.msra.mxu0 %v9307_v12  ;;  %6892 = vmatpush3.msra.mxu1 %v9312_v40  ;;  %v9349_v40 = vld [vmem:[%s9900_s9 + $0x108] sm:$0xff]  ;;  %v9354_v12 = vld [vmem:[%s9900_s9 + $0x178] sm:$0xff] }
 0xd00   : > { %6840 = vmatprep.subr.mxu0 %v10033_v31  ;;  %6893 = vmatprep.subr.mxu1 %v10033_v31  ;;  %10156 = vst [vmem:[#allocation52_spill] sm:$0xff] %v9349_v40  ;;  %10157 = vst [vmem:[#allocation53_spill] sm:$0xff] %v9354_v12 }
 0xd01   : > { %6841 = vmatpush3.msra.mxu0 %v9321_v27  ;;  %6894 = vmatpush3.msra.mxu1 %v9326_v29  ;;  %v9363_v29 = vld [vmem:[%s9900_s9 + $0x100] sm:$0xff]  ;;  %v9368_v27 = vld [vmem:[%s9900_s9 + $0x170] sm:$0xff] }
 0xd02   : > { %6842 = vmatprep.subr.mxu0 %v10033_v31  ;;  %6895 = vmatprep.subr.mxu1 %v10033_v31  ;;  %10158 = vst [vmem:[#allocation54_spill] sm:$0xff] %v9363_v29  ;;  %10159 = vst [vmem:[#allocation55_spill] sm:$0xff] %v9368_v27 }
 0xd03   : > { %6843 = vmatpush3.msra.mxu0 %v9335_v0  ;;  %6896 = vmatpush3.msra.mxu1 %v9340_v16  ;;  %v9377_v16 = vld [vmem:[%s9900_s9 + $0xf8] sm:$0xff]  ;;  %v9382_v0 = vld [vmem:[%s9900_s9 + $0x168] sm:$0xff] }
 0xd04   : > { %6844 = vmatprep.subr.mxu0 %v10033_v31  ;;  %6897 = vmatprep.subr.mxu1 %v10033_v31  ;;  %10160 = vst [vmem:[#allocation56_spill] sm:$0xff] %v9377_v16  ;;  %10161 = vst [vmem:[#allocation57_spill] sm:$0xff] %v9382_v0 }
 0xd05   : > { %6845 = vmatpush3.msra.mxu0 %v9349_v40  ;;  %6898 = vmatpush3.msra.mxu1 %v9354_v12  ;;  %v9391_v12 = vld [vmem:[%s9900_s9 + $0xf0] sm:$0xff]  ;;  %v9396_v40 = vld [vmem:[%s9900_s9 + $0x160] sm:$0xff] }
 0xd06   : > { %6846 = vmatprep.subr.mxu0 %v10033_v31  ;;  %6899 = vmatprep.subr.mxu1 %v10033_v31  ;;  %10162 = vst [vmem:[#allocation58_spill] sm:$0xff] %v9391_v12  ;;  %10163 = vst [vmem:[#allocation59_spill] sm:$0xff] %v9396_v40 }
 0xd07   : > { %6847 = vmatpush3.msra.mxu0 %v9363_v29  ;;  %6900 = vmatpush3.msra.mxu1 %v9368_v27  ;;  %v9405_v27 = vld [vmem:[%s9900_s9 + $0xe8] sm:$0xff]  ;;  %v9410_v29 = vld [vmem:[%s9900_s9 + $0x158] sm:$0xff] }
 0xd08   : > { %6848 = vmatprep.subr.mxu0 %v10033_v31  ;;  %6901 = vmatprep.subr.mxu1 %v10033_v31  ;;  %10164 = vst [vmem:[#allocation60_spill] sm:$0xff] %v9405_v27  ;;  %10165 = vst [vmem:[#allocation61_spill] sm:$0xff] %v9410_v29 }
 0xd09   : > { %6849 = vmatpush3.msra.mxu0 %v9377_v16  ;;  %6902 = vmatpush3.msra.mxu1 %v9382_v0  ;;  %v9419_v0 = vld [vmem:[%s9900_s9 + $0xe0] sm:$0xff]  ;;  %v9426_v16 = vld [vmem:[%s9900_s9 + $0x150] sm:$0xff] }
 0xd0a   : > { %6850 = vmatprep.subr.mxu0 %v10033_v31  ;;  %6903 = vmatprep.subr.mxu1 %v10033_v31  ;;  %10166 = vst [vmem:[#allocation62_spill] sm:$0xff] %v9419_v0  ;;  %10167 = vst [vmem:[#allocation63_spill] sm:$0xff] %v9426_v16 }
 0xd0b   : > { %6851 = vmatpush3.msra.mxu0 %v9391_v12  ;;  %6904 = vmatpush3.msra.mxu1 %v9396_v40 }
 0xd0c   : > { %6852 = vmatprep.subr.mxu0 %v10033_v31  ;;  %6905 = vmatprep.subr.mxu1 %v10033_v31 }
 0xd0d   : > { %6853 = vmatpush3.msra.mxu0 %v9405_v27  ;;  %6906 = vmatpush3.msra.mxu1 %v9410_v29 }
 0xd0e   : > { %6854 = vmatprep.subr.mxu0 %v10033_v31  ;;  %6907 = vmatprep.subr.mxu1 %v10033_v31 }
 0xd0f   : > { %6855 = vmatpush3.msra.mxu0 %v9419_v0  ;;  %6856 = vmatprep.mubr.msk.f32.mxu0 %vm7444_vm1, %v10033_v31 }
 0xd10   : > { %6908 = vmatpush3.msra.mxu1 %v9426_v16  ;;  %6909 = vmatprep.mubr.msk.f32.mxu1 %vm7444_vm1, %v10033_v31 }
 0xd11   : > { %6857 = vmatmul.mubr.msk.f32.vlgmr.msra.gmra.mxu0 %vm696_vm4, %v9101_v59  ;;  %6910 = vmatmul.mubr.msk.f32.vlgmr.msra.gmra.mxu1 %vm696_vm4, %v9101_v59 }
 0xd12   : > { %6945 = vmatprep.subr.mxu1 %v10033_v31  ;;  %6953 = vmatprep.mubr.msk.f32.mxu1 %vm7444_vm1, %v10033_v31 }
 0xd13   : > { %6946 = vmatpush3.msra.mxu1 %v8692_v3  ;;  %6912 = vmatprep.subr.mxu0 %v10033_v31 }
 0xd14   : > { %6947 = vmatprep.subr.mxu1 %v10033_v31  ;;  %6913 = vmatpush3.msra.mxu0 %v8664_v47  ;;  %v9463_v47 = vld [vmem:[%s7583_s21 + $0x3] sm:$0x1]  ;;  %s9773_s21 = scalar_lea.sflag [#allocation5], %s10216_s27 }
 0xd15   : > { %6948 = vmatpush3.msra.mxu1 %v8697_v38  ;;  %6914 = vmatprep.subr.mxu0 %v10033_v31 }
 0xd16   : > { %6949 = vmatprep.subr.mxu1 %v10033_v31  ;;  %6915 = vmatpush3.msra.mxu0 %v8671_v49 }
 0xd17   : > { %6950 = vmatpush3.msra.mxu1 %v8704_v39  ;;  %6916 = vmatprep.subr.mxu0 %v10033_v31 }
 0xd18   : > { %6951 = vmatprep.subr.mxu1 %v10033_v31  ;;  %6917 = vmatpush3.msra.mxu0 %v8678_v6 }
 0xd19   : > { %6952 = vmatpush3.msra.mxu1 %v8711_v36  ;;  %6918 = vmatprep.subr.mxu0 %v10033_v31 }
 0xd1a   : > { %6987 = vmatprep.subr.mxu1 %v10033_v31  ;;  %6919 = vmatpush3.msra.mxu0 %v8685_v37 }
 0xd1b   : > { %6920 = vmatprep.mubr.msk.f32.mxu0 %vm7444_vm1, %v10033_v31  ;;  %6923 = vmatprep.subr.mxu0 %v10033_v31 }
 0xd1c   : > { %6954 = vmatmul.mubr.msk.f32.vlgmr.msra.gmra.mxu1 %vm509_vm2, %v9463_v47 }
 0xd1d   : > { %6988 = vmatpush3.msra.mxu1 %v8721_v43  ;;  %6995 = vmatprep.mubr.msk.f32.mxu1 %vm7444_vm1, %v10033_v31 }
 0xd1e   : > { %6989 = vmatprep.subr.mxu1 %v10033_v31 }
 0xd1f   : > { %6990 = vmatpush3.msra.mxu1 %v8730_v33  ;;  %v3211_v33 = vadd.f32 %v8848_v51, %v8895_v62 }
 0xd20   : > { %6991 = vmatprep.subr.mxu1 %v10033_v31 }
 0xd21   : > { %6992 = vmatpush3.msra.mxu1 %v8739_v5 }
 0xd22   : > { %6993 = vmatprep.subr.mxu1 %v10033_v31 }
 0xd23   : > { %6994 = vmatpush3.msra.mxu1 %v8746_v20  ;;  %v5608_v20 = vld [vmem:[%s9901_s10 + $0x1] sm:$0x1] }
 0xd24   : > { %6998 = vmatprep.subr.mxu1 %v10033_v31 }
 0xda0   : > { %v3297_v49 = vpop.f32.mrf.mxu0  ;;  %v3538_v6 = vpop.f32.mrf.mxu1 }
 0xda1   : > { %v3542_v5 = vadd.f32 %v3538_v6, %v8857_v46  ;;  %v3301_v0 = vadd.f32 %v3297_v49, %v3211_v33 }
 0xda2   : > { %v6752_v37 = vpop.f32.mrf.mxu0  ;;  %v6805_v3 = vpop.f32.mrf.mxu1 }
 0xda3   : > { %v3302_v37 = vld [vmem:[%s9901_s10] sm:$0x1] }
 0xda9   : > { %v3625_v38 = vpop.f32.mrf.mxu0 }
 0xdaa   : > { %v3866_v39 = vpop.f32.mrf.mxu1 }
 0xdab   : > { %v6816_v36 = vpop.f32.mrf.mxu0 }
 0xdac   : > { %v6869_v43 = vpop.f32.mrf.mxu1  ;;  %v3544_v36 = vadd.f32 %v5608_v20, %v3542_v5 }
 0xdad   : > { %v3303_v43 = vadd.f32 %v3302_v37, %v3301_v0  ;;  %v5662_v0 = vld [vmem:[%s9901_s10 + $0x3] sm:$0x1] }
 0xdae   : > { %v5609_v27 = vmul.f32 -1.442695, %v3544_v36 }
 0xdaf   : > { %v5582_v40 = vmul.f32 -1.442695, %v3303_v43 }
 0xdb0   : > { %7276 = vpow2.f32 %v5609_v27 }
 0xdb1   : > { %7278 = vpow2.f32 %v5582_v40 }
 0xdb3   : > { %v3695_v59 = vpop.f32.mrf.mxu0 }
 0xdb4   : > { %v3936_v16 = vpop.f32.mrf.mxu1  ;;  %v3696_v49 = vadd.f32 %v3695_v59, %v3625_v38 }
 0xdb5   : > { %v6827_v29 = vpop.f32.mrf.mxu0  ;;  %v3937_v6 = vadd.f32 %v3936_v16, %v3866_v39 }
 0xdb6   : > { %v6880_v3 = vpop.f32.mrf.mxu1  ;;  %v5635_v29 = vld [vmem:[%s9901_s10 + $0x2] sm:$0x1] }
 0xdbd   : > { %v7277_v51 = vpop.eup %7276 }
 0xdbe   : > { %v7279_v46 = vpop.eup %7278  ;;  %v3548_v62 = vadd.f32 1.0, %v7277_v51 }
 0xdbf   : > { %v3307_v33 = vadd.f32 1.0, %v7279_v46 }
 0xdc0   : > { %7280 = vrcp.f32 %v3548_v62 }
 0xdc1   : > { %7282 = vrcp.f32 %v3307_v33 }
 0xdcd   : > { %v7281_v39 = vpop.eup %7280 }
 0xdce   : > { %v7283_v59 = vpop.eup %7282  ;;  %v4028_v36 = vmul.f32 %v7281_v39, %v8768_v42 }
 0xdd1   : > { %v3779_v12 = vpop.f32.mrf.mxu0  ;;  %v4020_v56 = vpop.f32.mrf.mxu1 }
 0xdd2   : > { %v3783_v5 = vadd.f32 %v3779_v12, %v3696_v49  ;;  %v4024_v20 = vadd.f32 %v4020_v56, %v3937_v6  ;;  %v9502_v6 = vld [vmem:[%s9902_s11] sm:$0x1] }
 0xdd3   : > { %v6858_v27 = vpop.f32.mrf.mxu0  ;;  %v6911_v40 = vpop.f32.mrf.mxu1 }
 0xdd4   : > { %v3785_v37 = vadd.f32 %v5635_v29, %v3783_v5  ;;  %v4026_v38 = vadd.f32 %v5662_v0, %v4024_v20 }
 0xdd6   : > { %v5636_v16 = vmul.f32 -1.442695, %v3785_v37  ;;  %7284 = vtanh.f32 %v4026_v38 }
 0xdd8   : > { %7286 = vpow2.f32 %v5636_v16 }
 0xde3   : > { %v7285_v3 = vpop.eup %7284 }
 0xde4   : > { %v4029_v43 = vmul.f32 %v7285_v3, %v7283_v59 }
 0xde5   : > { %v7287_v51 = vpop.eup %7286 }
 0xde6   : > { %v3789_v12 = vadd.f32 1.0, %v7287_v51  ;;  %v9493_v56 = vadd.f32 %v4029_v43, %v4028_v36 }
 0xde8   : > { %7288 = vrcp.f32 %v3789_v12  ;;  %5663 = vst.msk [vmem:[%s7585_s18 + $0x2] sm:$0x1] %vm1689_vm6, %v9493_v56 }
 0xde9   : > { %7290 = vtanh.f32 %v9493_v56 }
 0xdf5   : > { %v7289_v46 = vpop.eup %7288 }
 0xdf6   : > { %v7291_v62 = vpop.eup %7290 }
 0xdf7   : > { %v4032_v49 = vmul.f32 %v7291_v62, %v7289_v46 }
 0xdf9   : > { %v9505_v42 = vmul.f32 %v9502_v6, %v4032_v49 }
 0xdfb   : > { %6921 = vmatmul.mubr.msk.f32.vlgmr.msra.gmra.mxu0 %vm509_vm2, %v9505_v42  ;;  %6996 = vmatmul.mubr.msk.f32.vlgmr.msra.gmra.mxu1 %vm509_vm2, %v9505_v42  ;;  %5664 = vst.msk [vmem:[%s7587_s22 + $0x2] sm:$0x1] %vm1689_vm6, %v9505_v42 }
 0xdfc   : > { %6999 = vmatpush3.msra.mxu1 %v8780_v34  ;;  %7006 = vmatprep.mubr.msk.f32.mxu1 %vm7444_vm1, %v10033_v31  ;;  %v9566_v34 = vpop.f32.mrf.mxu1 }
 0xdfd   : > { %7000 = vmatprep.subr.mxu1 %v10033_v31  ;;  %6924 = vmatpush3.msra.mxu0 %v8806_v9 }
 0xdfe   : > { %7001 = vmatpush3.msra.mxu1 %v8789_v4  ;;  %6925 = vmatprep.subr.mxu0 %v10033_v31  ;;  %v6955_v4 = vpop.f32.mrf.mxu1 }
 0xdff   : > { %7002 = vmatprep.subr.mxu1 %v10033_v31  ;;  %6926 = vmatpush3.msra.mxu0 %v8820_v11 }
 0xe00   : > { %7003 = vmatpush3.msra.mxu1 %v8801_v32  ;;  %6927 = vmatprep.subr.mxu0 %v10033_v31 }
 0xe01   : > { %7004 = vmatprep.subr.mxu1 %v10033_v31  ;;  %6928 = vmatpush3.msra.mxu0 %v8829_v18 }
 0xe02   : > { %7005 = vmatpush3.msra.mxu1 %v8815_v10  ;;  %6929 = vmatprep.subr.mxu0 %v10033_v31 }
 0xe03   : > { %7007 = vmatmul.mubr.msk.f32.vlgmr.msra.gmra.mxu1 %vm509_vm2, %v9463_v47  ;;  %6930 = vmatpush3.msra.mxu0 %v8839_v50 }
 0xe04   : > { %6931 = vmatprep.mubr.msk.f32.mxu0 %vm7444_vm1, %v10033_v31  ;;  %6934 = vmatprep.subr.mxu0 %v10033_v31 }
 0xe05   : > { %7009 = vmatprep.subr.mxu1 %v10033_v31  ;;  %7037 = vmatprep.mubr.msk.f32.mxu1 %vm7444_vm1, %v10033_v31 }
 0xe06   : > { %7010 = vmatpush3.msra.mxu1 %v8906_v45 }
 0xe07   : > { %7011 = vmatprep.subr.mxu1 %v10033_v31 }
 0xe08   : > { %7012 = vmatpush3.msra.mxu1 %v8918_v28 }
 0xe09   : > { %7013 = vmatprep.subr.mxu1 %v10033_v31 }
 0xe0a   : > { %7014 = vmatpush3.msra.mxu1 %v8930_v53 }
 0xe0b   : > { %7015 = vmatprep.subr.mxu1 %v10033_v31 }
 0xe0c   : > { %7016 = vmatpush3.msra.mxu1 %v8944_v57 }
 0xe0d   : > { %7017 = vmatprep.subr.mxu1 %v10033_v31 }
 0xe0e   : > { %7018 = vmatpush3.msra.mxu1 %v8958_v22 }
 0xe0f   : > { %7019 = vmatprep.subr.mxu1 %v10033_v31 }
 0xe10   : > { %7020 = vmatpush3.msra.mxu1 %v8972_v41 }
 0xe11   : > { %7021 = vmatprep.subr.mxu1 %v10033_v31 }
 0xe12   : > { %7022 = vmatpush3.msra.mxu1 %v8986_v48 }
 0xe13   : > { %7023 = vmatprep.subr.mxu1 %v10033_v31 }
 0xe14   : > { %7024 = vmatpush3.msra.mxu1 %v9000_v54 }
 0xe15   : > { %7025 = vmatprep.subr.mxu1 %v10033_v31 }
 0xe16   : > { %7026 = vmatpush3.msra.mxu1 %v9014_v60 }
 0xe17   : > { %7027 = vmatprep.subr.mxu1 %v10033_v31 }
 0xe18   : > { %7028 = vmatpush3.msra.mxu1 %v9028_v1 }
 0xe19   : > { %7029 = vmatprep.subr.mxu1 %v10033_v31 }
 0xe1a   : > { %7030 = vmatpush3.msra.mxu1 %v9042_v13 }
 0xe1b   : > { %7031 = vmatprep.subr.mxu1 %v10033_v31 }
 0xe1c   : > { %7032 = vmatpush3.msra.mxu1 %v9056_v26 }
 0xe1d   : > { %7033 = vmatprep.subr.mxu1 %v10033_v31 }
 0xe1e   : > { %7034 = vmatpush3.msra.mxu1 %v9074_v19 }
 0xe1f   : > { %7035 = vmatprep.subr.mxu1 %v10033_v31 }
 0xe20   : > { %7036 = vmatpush3.msra.mxu1 %v9088_v25 }
 0xe21   : > { %7093 = vmatprep.subr.mxu1 %v10033_v31 }
 0xebb   : > { %v4111_v32 = vpop.f32.mrf.mxu0  ;;  %v4557_v9 = vpop.f32.mrf.mxu1 }
 0xebc   : > { %v4118_v10 = vrot.slane %v4111_v32, %v7666_v14  ;;  %v10168_v14 = vld [vmem:[#allocation16_spill] sm:$0xff] }
 0xebd   : > { %v6922_v11 = vpop.f32.mrf.mxu0  ;;  %v6997_v18 = vpop.f32.mrf.mxu1 }
 0xebe   : > { %v4119_v50 = vadd.f32 %v8854_v15, %v4118_v10  ;;  %v10169_v15 = vld [vmem:[#allocation17_spill] sm:$0xff] }
 0xec0   : > { %7292 = vtanh.f32 %v4119_v50 }
 0xec3   : > { %v4627_v45 = vpop.f32.mrf.mxu1 }
 0xec4   : > { %v9570_v28 = vadd.f32 %v4627_v45, %v4557_v9  ;;  %v10186_v45 = vld [vmem:[#allocation34_spill] sm:$0xff] }
 0xec5   : > { %v7008_v53 = vpop.f32.mrf.mxu1 }
 0xec6   : > { %v10187_v53 = vld [vmem:[#allocation35_spill] sm:$0xff] }
 0xecd   : > { %v7293_v57 = vpop.eup %7292 }
 0xece   : > { %6932 = vmatmul.mubr.msk.f32.vlgmr.msra.gmra.mxu0 %vm509_vm2, %v7293_v57  ;;  %v10188_v57 = vld [vmem:[#allocation36_spill] sm:$0xff] }
 0xecf   : > { %6935 = vmatpush3.msra.mxu0 %v8862_v8  ;;  %6942 = vmatprep.mubr.msk.f32.mxu0 %vm7444_vm1, %v10033_v31  ;;  %v10170_v8 = vld [vmem:[#allocation18_spill] sm:$0xff] }
 0xed0   : > { %6936 = vmatprep.subr.mxu0 %v10033_v31 }
 0xed1   : > { %6937 = vmatpush3.msra.mxu0 %v8868_v58  ;;  %v10171_v58 = vld [vmem:[#allocation19_spill] sm:$0xff] }
 0xed2   : > { %6938 = vmatprep.subr.mxu0 %v10033_v31 }
 0xed3   : > { %6939 = vmatpush3.msra.mxu0 %v8877_v52  ;;  %v10172_v52 = vld [vmem:[#allocation20_spill] sm:$0xff] }
 0xed4   : > { %6940 = vmatprep.subr.mxu0 %v10033_v31 }
 0xed5   : > { %6941 = vmatpush3.msra.mxu0 %v8884_v2  ;;  %v10173_v2 = vld [vmem:[#allocation21_spill] sm:$0xff] }
 0xed6   : > { %6943 = vmatmul.mubr.msk.f32.vlgmr.msra.gmra.mxu0 %vm509_vm2, %v9505_v42  ;;  %6956 = vmatprep.subr.mxu0 %v10033_v31 }
 0xed7   : > { %6957 = vmatpush3.msra.mxu0 %v8901_v30  ;;  %6984 = vmatprep.mubr.msk.f32.mxu0 %vm7444_vm1, %v10033_v31  ;;  %v10174_v30 = vld [vmem:[#allocation22_spill] sm:$0xff] }
 0xed8   : > { %6958 = vmatprep.subr.mxu0 %v10033_v31 }
 0xed9   : > { %6959 = vmatpush3.msra.mxu0 %v8911_v35  ;;  %v10175_v35 = vld [vmem:[#allocation23_spill] sm:$0xff] }
 0xeda   : > { %6960 = vmatprep.subr.mxu0 %v10033_v31 }
 0xedb   : > { %6961 = vmatpush3.msra.mxu0 %v8925_v7  ;;  %v10176_v7 = vld [vmem:[#allocation24_spill] sm:$0xff] }
 0xedc   : > { %6962 = vmatprep.subr.mxu0 %v10033_v31 }
 0xedd   : > { %6963 = vmatpush3.msra.mxu0 %v8939_v55  ;;  %v10177_v55 = vld [vmem:[#allocation25_spill] sm:$0xff] }
 0xede   : > { %6964 = vmatprep.subr.mxu0 %v10033_v31 }
 0xedf   : > { %6965 = vmatpush3.msra.mxu0 %v10168_v14  ;;  %v10189_v14 = vld [vmem:[#allocation37_spill] sm:$0xff] }
 0xee0   : > { %6966 = vmatprep.subr.mxu0 %v10033_v31 }
 0xee1   : > { %6967 = vmatpush3.msra.mxu0 %v10169_v15  ;;  %v10190_v15 = vld [vmem:[#allocation38_spill] sm:$0xff] }
 0xee2   : > { %6968 = vmatprep.subr.mxu0 %v10033_v31 }
 0xee3   : > { %6969 = vmatpush3.msra.mxu0 %v10170_v8  ;;  %v10191_v8 = vld [vmem:[#allocation39_spill] sm:$0xff] }
 0xee4   : > { %6970 = vmatprep.subr.mxu0 %v10033_v31 }
 0xee5   : > { %6971 = vmatpush3.msra.mxu0 %v10171_v58  ;;  %v10192_v58 = vld [vmem:[#allocation40_spill] sm:$0xff] }
 0xee6   : > { %6972 = vmatprep.subr.mxu0 %v10033_v31 }
 0xee7   : > { %6973 = vmatpush3.msra.mxu0 %v10172_v52  ;;  %v10194_v52 = vld [vmem:[#allocation42_spill] sm:$0xff] }
 0xee8   : > { %6974 = vmatprep.subr.mxu0 %v10033_v31 }
 0xee9   : > { %6975 = vmatpush3.msra.mxu0 %v10173_v2  ;;  %v10195_v2 = vld [vmem:[#allocation43_spill] sm:$0xff] }
 0xeea   : > { %6976 = vmatprep.subr.mxu0 %v10033_v31 }
 0xeeb   : > { %6977 = vmatpush3.msra.mxu0 %v10174_v30  ;;  %v10196_v30 = vld [vmem:[#allocation44_spill] sm:$0xff] }
 0xeec   : > { %6978 = vmatprep.subr.mxu0 %v10033_v31 }
 0xeed   : > { %6979 = vmatpush3.msra.mxu0 %v10175_v35  ;;  %v10197_v35 = vld [vmem:[#allocation45_spill] sm:$0xff] }
 0xeee   : > { %6980 = vmatprep.subr.mxu0 %v10033_v31 }
 0xeef   : > { %6981 = vmatpush3.msra.mxu0 %v10176_v7  ;;  %v10198_v7 = vld [vmem:[#allocation46_spill] sm:$0xff] }
 0xef0   : > { %6982 = vmatprep.subr.mxu0 %v10033_v31 }
 0xef1   : > { %6983 = vmatpush3.msra.mxu0 %v10177_v55  ;;  %v10199_v55 = vld [vmem:[#allocation47_spill] sm:$0xff] }
 0xef2   : > { %7040 = vmatprep.subr.mxu0 %v10033_v31 }
 0xf8e   : > { %v4190_v22 = vpop.f32.mrf.mxu0 }
 0xf8f   : > { %v4194_v41 = vsel %vm662_vm3, %v4190_v22, -inf }
 0xf90   : > { %4195 = vmax.xlane.f32.xlu0 %v4194_v41  ;;  %v6933_v48 = vpop.f32.mrf.mxu0  ;;  %v10201_v41 = vld [vmem:[#allocation49_spill] sm:$0xff] }
 0xf91   : > { %v10202_v48 = vld [vmem:[#allocation50_spill] sm:$0xff] }
 0xf96   : > { %v9616_v54 = vpop.f32.mrf.mxu0 }
 0xf98   : > { %v6944_v60 = vpop.f32.mrf.mxu0 }
 0xf99   : > { %v10203_v60 = vld [vmem:[#allocation51_spill] sm:$0xff] }
0x1019   : > { %v4196_v1 = vpop.xlane.xlu0 %4195 }
0x101a   : > { %v4197_v13 = vrot.slane %v4196_v1, 4 }
0x101c   : > { %v4198_v26 = vmax.f32 %v4196_v1, %v4197_v13  ;;  %v10204_v1 = vld [vmem:[#allocation52_spill] sm:$0xff]  ;;  %v10205_v13 = vld [vmem:[#allocation53_spill] sm:$0xff] }
0x101e   : > { %v4199_v19 = vrot.slane %v4198_v26, 2 }
0x1020   : > { %v4200_v25 = vmax.f32 %v4198_v26, %v4199_v19  ;;  %v10206_v26 = vld [vmem:[#allocation54_spill] sm:$0xff]  ;;  %v10207_v19 = vld [vmem:[#allocation55_spill] sm:$0xff] }
0x1022   : > { %v4201_v33 = vrot.slane %v4200_v25, 1 }
0x1024   : > { %v4202_v29 = vmax.f32 %v4200_v25, %v4201_v33  ;;  %v10208_v25 = vld [vmem:[#allocation56_spill] sm:$0xff]  ;;  %v10209_v33 = vld [vmem:[#allocation57_spill] sm:$0xff] }
0x1026   : > { %7164 = vpush %v4202_v29  ;;  %v10210_v29 = vld [vmem:[#allocation58_spill] sm:$0xff] }
0x1057   : > { %s7165_s20 = spop %7164 }
0x1058   : > { %v4204_v0 = vstv %s7165_s20  ;;  %s7325_s20 = scalar_lea.vmem %s9766_s24, 64 }
0x1059   : > { %v4205_v5 = vsub.f32 %v4190_v22, %v4204_v0  ;;  %v10200_v22 = vld [vmem:[#allocation48_spill] sm:$0xff]  ;;  %v10211_v0 = vld [vmem:[#allocation59_spill] sm:$0xff]  ;;  %p7326_p12 = scmp.ne.s32.totalorder %s9766_s24, %s7325_s20 }
0x105b   : > { %v4206_v20 = vmul.f32 1.442695, %v4205_v5  ;;  %v10212_v5 = vld [vmem:[#allocation60_spill] sm:$0xff]  ;;  %p7327_p13 = pnand %p7326_p12, %p7566_p5 }
0x105d   : > { %7294 = vpow2.f32 %v4206_v20  ;;  %v10213_v20 = vld [vmem:[#allocation61_spill] sm:$0xff]  ;;  %p7328_p0 = pneg %p7327_p13 }
0x106a   : > { %v7295_v27 = vpop.eup %7294 }
0x106b   : > { %4223 = vperm.xlu0 %7225, %v7295_v27   ;;  %v4208_v40 = vsel %vm662_vm3, %v7295_v27, 0.0  ;;  %v10214_v27 = vld [vmem:[#allocation62_spill] sm:$0xff] }
0x106c   : > { %4209 = vadd.xlane.f32.xlu1 %v4208_v40  ;;  %v10215_v40 = vld [vmem:[#allocation63_spill] sm:$0xff] }
0x10e6   : > { %v4224_v12 = vpop.permute.xlu0 %4223 }
0x10e7   : > { %v4226_v46 = vmul.f32 %v9097_v21, %v4224_v12  ;;  %v10179_v21 = vld [vmem:[#allocation27_spill] sm:$0xff] }
0x10e9   : > { %v4227_v62 = vsel %vm696_vm4, %v4226_v46, 0.0 }
0x10ea   : > { %v4228_v49 = vrot.slane %v4227_v62, 4 }
0x10ec   : > { %v4229_v4 = vadd.f32 %v4228_v49, %v4227_v62  ;;  %v5698_v49 = vld [vmem:[%s9901_s10 + $0x1] sm:$0x1] }
0x10ee   : > { %v4230_v32 = vrot.slane %v4229_v4, 2 }
0x10f0   : > { %v4231_v9 = vadd.f32 %v4230_v32, %v4229_v4  ;;  %v4475_v32 = vld [vmem:[%s9901_s10] sm:$0x1] }
0x10f2   : > { %v4232_v10 = vrot.slane %v4231_v9, 1 }
0x10f4   : > { %v4233_v11 = vadd.f32 %v4232_v10, %v4231_v9 }
0x10f5   : > { %v4210_v37 = vpop.xlane.xlu1 %4209 }
0x10f6   : > { %v4211_v38 = vrot.slane %v4210_v37, 4 }
0x10f8   : > { %v4212_v16 = vadd.f32 %v4211_v38, %v4210_v37 }
0x10fa   : > { %v4213_v39 = vrot.slane %v4212_v16, 2 }
0x10fc   : > { %v4214_v59 = vadd.f32 %v4213_v39, %v4212_v16 }
0x10fe   : > { %v4215_v3 = vrot.slane %v4214_v59, 1 }
0x1100   : > { %v4216_v36 = vadd.f32 %v4215_v3, %v4214_v59 }
0x1102   : > { %7166 = vpush %v4216_v36 }
0x1133   : > { %s7167_s29 = spop %7166 }
0x1134   : > { %v4218_v43 = vstv %s7167_s29  ;;  %s7446_s29 = smov [#allocation4]  }
0x1135   : > { %7296 = vrcp.f32 %v4218_v43  ;;  %s7329_s25 = sshll.u32 %s7446_s29, 4  ;;  %s7330_s25 = int_to_ptr.vmem [resolvable:$false] %s7329_s25 }
0x1136   : > { %s7331_s26 = scalar_lea.vmem %s7330_s25, 128  ;;  %p7332_p1 = scmp.lt.s32.totalorder %s9766_s24, %s7330_s25 }
0x1137   : > { %p7333_p2 = scmp.lt.s32.totalorder %s7331_s26, %s7325_s20 }
0x1139   : > { %p7334_p3 = por %p7333_p2, %p7332_p1 }
0x113b   : > { %p7335_p4 = pnand %p7334_p3, %p7328_p0 }
0x1142   : > { %v7297_v51 = vpop.eup %7296 }
0x1143   : > { %7168 = vpush %v7297_v51  ;;  %v4384_v51 = vadd.f32 %v9566_v34, %v9616_v54 }
0x1174   : > { %s7169_s19 = spop %7168 }
0x1175   : > { %v4234_v18 = vstv %s7169_s19  ;;  %s9756_s19 = sshll.u32 %s7547_s17, 6 }
0x1176   : > { %v9621_v50 = vmul.f32 %v4234_v18, %v4233_v11  ;;  %s9764_s28 = scalar_lea.hbm %s9903_s12, %s9756_s19 }
0x1178   : > { %5755 = vst.msk [vmem:[%s7589_s15 + $0x3] sm:$0x1] %vm1692_vm5, %v9621_v50  ;;  %6985 = vmatmul.mubr.msk.f32.vlgmr.msra.gmra.mxu0 %vm696_vm4, %v9621_v50  ;;  %7038 = vmatmul.mubr.msk.f32.vlgmr.msra.gmra.mxu1 %vm696_vm4, %v9621_v50 }
0x1179   : > { %7041 = vmatpush3.msra.mxu0 %v9106_v61  ;;  %7094 = vmatpush3.msra.mxu1 %v9111_v44  ;;  %v10178_v61 = vld [vmem:[#allocation26_spill] sm:$0xff]  ;;  %v10180_v44 = vld [vmem:[#allocation28_spill] sm:$0xff] }
0x117a   : > { %7042 = vmatprep.subr.mxu0 %v10033_v31  ;;  %7095 = vmatprep.subr.mxu1 %v10033_v31 }
0x117b   : > { %7043 = vmatpush3.msra.mxu0 %v9123_v63  ;;  %7096 = vmatpush3.msra.mxu1 %v9128_v24  ;;  %v10181_v63 = vld [vmem:[#allocation29_spill] sm:$0xff]  ;;  %v10182_v24 = vld [vmem:[#allocation30_spill] sm:$0xff] }
0x117c   : > { %7044 = vmatprep.subr.mxu0 %v10033_v31  ;;  %7097 = vmatprep.subr.mxu1 %v10033_v31 }
0x117d   : > { %7045 = vmatpush3.msra.mxu0 %v9137_v23  ;;  %7098 = vmatpush3.msra.mxu1 %v9142_v17  ;;  %v10183_v23 = vld [vmem:[#allocation31_spill] sm:$0xff]  ;;  %v10184_v17 = vld [vmem:[#allocation32_spill] sm:$0xff] }
0x117e   : > { %7046 = vmatprep.subr.mxu0 %v10033_v31  ;;  %7099 = vmatprep.subr.mxu1 %v10033_v31 }
0x117f   : > { %7047 = vmatpush3.msra.mxu0 %v10178_v61  ;;  %7048 = vmatprep.mubr.msk.f32.mxu0 %vm7444_vm1, %v10033_v31 }
0x1180   : > { %7100 = vmatpush3.msra.mxu1 %v10179_v21  ;;  %7101 = vmatprep.mubr.msk.f32.mxu1 %vm7444_vm1, %v10033_v31 }
0x1181   : > { %7049 = vmatmul.mubr.msk.f32.vlgmr.msra.gmra.mxu0 %vm509_vm2, %v9505_v42  ;;  %7051 = vmatprep.subr.mxu0 %v10033_v31 }
0x1182   : > { %7102 = vmatmul.mubr.msk.f32.vlgmr.msra.gmra.mxu1 %vm509_vm2, %v9505_v42  ;;  %7104 = vmatprep.subr.mxu1 %v10033_v31  ;;  %v10185_v42 = vld [vmem:[#allocation33_spill] sm:$0xff] }
0x1183   : > { %7052 = vmatpush3.msra.mxu0 %v10180_v44  ;;  %7105 = vmatpush3.msra.mxu1 %v10181_v63 }
0x1184   : > { %7053 = vmatprep.subr.mxu0 %v10033_v31  ;;  %7106 = vmatprep.subr.mxu1 %v10033_v31 }
0x1185   : > { %7054 = vmatpush3.msra.mxu0 %v10182_v24  ;;  %7107 = vmatpush3.msra.mxu1 %v10183_v23  ;;  %v5725_v24 = vld [vmem:[%s9901_s10 + $0x2] sm:$0x1] }
0x1186   : > { %7055 = vmatprep.subr.mxu0 %v10033_v31  ;;  %7108 = vmatprep.subr.mxu1 %v10033_v31 }
0x1187   : > { %7056 = vmatpush3.msra.mxu0 %v10184_v17  ;;  %7109 = vmatpush3.msra.mxu1 %v10185_v42  ;;  %v5752_v17 = vld [vmem:[%s9901_s10 + $0x3] sm:$0x1] }
0x1188   : > { %7057 = vmatprep.subr.mxu0 %v10033_v31  ;;  %7110 = vmatprep.subr.mxu1 %v10033_v31 }
0x1189   : > { %7058 = vmatpush3.msra.mxu0 %v10186_v45  ;;  %7059 = vmatprep.mubr.msk.f32.mxu0 %vm7444_vm1, %v10033_v31 }
0x118a   : > { %7111 = vmatpush3.msra.mxu1 %v10187_v53  ;;  %7112 = vmatprep.mubr.msk.f32.mxu1 %vm7444_vm1, %v10033_v31 }
0x118b   : > { %7060 = vmatmul.mubr.msk.f32.vlgmr.msra.gmra.mxu0 %vm509_vm2, %v9463_v47  ;;  %7062 = vmatprep.subr.mxu0 %v10033_v31 }
0x118c   : > { %7113 = vmatmul.mubr.msk.f32.vlgmr.msra.gmra.mxu1 %vm509_vm2, %v9463_v47  ;;  %7115 = vmatprep.subr.mxu1 %v10033_v31  ;;  %v10193_v47 = vld [vmem:[#allocation41_spill] sm:$0xff] }
0x118d   : > { %7063 = vmatpush3.msra.mxu0 %v10188_v57  ;;  %7116 = vmatpush3.msra.mxu1 %v10189_v14 }
0x118e   : > { %7064 = vmatprep.subr.mxu0 %v10033_v31  ;;  %7117 = vmatprep.subr.mxu1 %v10033_v31 }
0x118f   : > { %7065 = vmatpush3.msra.mxu0 %v10190_v15  ;;  %7118 = vmatpush3.msra.mxu1 %v10191_v8 }
0x1190   : > { %7066 = vmatprep.subr.mxu0 %v10033_v31  ;;  %7119 = vmatprep.subr.mxu1 %v10033_v31 }
0x1191   : > { %7067 = vmatpush3.msra.mxu0 %v10192_v58  ;;  %7120 = vmatpush3.msra.mxu1 %v10193_v47 }
0x1192   : > { %7068 = vmatprep.subr.mxu0 %v10033_v31  ;;  %7121 = vmatprep.subr.mxu1 %v10033_v31 }
0x1193   : > { %7069 = vmatpush3.msra.mxu0 %v10194_v52  ;;  %7122 = vmatpush3.msra.mxu1 %v10195_v2 }
0x1194   : > { %7070 = vmatprep.subr.mxu0 %v10033_v31  ;;  %7123 = vmatprep.subr.mxu1 %v10033_v31 }
0x1195   : > { %7071 = vmatpush3.msra.mxu0 %v10196_v30  ;;  %7124 = vmatpush3.msra.mxu1 %v10197_v35 }
0x1196   : > { %7072 = vmatprep.subr.mxu0 %v10033_v31  ;;  %7125 = vmatprep.subr.mxu1 %v10033_v31 }
0x1197   : > { %7073 = vmatpush3.msra.mxu0 %v10198_v7  ;;  %7126 = vmatpush3.msra.mxu1 %v10199_v55 }
0x1198   : > { %7074 = vmatprep.subr.mxu0 %v10033_v31  ;;  %7127 = vmatprep.subr.mxu1 %v10033_v31 }
0x1199   : > { %7075 = vmatpush3.msra.mxu0 %v10200_v22  ;;  %7128 = vmatpush3.msra.mxu1 %v10201_v41 }
0x119a   : > { %7076 = vmatprep.subr.mxu0 %v10033_v31  ;;  %7129 = vmatprep.subr.mxu1 %v10033_v31 }
0x119b   : > { %7077 = vmatpush3.msra.mxu0 %v10202_v48  ;;  %7130 = vmatpush3.msra.mxu1 %v10203_v60 }
0x119c   : > { %7078 = vmatprep.subr.mxu0 %v10033_v31  ;;  %7131 = vmatprep.subr.mxu1 %v10033_v31 }
0x119d   : > { %7079 = vmatpush3.msra.mxu0 %v10204_v1  ;;  %7132 = vmatpush3.msra.mxu1 %v10205_v13 }
0x119e   : > { %7080 = vmatprep.subr.mxu0 %v10033_v31  ;;  %7133 = vmatprep.subr.mxu1 %v10033_v31 }
0x119f   : > { %7081 = vmatpush3.msra.mxu0 %v10206_v26  ;;  %7134 = vmatpush3.msra.mxu1 %v10207_v19 }
0x11a0   : > { %7082 = vmatprep.subr.mxu0 %v10033_v31  ;;  %7135 = vmatprep.subr.mxu1 %v10033_v31 }
0x11a1   : > { %7083 = vmatpush3.msra.mxu0 %v10208_v25  ;;  %7136 = vmatpush3.msra.mxu1 %v10209_v33 }
0x11a2   : > { %7084 = vmatprep.subr.mxu0 %v10033_v31  ;;  %7137 = vmatprep.subr.mxu1 %v10033_v31 }
0x11a3   : > { %7085 = vmatpush3.msra.mxu0 %v10210_v29  ;;  %7138 = vmatpush3.msra.mxu1 %v10211_v0 }
0x11a4   : > { %7086 = vmatprep.subr.mxu0 %v10033_v31  ;;  %7139 = vmatprep.subr.mxu1 %v10033_v31 }
0x11a5   : > { %7087 = vmatpush3.msra.mxu0 %v10212_v5  ;;  %7140 = vmatpush3.msra.mxu1 %v10213_v20 }
0x11a6   : > { %7088 = vmatprep.subr.mxu0 %v10033_v31  ;;  %7141 = vmatprep.subr.mxu1 %v10033_v31 }
0x11a7   : > { %7089 = vmatpush3.msra.mxu0 %v10214_v27  ;;  %7090 = vmatprep.mubr.msk.f32.mxu0 %vm7444_vm1, %v10033_v31 }
0x11a8   : > { %7142 = vmatpush3.msra.mxu1 %v10215_v40  ;;  %7143 = vmatprep.mubr.msk.f32.mxu1 %vm7444_vm1, %v10033_v31 }
0x11a9   : > { %7091 = vmatmul.mubr.msk.f32.vlgmr.msra.gmra.mxu0 %vm696_vm4, %v9621_v50  ;;  %7144 = vmatmul.mubr.msk.f32.vlgmr.msra.gmra.mxu1 %vm696_vm4, %v9621_v50 }
0x1238   : > { %v4470_v37 = vpop.f32.mrf.mxu0  ;;  %v4711_v38 = vpop.f32.mrf.mxu1 }
0x1239   : > { %v4715_v31 = vadd.f32 %v4711_v38, %v9570_v28  ;;  %v4474_v62 = vadd.f32 %v4470_v37, %v4384_v51 }
0x123a   : > { %v6986_v16 = vpop.f32.mrf.mxu0  ;;  %v7039_v39 = vpop.f32.mrf.mxu1 }
0x123b   : > { %v4717_v10 = vadd.f32 %v5698_v49, %v4715_v31  ;;  %v4476_v11 = vadd.f32 %v4475_v32, %v4474_v62 }
0x123d   : > { %v5699_v18 = vmul.f32 -1.442695, %v4717_v10  ;;  %v5672_v50 = vmul.f32 -1.442695, %v4476_v11 }
0x123f   : > { %7298 = vpow2.f32 %v5699_v18 }
0x1240   : > { %7300 = vpow2.f32 %v5672_v50 }
0x1241   : > { %v4798_v59 = vpop.f32.mrf.mxu0 }
0x1242   : > { %v5039_v3 = vpop.f32.mrf.mxu1 }
0x1243   : > { %v7050_v36 = vpop.f32.mrf.mxu0 }
0x1244   : > { %v7103_v43 = vpop.f32.mrf.mxu1 }
0x124b   : > { %v4868_v12 = vpop.f32.mrf.mxu0 }
0x124c   : > { %v5109_v46 = vpop.f32.mrf.mxu1  ;;  %v7299_v34 = vpop.eup %7298  ;;  %v4869_v61 = vadd.f32 %v4868_v12, %v4798_v59 }
0x124d   : > { %v7061_v4 = vpop.f32.mrf.mxu0  ;;  %v7301_v28 = vpop.eup %7300  ;;  %v4721_v54 = vadd.f32 1.0, %v7299_v34  ;;  %v5110_v21 = vadd.f32 %v5109_v46, %v5039_v3 }
0x124e   : > { %v7114_v9 = vpop.f32.mrf.mxu1  ;;  %v4480_v44 = vadd.f32 1.0, %v7301_v28 }
0x124f   : > { %7302 = vrcp.f32 %v4721_v54 }
0x1250   : > { %7304 = vrcp.f32 %v4480_v44 }
0x125c   : > { %v7303_v58 = vpop.eup %7302 }
0x125d   : > { %v7305_v47 = vpop.eup %7304  ;;  %v5201_v2 = vmul.f32 %v7303_v58, %v9493_v56 }
0x1269   : > { %v4952_v63 = vpop.f32.mrf.mxu0  ;;  %v5193_v23 = vpop.f32.mrf.mxu1 }
0x126a   : > { %v4956_v42 = vadd.f32 %v4952_v63, %v4869_v61  ;;  %v5197_v45 = vadd.f32 %v5193_v23, %v5110_v21 }
0x126b   : > { %v7092_v53 = vpop.f32.mrf.mxu0  ;;  %v7145_v57 = vpop.f32.mrf.mxu1 }
0x126c   : > { %v4958_v14 = vadd.f32 %v5725_v24, %v4956_v42  ;;  %v5199_v15 = vadd.f32 %v5752_v17, %v5197_v45 }
0x126e   : > { %v5726_v8 = vmul.f32 -1.442695, %v4958_v14  ;;  %7306 = vtanh.f32 %v5199_v15 }
0x1270   : > { %7308 = vpow2.f32 %v5726_v8 }
0x127b   : > { %v7307_v52 = vpop.eup %7306 }
0x127c   : > { %v5202_v30 = vmul.f32 %v7307_v52, %v7305_v47 }
0x127d   : > { %v7309_v35 = vpop.eup %7308 }
0x127e   : > { %v4962_v7 = vadd.f32 1.0, %v7309_v35  ;;  %v5203_v55 = vadd.f32 %v5202_v30, %v5201_v2 }
0x1280   : > { %7310 = vrcp.f32 %v4962_v7  ;;  %5214 = vst.msk [vmem:[#allocation3] sm:$0x1] %vm1689_vm6, %v5203_v55  ;;  %5753 = vst.msk [vmem:[%s7585_s18 + $0x3] sm:$0x1] %vm1689_vm6, %v5203_v55 }
0x1281   : > { %7312 = vtanh.f32 %v5203_v55 }
0x1282   : > { %7338 = shalt.err (!%p7335_p4)
}
0x1283   : > { %s7339_s18 = scalar_lea.hbm %s9764_s28, 64  ;;  %s7343_s29 = scalar_lea.hbm %s9903_s12, 128 }
0x1284   : > { %p7340_p7 = scmp.ne.s32.totalorder %s9764_s28, %s7339_s18  ;;  %p7344_p10 = scmp.lt.s32.totalorder %s9764_s28, %s9903_s12 }
0x1285   : > { %p7345_p11 = scmp.lt.s32.totalorder %s7343_s29, %s7339_s18 }
0x1286   : > { %p7341_p8 = pnand %p7340_p7, %p7566_p5 }
0x1287   : > { %p7346_p12 = por %p7345_p11, %p7344_p10 }
0x1288   : > { %p7342_p9 = pneg %p7341_p8 }
0x128a   : > { %p7347_p13 = pnand %p7346_p12, %p7342_p9 }
0x128c   : > { %7350 = shalt.err (!%p7347_p13)
}
0x128d   : > { %s7447_s20 = smov 16   ;;  %s7448_s0 = smov 1   ;;  %v7311_v56 = vpop.eup %7310 }
0x128e   : > { %7170 = dma.vmem_to_hbm [thread:$0]  (%p7566_p5), %s9766_s24, 64, %s9764_s28, %s9773_s21, %s7447_s20, %s7447_s20, %s7448_s0   ;;  %v7313_v22 = vpop.eup %7312 }
0x128f   : > { %s5220_s1 = sand.u32 1, %s7547_s17   ;;  %s5255_s2 = sshll.u32 %s7587_s22, 4  ;;  %v5205_v41 = vmul.f32 %v7313_v22, %v7311_v56  ;;  %s9809_s2 = int_to_ptr.vmem [resolvable:$true] %s5255_s2 }
0x1290   : > { %s5271_s25 = sshll.u32 %s7589_s15, 4  ;;  %s9807_s27 = scalar_lea.hbm %s9904_s13, %s9756_s19  ;;  %s9817_s25 = int_to_ptr.vmem [resolvable:$true] %s5271_s25 }
0x1291   : > { %v5206_v48 = vmul.f32 %v9502_v6, %v5205_v41  ;;  %s9815_s17 = scalar_lea.hbm %s9905_s14, %s9756_s19  ;;  %s9822_s15 = scalar_lea.sflag [#allocation7], %s5220_s1 }
0x1292   : > { %s7351_s24 = scalar_lea.vmem %s9809_s2, 64  ;;  %s7449_s28 = smov [#allocation6]  }
0x1293   : > { %5754 = vst.msk [vmem:[%s7587_s22 + $0x3] sm:$0x1] %vm1689_vm6, %v5206_v48  ;;  %5213 = vst.msk [vmem:[#allocation2] sm:$0x1] %vm1689_vm6, %v5206_v48  ;;  %p7352_p0 = scmp.ne.s32.totalorder %s9809_s2, %s7351_s24  ;;  %s7355_s3 = sshll.u32 %s7449_s28, 4  ;;  %s7356_s3 = int_to_ptr.vmem [resolvable:$false] %s7355_s3 }
0x1294   : > { %s7357_s21 = scalar_lea.vmem %s7356_s3, 128  ;;  %p7358_p3 = scmp.lt.s32.totalorder %s9809_s2, %s7356_s3 }
0x1295   : > { %p7353_p1 = pnand %p7352_p0, %p7566_p5  ;;  %p7359_p4 = scmp.lt.s32.totalorder %s7357_s21, %s7351_s24 }
0x1297   : > { %p7354_p2 = pneg %p7353_p1  ;;  %p7360_p7 = por %p7359_p4, %p7358_p3 }
0x1299   : > { %p7361_p8 = pnand %p7360_p7, %p7354_p2 }
0x129b   : > { %7364 = shalt.err (!%p7361_p8)
}
0x129c   : > { %s7365_s22 = scalar_lea.hbm %s9807_s27, 64  ;;  %s7369_s26 = scalar_lea.hbm %s9904_s13, 128 }
0x129d   : > { %p7366_p9 = scmp.ne.s32.totalorder %s9807_s27, %s7365_s22  ;;  %p7370_p12 = scmp.lt.s32.totalorder %s9807_s27, %s9904_s13 }
0x129e   : > { %p7371_p13 = scmp.lt.s32.totalorder %s7369_s26, %s7365_s22 }
0x129f   : > { %p7367_p10 = pnand %p7366_p9, %p7566_p5 }
0x12a0   : > { %p7372_p0 = por %p7371_p13, %p7370_p12 }
0x12a1   : > { %p7368_p11 = pneg %p7367_p10 }
0x12a3   : > { %p7373_p1 = pnand %p7372_p0, %p7368_p11 }
0x12a5   : > { %7376 = shalt.err (!%p7373_p1)
}
0x12a6   : > { %7171 = dma.vmem_to_hbm [thread:$0]  (%p7566_p5), %s9809_s2, 64, %s9807_s27, %s9822_s15, %s7447_s20, %s7447_s20, %s7448_s0  }
0x12a7   : > { %s7377_s24 = scalar_lea.vmem %s9817_s25, 64  ;;  %s7450_s28 = smov [#allocation8]  }
0x12a8   : > { %p7378_p2 = scmp.ne.s32.totalorder %s9817_s25, %s7377_s24  ;;  %s7381_s3 = sshll.u32 %s7450_s28, 4  ;;  %s7382_s3 = int_to_ptr.vmem [resolvable:$false] %s7381_s3 }
0x12a9   : > { %s7383_s21 = scalar_lea.vmem %s7382_s3, 128  ;;  %p7384_p7 = scmp.lt.s32.totalorder %s9817_s25, %s7382_s3 }
0x12aa   : > { %p7379_p3 = pnand %p7378_p2, %p7566_p5  ;;  %p7385_p8 = scmp.lt.s32.totalorder %s7383_s21, %s7377_s24 }
0x12ac   : > { %p7380_p4 = pneg %p7379_p3  ;;  %p7386_p9 = por %p7385_p8, %p7384_p7 }
0x12ae   : > { %p7387_p10 = pnand %p7386_p9, %p7380_p4 }
0x12b0   : > { %7390 = shalt.err (!%p7387_p10)
}
0x12b1   : > { %s7391_s22 = scalar_lea.hbm %s9815_s17, 64  ;;  %s7395_s19 = scalar_lea.hbm %s9905_s14, 128 }
0x12b2   : > { %p7392_p11 = scmp.ne.s32.totalorder %s9815_s17, %s7391_s22  ;;  %p7396_p0 = scmp.lt.s32.totalorder %s9815_s17, %s9905_s14 }
0x12b3   : > { %p7397_p1 = scmp.lt.s32.totalorder %s7395_s19, %s7391_s22 }
0x12b4   : > { %p7393_p12 = pnand %p7392_p11, %p7566_p5 }
0x12b5   : > { %p7398_p2 = por %p7397_p1, %p7396_p0 }
0x12b6   : > { %p7394_p13 = pneg %p7393_p12 }
0x12b8   : > { %p7399_p3 = pnand %p7398_p2, %p7394_p13 }
0x12ba   : > { %7402 = shalt.err (!%p7399_p3)
}
0x12bb   : > { %7172 = dma.vmem_to_hbm [thread:$0]  (%p7566_p5), %s9817_s25, 64, %s9815_s17, %s9822_s15, %s7447_s20, %s7447_s20, %s7448_s0  }
0x12bc PF: > { %s10217_s18 = sld [smem:[#allocation11_spill]]  ;;  %p7186_p4 = scmp.ge.s32.totalorder %s7441_s16, 2 }
0x12be   : > { %p7177_p7 = pnand %p7186_p4, %p7570_p6 }
0x12c0   : > { %p7178_p8 = pneg %p7177_p7 }
0x12c2   : > { %s5286_s24 = sand.u32 1, %s10217_s18  }
0x12c3   : > { %s5287_s28 = scalar_lea.sflag [#allocation5], %s5286_s24 }
0x12c4   : > { %7420 = dma.done.wait (%p7178_p8), %s5287_s28, 64  }
0x12c5   : > { %7422 = vsyncadd (%p7178_p8), %s5287_s28, 4294967232  ;;  %s10219_s23 = sadd.s32 4294967294, %s7441_s16  }
0x12c6   : > { %s5295_s3 = sand.u32 1, %s10219_s23  }
0x12c7   : > { %s5296_s21 = scalar_lea.sflag [#allocation7], %s5295_s3 }
0x12c8   : > { %7424 = dma.done.wait (%p7178_p8), %s5296_s21, 128  }
0x12c9   : > { %7426 = vsyncadd (%p7178_p8), %s5296_s21, 4294967168  ;;  %s10220_s16 = sld [smem:[#allocation13_spill]]  ;;  %s10223_s29 = smov %s7433_s30 }
0x12ca   : > { %s10221_s20 = sld [smem:[#allocation12_spill]] }
0x12cb   : > { %s10222_s15 = sld [smem:[#allocation14_spill]] }
0x12cf   : > { %p28_p5 = scmp.ge.s32.totalorder %s10220_s16, 4  }
0x12d0   : > { %s10224_s30 = smov %s10221_s20 }
0x12d1   :  { %30 = sbr.rel (!%p28_p5) target bundleno = 10 (0xa), region = 163 }
0x12d6   :  { %5310 = vsyncpa [#allocation5], 1 }
0x12d7   :  { %5312 = vsyncpa [#allocation5 + $0x1], 1 }
0x12d8   :  { %5313 = vsyncpa [#allocation7], 1 }
0x12d9   :  { %5315 = vsyncpa [#allocation7 + $0x1], 1 }

</bundles_post_ra>
